<compile_context>
chip_gen: v5e
topology: v5e:2x2
jax: 0.10.0
libtpu: 0.0.40
codegen_flags: <defaults>
</compile_context>

<pallas_src>
import functools

import jax
import jax.numpy as jnp
import numpy as np
from jax.experimental import pallas as pl
from jax.experimental.pallas import tpu as pltpu

EPS = 1e-5
TM_MAX = 512          # matmul M-tile rows (multiple of 8)
TK_MAX = 512          # matmul K-tile (multiple of 128)
TM_EPI_MAX = 4096     # epilogue M-tile rows
EPI_VMEM_BUDGET = 12 << 20


def _round_up(x, m):
    return (x + m - 1) // m * m


# ----------------------------- Pallas kernels ------------------------------ #
def _mm_stats_kernel(x_ref, w_ref, y_ref, s_ref, q_ref, acc_ref):
    """K-tiled y = x @ w (bf16 in, f32 acc). On the last K step: write y (bf16)
    and per-M-tile partial per-channel sum / sum-of-squares (f32)."""
    @pl.when(pl.program_id(1) == 0)
    def _():
        acc_ref[...] = jnp.zeros_like(acc_ref)

    acc_ref[...] += jnp.dot(x_ref[...], w_ref[...],
                            preferred_element_type=jnp.float32)

    @pl.when(pl.program_id(1) == pl.num_programs(1) - 1)
    def _():
        y = acc_ref[...]
        y_ref[...] = y.astype(y_ref.dtype)
        # Partial stats for this M tile, broadcast over 8 sublanes so the
        # output block is (8, Cp) lane/sublane dense; wrapper divides by 8.
        s_ref[...] = jnp.broadcast_to(jnp.sum(y, axis=0, keepdims=True), s_ref.shape)
        q_ref[...] = jnp.broadcast_to(jnp.sum(y * y, axis=0, keepdims=True), q_ref.shape)


def _mm_proj_stats_kernel(x_ref, w_ref, xs_ref, ws_ref,
                          y_ref, ys_ref, s_ref, q_ref, ss_ref, qs_ref, acc_ref):
    """Conv1 K-tiled matmul + fused 1x1x1 projection shortcut.  The shortcut is
    a single K = Cin_pad matmul on the center-tap activations (done once per M
    tile, on the last K step)."""
    @pl.when(pl.program_id(1) == 0)
    def _():
        acc_ref[...] = jnp.zeros_like(acc_ref)

    acc_ref[...] += jnp.dot(x_ref[...], w_ref[...],
                            preferred_element_type=jnp.float32)

    @pl.when(pl.program_id(1) == pl.num_programs(1) - 1)
    def _():
        y = acc_ref[...]
        y_ref[...] = y.astype(y_ref.dtype)
        s_ref[...] = jnp.broadcast_to(jnp.sum(y, axis=0, keepdims=True), s_ref.shape)
        q_ref[...] = jnp.broadcast_to(jnp.sum(y * y, axis=0, keepdims=True), q_ref.shape)

        ys = jnp.dot(xs_ref[...], ws_ref[...], preferred_element_type=jnp.float32)
        ys_ref[...] = ys.astype(ys_ref.dtype)
        ss_ref[...] = jnp.broadcast_to(jnp.sum(ys, axis=0, keepdims=True), ss_ref.shape)
        qs_ref[...] = jnp.broadcast_to(jnp.sum(ys * ys, axis=0, keepdims=True), qs_ref.shape)


def _bn_act_kernel(y_ref, a_ref, c_ref, o_ref, *, relu):
    out = y_ref[...].astype(jnp.float32) * a_ref[...] + c_ref[...]
    if relu:
        out = jnp.maximum(out, 0.0)
    o_ref[...] = out.astype(o_ref.dtype)


def _bn_add_bn_relu_kernel(y_ref, a_ref, c_ref, r_ref, ar_ref, cr_ref, o_ref):
    out = y_ref[...].astype(jnp.float32) * a_ref[...] + c_ref[...]
    res = r_ref[...].astype(jnp.float32) * ar_ref[...] + cr_ref[...]
    o_ref[...] = jnp.maximum(out + res, 0.0).astype(o_ref.dtype)


def _bn_add_relu_kernel(y_ref, a_ref, c_ref, r_ref, o_ref):
    out = y_ref[...].astype(jnp.float32) * a_ref[...] + c_ref[...]
    o_ref[...] = jnp.maximum(out + r_ref[...].astype(jnp.float32), 0.0).astype(o_ref.dtype)


# --------------------------- pallas_call wrappers --------------------------- #
def _pass1_params(footprint_bytes):
    return pltpu.CompilerParams(
        dimension_semantics=("parallel", "arbitrary"),
        vmem_limit_bytes=int(min(max(2 * footprint_bytes, 32 << 20), 64 << 20)))


def _epi_params():
    return pltpu.CompilerParams(dimension_semantics=("parallel",),
                                vmem_limit_bytes=32 << 20)


def matmul_stats(p, w, tm, tk):
    mp, kp = p.shape
    cp = w.shape[1]
    nm, nk = mp // tm, kp // tk
    footprint = (2 * tm * tk * 2 + 2 * tk * cp * 2 + tm * cp * 4
                 + 2 * tm * cp * 2 + 4 * 8 * cp * 4)
    return pl.pallas_call(
        _mm_stats_kernel,
        out_shape=(jax.ShapeDtypeStruct((mp, cp), jnp.bfloat16),
                   jax.ShapeDtypeStruct((nm * 8, cp), jnp.float32),
                   jax.ShapeDtypeStruct((nm * 8, cp), jnp.float32)),
        grid=(nm, nk),
        in_specs=[pl.BlockSpec((tm, tk), lambda i, k: (i, k)),
                  pl.BlockSpec((tk, cp), lambda i, k: (k, 0))],
        out_specs=(pl.BlockSpec((tm, cp), lambda i, k: (i, 0)),
                   pl.BlockSpec((8, cp), lambda i, k: (i, 0)),
                   pl.BlockSpec((8, cp), lambda i, k: (i, 0))),
        scratch_shapes=[pltpu.VMEM((tm, cp), jnp.float32)],
        compiler_params=_pass1_params(footprint),
    )(p, w)


def matmul_proj_stats(p, w, xs, ws, tm, tk):
    mp, kp = p.shape
    cp = w.shape[1]
    cinp = xs.shape[1]
    nm, nk = mp // tm, kp // tk
    footprint = (2 * tm * tk * 2 + 2 * tk * cp * 2 + tm * cp * 4
                 + 2 * tm * cp * 2 + 8 * 8 * cp * 4
                 + 2 * tm * cinp * 2 + 2 * cinp * cp * 2 + 2 * tm * cp * 2)
    return pl.pallas_call(
        _mm_proj_stats_kernel,
        out_shape=(jax.ShapeDtypeStruct((mp, cp), jnp.bfloat16),
                   jax.ShapeDtypeStruct((mp, cp), jnp.bfloat16),
                   jax.ShapeDtypeStruct((nm * 8, cp), jnp.float32),
                   jax.ShapeDtypeStruct((nm * 8, cp), jnp.float32),
                   jax.ShapeDtypeStruct((nm * 8, cp), jnp.float32),
                   jax.ShapeDtypeStruct((nm * 8, cp), jnp.float32)),
        grid=(nm, nk),
        in_specs=[pl.BlockSpec((tm, tk), lambda i, k: (i, k)),
                  pl.BlockSpec((tk, cp), lambda i, k: (k, 0)),
                  pl.BlockSpec((tm, cinp), lambda i, k: (i, 0)),
                  pl.BlockSpec((cinp, cp), lambda i, k: (0, 0))],
        out_specs=(pl.BlockSpec((tm, cp), lambda i, k: (i, 0)),
                   pl.BlockSpec((tm, cp), lambda i, k: (i, 0)),
                   pl.BlockSpec((8, cp), lambda i, k: (i, 0)),
                   pl.BlockSpec((8, cp), lambda i, k: (i, 0)),
                   pl.BlockSpec((8, cp), lambda i, k: (i, 0)),
                   pl.BlockSpec((8, cp), lambda i, k: (i, 0))),
        scratch_shapes=[pltpu.VMEM((tm, cp), jnp.float32)],
        compiler_params=_pass1_params(footprint),
    )(p, w, xs, ws)


def _epi_tm(mp, tm, row_bytes):
    """Largest multiple of tm that divides mp, capped by rows and VMEM budget."""
    nt = mp // tm
    best = tm
    for f in range(1, nt + 1):
        if nt % f == 0:
            cand = tm * f
            if cand <= TM_EPI_MAX and 2 * cand * row_bytes <= EPI_VMEM_BUDGET:
                best = cand
    return best


def bn_act(y, a, c, tm, *, relu, out_dtype):
    mp, cp = y.shape
    tme = _epi_tm(mp, tm, cp * (y.dtype.itemsize + np.dtype(out_dtype).itemsize))
    kern = functools.partial(_bn_act_kernel, relu=relu)
    return pl.pallas_call(
        kern,
        out_shape=jax.ShapeDtypeStruct((mp, cp), out_dtype),
        grid=(mp // tme,),
        in_specs=[pl.BlockSpec((tme, cp), lambda i: (i, 0)),
                  pl.BlockSpec((1, cp), lambda i: (0, 0)),
                  pl.BlockSpec((1, cp), lambda i: (0, 0))],
        out_specs=pl.BlockSpec((tme, cp), lambda i: (i, 0)),
        compiler_params=_epi_params(),
    )(y, a, c)


def bn_add_bn_relu(y, a, c, r, ar, cr, tm, out_dtype):
    mp, cp = y.shape
    tme = _epi_tm(mp, tm, cp * (y.dtype.itemsize + r.dtype.itemsize
                                + np.dtype(out_dtype).itemsize))
    return pl.pallas_call(
        _bn_add_bn_relu_kernel,
        out_shape=jax.ShapeDtypeStruct((mp, cp), out_dtype),
        grid=(mp // tme,),
        in_specs=[pl.BlockSpec((tme, cp), lambda i: (i, 0)),
                  pl.BlockSpec((1, cp), lambda i: (0, 0)),
                  pl.BlockSpec((1, cp), lambda i: (0, 0)),
                  pl.BlockSpec((tme, cp), lambda i: (i, 0)),
                  pl.BlockSpec((1, cp), lambda i: (0, 0)),
                  pl.BlockSpec((1, cp), lambda i: (0, 0))],
        out_specs=pl.BlockSpec((tme, cp), lambda i: (i, 0)),
        compiler_params=_epi_params(),
    )(y, a, c, r, ar, cr)


def bn_add_relu(y, a, c, r, tm, out_dtype):
    mp, cp = y.shape
    tme = _epi_tm(mp, tm, cp * (y.dtype.itemsize + r.dtype.itemsize
                                + np.dtype(out_dtype).itemsize))
    return pl.pallas_call(
        _bn_add_relu_kernel,
        out_shape=jax.ShapeDtypeStruct((mp, cp), out_dtype),
        grid=(mp // tme,),
        in_specs=[pl.BlockSpec((tme, cp), lambda i: (i, 0)),
                  pl.BlockSpec((1, cp), lambda i: (0, 0)),
                  pl.BlockSpec((1, cp), lambda i: (0, 0)),
                  pl.BlockSpec((tme, cp), lambda i: (i, 0))],
        out_specs=pl.BlockSpec((tme, cp), lambda i: (i, 0)),
        compiler_params=_epi_params(),
    )(y, a, c, r)


# ------------------------------- JAX glue ----------------------------------- #
def im2col3d(x_ndhwc, ksize, stride, pad):
    """x: (N,D,H,W,C) -> patches (N*Do*Ho*Wo, ksize^3*C), out spatial dims."""
    N, D, H, W, C = x_ndhwc.shape
    xp = jnp.pad(x_ndhwc, ((0, 0), (pad, pad), (pad, pad), (pad, pad), (0, 0)))
    Do = (D + 2 * pad - ksize) // stride + 1
    Ho = (H + 2 * pad - ksize) // stride + 1
    Wo = (W + 2 * pad - ksize) // stride + 1
    cols = []
    for kd in range(ksize):
        for kh in range(ksize):
            for kw in range(ksize):
                sl = xp[:, kd:kd + stride * Do:stride,
                           kh:kh + stride * Ho:stride,
                           kw:kw + stride * Wo:stride, :]
                cols.append(sl)
    patches = jnp.concatenate(cols, axis=-1)  # (N,Do,Ho,Wo, k^3*C), (kd,kh,kw,c) order
    return patches.reshape(N * Do * Ho * Wo, ksize ** 3 * C), (N, Do, Ho, Wo)


def _w_torch_to_mat(w_torch):
    """(Cout, Cin, kd, kh, kw) -> (kd*kh*kw*Cin, Cout), matching im2col order."""
    cout = w_torch.shape[0]
    return jnp.transpose(w_torch, (2, 3, 4, 1, 0)).reshape(-1, cout)


def _pad2d(a, rows, cols):
    r, c = a.shape
    if r == rows and c == cols:
        return a
    return jnp.pad(a, ((0, rows - r), (0, cols - c)))


def _pick_m_tiling(m):
    tm = min(TM_MAX, _round_up(m, 8))
    return tm, _round_up(m, tm)


def _pick_k_tiling(k):
    tk = min(TK_MAX, _round_up(k, 128))
    return tk, _round_up(k, tk)


def _bn_affine(s_part, q_part, m_true, gamma, beta, cp):
    """a = g*rsqrt(var+eps), c = b - mean*a from per-tile partial sums (each
    partial was broadcast over 8 sublanes, hence /8).  Padded rows/columns of y
    are exactly zero, so dividing by the true M keeps the stats exact."""
    col_sum = jnp.sum(s_part, axis=0) / 8.0
    col_ssq = jnp.sum(q_part, axis=0) / 8.0
    mean = col_sum / m_true
    # TODO(synk): E[y^2]-mean^2 can cancel when |mean| >> std; a shifted-moment
    # or Welford combine would be more robust on real activations.
    var = jnp.maximum(col_ssq / m_true - mean * mean, 0.0)
    g = jnp.pad(gamma, (0, cp - gamma.shape[0])).astype(jnp.float32)
    b = jnp.pad(beta, (0, cp - beta.shape[0])).astype(jnp.float32)
    a = g * jax.lax.rsqrt(var + EPS)
    c = b - mean * a
    return a.reshape(1, cp), c.reshape(1, cp)


def basic_block_3d(x_ncdhw, params, *, stride):
    x = jnp.transpose(x_ncdhw, (0, 2, 3, 4, 1))            # NDHWC
    N, D, H, W, cin = x.shape
    planes = params["w1"].shape[0]
    cp = _round_up(planes, 128)
    has_proj = (stride != 1) or (cin != planes)

    x_bf = x.astype(jnp.bfloat16)
    # TODO(synk): im2col still materialized in HBM (27x activation bytes);
    # an in-kernel halo-tile im2col would remove most remaining HBM traffic.
    patches1, (n, do, ho, wo) = im2col3d(x_bf, 3, stride, 1)
    m1, k1 = patches1.shape
    tm, mp = _pick_m_tiling(m1)
    tk1, kp1 = _pick_k_tiling(k1)
    p1 = _pad2d(patches1, mp, kp1)
    w1 = _pad2d(_w_torch_to_mat(params["w1"]).astype(jnp.bfloat16), kp1, cp)

    # ------------- conv1 (+ fused 1x1x1 projection shortcut): pass 1 -------------
    if has_proj:
        cinp = _round_up(cin, 128)
        # 1x1x1 stride-s conv input = the center-tap activations of conv1's window.
        xsc = x_bf[:, :stride * do:stride, :stride * ho:stride, :stride * wo:stride, :]
        xsc = _pad2d(xsc.reshape(m1, cin), mp, cinp)
        wsc = _pad2d(_w_torch_to_mat(params["w_sc"]).astype(jnp.bfloat16), cinp, cp)
        y1, ysc, s1, q1, ssc, qsc = matmul_proj_stats(p1, w1, xsc, wsc, tm, tk1)
    else:
        y1, s1, q1 = matmul_stats(p1, w1, tm, tk1)

    # conv1 epilogue: BN + ReLU (bf16 output feeds conv2's bf16 matmul).
    a1, c1 = _bn_affine(s1, q1, m1, params["g1"], params["b1"], cp)
    out1 = bn_act(y1, a1, c1, tm, relu=True, out_dtype=jnp.bfloat16)
    out1 = out1[:m1, :planes].reshape(n, do, ho, wo, planes)

    # ------------------------------ conv2: pass 1 ------------------------------
    patches2, _ = im2col3d(out1, 3, 1, 1)
    k2 = patches2.shape[1]
    tk2, kp2 = _pick_k_tiling(k2)
    p2 = _pad2d(patches2, mp, kp2)
    w2 = _pad2d(_w_torch_to_mat(params["w2"]).astype(jnp.bfloat16), kp2, cp)
    y2, s2, q2 = matmul_stats(p2, w2, tm, tk2)
    a2, c2 = _bn_affine(s2, q2, m1, params["g2"], params["b2"], cp)

    # --------------- residual BN + add + ReLU (fused epilogue) ----------------
    if has_proj:
        asc, csc = _bn_affine(ssc, qsc, m1, params["g_sc"], params["b_sc"], cp)
        out = bn_add_bn_relu(y2, a2, c2, ysc, asc, csc, tm, jnp.float32)
    else:
        res = _pad2d(x_bf.reshape(m1, cin), mp, cp)        # identity shortcut, bf16
        out = bn_add_relu(y2, a2, c2, res, tm, jnp.float32)

    out = out[:m1, :planes].reshape(n, do, ho, wo, planes)
    return jnp.transpose(out, (0, 4, 1, 2, 3)).astype(x_ncdhw.dtype)   # NCDHW


# -------------------------- pure-JAX reference ------------------------------ #
def _ref_block(x_ncdhw, params, stride):
    x = jnp.transpose(x_ncdhw, (0, 2, 3, 4, 1)).astype(jnp.float32)

    def conv(h, w_torch, s, pad):
        w = jnp.transpose(w_torch, (2, 3, 4, 1, 0))  # DHWIO
        return jax.lax.conv_general_dilated(
            h, w, window_strides=(s, s, s), padding=[(pad, pad)] * 3,
            dimension_numbers=("NDHWC", "DHWIO", "NDHWC"),
            precision=jax.lax.Precision.HIGHEST)

    def bn(y, g, b):
        mean = y.mean(axis=(0, 1, 2, 3), keepdims=True)
        var = ((y - mean) ** 2).mean(axis=(0, 1, 2, 3), keepdims=True)
        return (y - mean) * jax.lax.rsqrt(var + EPS) * g + b

    planes = params["w1"].shape[0]
    out = jax.nn.relu(bn(conv(x, params["w1"], stride, 1), params["g1"], params["b1"]))
    out = bn(conv(out, params["w2"], 1, 1), params["g2"], params["b2"])
    if stride != 1 or x.shape[-1] != planes:
        sc = bn(conv(x, params["w_sc"], stride, 0), params["g_sc"], params["b_sc"])
    else:
        sc = x
    out = jax.nn.relu(out + sc)
    return jnp.transpose(out, (0, 4, 1, 2, 3))


# --------------------------------- main ------------------------------------- #
def _make_params(key, in_planes, planes, proj):
    ks = jax.random.split(key, 9)
    p = {
        "w1": 0.1 * jax.random.normal(ks[0], (planes, in_planes, 3, 3, 3), jnp.float32),
        "g1": 1.0 + 0.1 * jax.random.normal(ks[1], (planes,), jnp.float32),
        "b1": 0.1 * jax.random.normal(ks[2], (planes,), jnp.float32),
        "w2": 0.1 * jax.random.normal(ks[3], (planes, planes, 3, 3, 3), jnp.float32),
        "g2": 1.0 + 0.1 * jax.random.normal(ks[4], (planes,), jnp.float32),
        "b2": 0.1 * jax.random.normal(ks[5], (planes,), jnp.float32),
    }
    if proj:
        p["w_sc"] = 0.1 * jax.random.normal(ks[6], (planes, in_planes, 1, 1, 1), jnp.float32)
        p["g_sc"] = 1.0 + 0.1 * jax.random.normal(ks[7], (planes,), jnp.float32)
        p["b_sc"] = 0.1 * jax.random.normal(ks[8], (planes,), jnp.float32)
    return p


if __name__ == "__main__":
    key = jax.random.PRNGKey(0)
    k_x1, k_p1, k_x2, k_p2 = jax.random.split(key, 4)

    # bf16 MXU matmuls + bf16-stored intermediates vs. pure-f32 HIGHEST
    # reference -> agreement at the few-percent level.
    RTOL = ATOL = 3e-2

    # Case 1: projection shortcut (stride 2, 4->8 channels); multi M-tile grid.
    N, in_planes, planes, D, stride = 2, 4, 8, 16, 2
    x1 = jax.random.normal(k_x1, (N, in_planes, D, D, D), jnp.float32)
    params1 = _make_params(k_p1, in_planes, planes, proj=True)
    fwd1 = jax.jit(functools.partial(basic_block_3d, stride=stride))
    out1 = jax.block_until_ready(fwd1(x1, params1))
    ref1 = jax.block_until_ready(_ref_block(x1, params1, stride))
    assert out1.shape == (N, planes, D // stride, D // stride, D // stride), out1.shape
    np.testing.assert_allclose(np.asarray(out1), np.asarray(ref1), rtol=RTOL, atol=ATOL)

    # Case 2: identity shortcut (stride 1, 24->24 channels); exercises the
    # K-tiled accumulator path (K = 27*24 = 648 -> 2 K-tiles of 512) and
    # multi M-tile grid.
    N2, planes2, D2 = 2, 24, 8
    x2 = jax.random.normal(k_x2, (N2, planes2, D2, D2, D2), jnp.float32)
    params2 = _make_params(k_p2, planes2, planes2, proj=False)
    fwd2 = jax.jit(functools.partial(basic_block_3d, stride=1))
    out2 = jax.block_until_ready(fwd2(x2, params2))
    ref2 = jax.block_until_ready(_ref_block(x2, params2, 1))
    assert out2.shape == (N2, planes2, D2, D2, D2), out2.shape
    np.testing.assert_allclose(np.asarray(out2), np.asarray(ref2), rtol=RTOL, atol=ATOL)

    print("KERNEL_OK")
</pallas_src>

<mosaic_0001>
module attributes {stable_mosaic.version = 11 : i64} {
  func.func @_mm_proj_stats_kernel(%arg0: i32, %arg1: i32, %arg2: memref<512x128xbf16, #tpu.memory_space<vmem>>, %arg3: memref<128x128xbf16, #tpu.memory_space<vmem>>, %arg4: memref<512x128xbf16, #tpu.memory_space<vmem>>, %arg5: memref<128x128xbf16, #tpu.memory_space<vmem>>, %arg6: memref<512x128xbf16, #tpu.memory_space<vmem>>, %arg7: memref<512x128xbf16, #tpu.memory_space<vmem>>, %arg8: memref<8x128xf32, #tpu.memory_space<vmem>>, %arg9: memref<8x128xf32, #tpu.memory_space<vmem>>, %arg10: memref<8x128xf32, #tpu.memory_space<vmem>>, %arg11: memref<8x128xf32, #tpu.memory_space<vmem>>, %arg12: memref<512x128xf32, #tpu.memory_space<vmem>>) attributes {dimension_semantics = [#tpu.dimension_semantics<parallel>, #tpu.dimension_semantics<arbitrary>], iteration_bounds = array<i64: 2, 1>, scalar_prefetch = 0 : i64, scratch_operands = 1 : i64, tpu.core_type = #tpu.core_type<tc>, window_params = [{transform_indices = @transform_0, window_bounds = array<i64: 512, 128>}, {transform_indices = @transform_1, window_bounds = array<i64: 128, 128>}, {transform_indices = @transform_2, window_bounds = array<i64: 512, 128>}, {pipeline_mode = #tpu.pipeline_mode<synchronous>, transform_indices = @transform_3, window_bounds = array<i64: 128, 128>}, {transform_indices = @transform_4, window_bounds = array<i64: 512, 128>}, {transform_indices = @transform_5, window_bounds = array<i64: 512, 128>}, {transform_indices = @transform_6, window_bounds = array<i64: 8, 128>}, {transform_indices = @transform_7, window_bounds = array<i64: 8, 128>}, {transform_indices = @transform_8, window_bounds = array<i64: 8, 128>}, {transform_indices = @transform_9, window_bounds = array<i64: 8, 128>}]} {
    %c0_i32 = arith.constant 0 : i32
    %0 = arith.cmpi eq, %arg1, %c0_i32 : i32
    %1 = arith.extui %0 : i1 to i32
    %c0_i32_0 = arith.constant 0 : i32
    %2 = arith.cmpi ne, %1, %c0_i32_0 : i32
    scf.if %2 {
      %cst_10 = arith.constant 0.000000e+00 : f32
      %12 = vector.broadcast %cst_10 : f32 to vector<512x128xf32>
      %c0_11 = arith.constant 0 : index
      %c0_12 = arith.constant 0 : index
      %13 = vector.load %arg12[%c0_11, %c0_12] : memref<512x128xf32, #tpu.memory_space<vmem>>, vector<512x128xf32>
      tpu.vector_store %arg12[%c0_11, %c0_12], %12 {strides = array<i32>} : memref<512x128xf32, #tpu.memory_space<vmem>>, vector<512x128xf32>,
    } else {
    }
    %c0 = arith.constant 0 : index
    %c0_1 = arith.constant 0 : index
    %3 = vector.load %arg12[%c0, %c0_1] : memref<512x128xf32, #tpu.memory_space<vmem>>, vector<512x128xf32>
    %c0_2 = arith.constant 0 : index
    %c0_3 = arith.constant 0 : index
    %4 = vector.load %arg2[%c0_2, %c0_3] : memref<512x128xbf16, #tpu.memory_space<vmem>>, vector<512x128xbf16>
    %c0_4 = arith.constant 0 : index
    %c0_5 = arith.constant 0 : index
    %5 = vector.load %arg3[%c0_4, %c0_5] : memref<128x128xbf16, #tpu.memory_space<vmem>>, vector<128x128xbf16>
    %cst = arith.constant dense<0.000000e+00> : vector<512x128xf32>
    %6 = tpu.matmul %4, %5, %cst {dimension_numbers = #tpu.dot_dimension_numbers<[1], [0], [0], [1], [0, 0, 1, 1], [], []>} : vector<512x128xbf16>, vector<128x128xbf16>, vector<512x128xf32> -> vector<512x128xf32>
    %7 = arith.addf %3, %6 : vector<512x128xf32>
    %c0_6 = arith.constant 0 : index
    %c0_7 = arith.constant 0 : index
    %8 = vector.load %arg12[%c0_6, %c0_7] : memref<512x128xf32, #tpu.memory_space<vmem>>, vector<512x128xf32>
    tpu.vector_store %arg12[%c0_6, %c0_7], %7 {strides = array<i32>} : memref<512x128xf32, #tpu.memory_space<vmem>>, vector<512x128xf32>,
    %c0_i32_8 = arith.constant 0 : i32
    %9 = arith.cmpi eq, %arg1, %c0_i32_8 : i32
    %10 = arith.extui %9 : i1 to i32
    %c0_i32_9 = arith.constant 0 : i32
    %11 = arith.cmpi ne, %10, %c0_i32_9 : i32
    scf.if %11 {
      %c0_10 = arith.constant 0 : index
      %c0_11 = arith.constant 0 : index
      %12 = vector.load %arg12[%c0_10, %c0_11] : memref<512x128xf32, #tpu.memory_space<vmem>>, vector<512x128xf32>
      %13 = arith.truncf %12 : vector<512x128xf32> to vector<512x128xbf16>
      %c0_12 = arith.constant 0 : index
      %c0_13 = arith.constant 0 : index
      %14 = vector.load %arg6[%c0_12, %c0_13] : memref<512x128xbf16, #tpu.memory_space<vmem>>, vector<512x128xbf16>
      tpu.vector_store %arg6[%c0_12, %c0_13], %13 {strides = array<i32>} : memref<512x128xbf16, #tpu.memory_space<vmem>>, vector<512x128xbf16>,
      %cst_14 = arith.constant dense<0.000000e+00> : vector<128xf32>
      %15 = vector.multi_reduction <add>, %12, %cst_14 [0] : vector<512x128xf32> to vector<128xf32>
      %16 = vector.shape_cast %15 : vector<128xf32> to vector<1x128xf32>
      %17 = vector.shape_cast %16 : vector<1x128xf32> to vector<1x128xf32>
      %18 = vector.broadcast %17 : vector<1x128xf32> to vector<8x128xf32>
      %c0_15 = arith.constant 0 : index
      %c0_16 = arith.constant 0 : index
      %19 = vector.load %arg8[%c0_15, %c0_16] : memref<8x128xf32, #tpu.memory_space<vmem>>, vector<8x128xf32>
      tpu.vector_store %arg8[%c0_15, %c0_16], %18 {strides = array<i32>} : memref<8x128xf32, #tpu.memory_space<vmem>>, vector<8x128xf32>,
      %20 = arith.mulf %12, %12 : vector<512x128xf32>
      %cst_17 = arith.constant dense<0.000000e+00> : vector<128xf32>
      %21 = vector.multi_reduction <add>, %20, %cst_17 [0] : vector<512x128xf32> to vector<128xf32>
      %22 = vector.shape_cast %21 : vector<128xf32> to vector<1x128xf32>
      %23 = vector.shape_cast %22 : vector<1x128xf32> to vector<1x128xf32>
      %24 = vector.broadcast %23 : vector<1x128xf32> to vector<8x128xf32>
      %c0_18 = arith.constant 0 : index
      %c0_19 = arith.constant 0 : index
      %25 = vector.load %arg9[%c0_18, %c0_19] : memref<8x128xf32, #tpu.memory_space<vmem>>, vector<8x128xf32>
      tpu.vector_store %arg9[%c0_18, %c0_19], %24 {strides = array<i32>} : memref<8x128xf32, #tpu.memory_space<vmem>>, vector<8x128xf32>,
      %c0_20 = arith.constant 0 : index
      %c0_21 = arith.constant 0 : index
      %26 = vector.load %arg4[%c0_20, %c0_21] : memref<512x128xbf16, #tpu.memory_space<vmem>>, vector<512x128xbf16>
      %c0_22 = arith.constant 0 : index
      %c0_23 = arith.constant 0 : index
      %27 = vector.load %arg5[%c0_22, %c0_23] : memref<128x128xbf16, #tpu.memory_space<vmem>>, vector<128x128xbf16>
      %cst_24 = arith.constant dense<0.000000e+00> : vector<512x128xf32>
      %28 = tpu.matmul %26, %27, %cst_24 {dimension_numbers = #tpu.dot_dimension_numbers<[1], [0], [0], [1], [0, 0, 1, 1], [], []>} : vector<512x128xbf16>, vector<128x128xbf16>, vector<512x128xf32> -> vector<512x128xf32>
      %29 = arith.truncf %28 : vector<512x128xf32> to vector<512x128xbf16>
      %c0_25 = arith.constant 0 : index
      %c0_26 = arith.constant 0 : index
      %30 = vector.load %arg7[%c0_25, %c0_26] : memref<512x128xbf16, #tpu.memory_space<vmem>>, vector<512x128xbf16>
      tpu.vector_store %arg7[%c0_25, %c0_26], %29 {strides = array<i32>} : memref<512x128xbf16, #tpu.memory_space<vmem>>, vector<512x128xbf16>,
      %cst_27 = arith.constant dense<0.000000e+00> : vector<128xf32>
      %31 = vector.multi_reduction <add>, %28, %cst_27 [0] : vector<512x128xf32> to vector<128xf32>
      %32 = vector.shape_cast %31 : vector<128xf32> to vector<1x128xf32>
      %33 = vector.shape_cast %32 : vector<1x128xf32> to vector<1x128xf32>
      %34 = vector.broadcast %33 : vector<1x128xf32> to vector<8x128xf32>
      %c0_28 = arith.constant 0 : index
      %c0_29 = arith.constant 0 : index
      %35 = vector.load %arg10[%c0_28, %c0_29] : memref<8x128xf32, #tpu.memory_space<vmem>>, vector<8x128xf32>
      tpu.vector_store %arg10[%c0_28, %c0_29], %34 {strides = array<i32>} : memref<8x128xf32, #tpu.memory_space<vmem>>, vector<8x128xf32>,
      %36 = arith.mulf %28, %28 : vector<512x128xf32>
      %cst_30 = arith.constant dense<0.000000e+00> : vector<128xf32>
      %37 = vector.multi_reduction <add>, %36, %cst_30 [0] : vector<512x128xf32> to vector<128xf32>
      %38 = vector.shape_cast %37 : vector<128xf32> to vector<1x128xf32>
      %39 = vector.shape_cast %38 : vector<1x128xf32> to vector<1x128xf32>
      %40 = vector.broadcast %39 : vector<1x128xf32> to vector<8x128xf32>
      %c0_31 = arith.constant 0 : index
      %c0_32 = arith.constant 0 : index
      %41 = vector.load %arg11[%c0_31, %c0_32] : memref<8x128xf32, #tpu.memory_space<vmem>>, vector<8x128xf32>
      tpu.vector_store %arg11[%c0_31, %c0_32], %40 {strides = array<i32>} : memref<8x128xf32, #tpu.memory_space<vmem>>, vector<8x128xf32>,
    } else {
    }
    return
  }
  func.func @transform_0(%arg0: i32, %arg1: i32) -> (i32, i32) {
    %c0_i32 = arith.constant 0 : i32
    return %arg0, %arg1 : i32, i32
  }
  func.func @transform_1(%arg0: i32, %arg1: i32) -> (i32, i32) {
    %c0_i32 = arith.constant 0 : i32
    %c0_i32_0 = arith.constant 0 : i32
    return %arg1, %c0_i32 : i32, i32
  }
  func.func @transform_2(%arg0: i32, %arg1: i32) -> (i32, i32) {
    %c0_i32 = arith.constant 0 : i32
    %c0_i32_0 = arith.constant 0 : i32
    return %arg0, %c0_i32 : i32, i32
  }
  func.func @transform_3(%arg0: i32, %arg1: i32) -> (i32, i32) {
    %c0_i32 = arith.constant 0 : i32
    %c0_i32_0 = arith.constant 0 : i32
    %c0_i32_1 = arith.constant 0 : i32
    return %c0_i32, %c0_i32_0 : i32, i32
  }
  func.func @transform_4(%arg0: i32, %arg1: i32) -> (i32, i32) {
    %c0_i32 = arith.constant 0 : i32
    %c0_i32_0 = arith.constant 0 : i32
    return %arg0, %c0_i32 : i32, i32
  }
  func.func @transform_5(%arg0: i32, %arg1: i32) -> (i32, i32) {
    %c0_i32 = arith.constant 0 : i32
    %c0_i32_0 = arith.constant 0 : i32
    return %arg0, %c0_i32 : i32, i32
  }
  func.func @transform_6(%arg0: i32, %arg1: i32) -> (i32, i32) {
    %c0_i32 = arith.constant 0 : i32
    %c0_i32_0 = arith.constant 0 : i32
    return %arg0, %c0_i32 : i32, i32
  }
  func.func @transform_7(%arg0: i32, %arg1: i32) -> (i32, i32) {
    %c0_i32 = arith.constant 0 : i32
    %c0_i32_0 = arith.constant 0 : i32
    return %arg0, %c0_i32 : i32, i32
  }
  func.func @transform_8(%arg0: i32, %arg1: i32) -> (i32, i32) {
    %c0_i32 = arith.constant 0 : i32
    %c0_i32_0 = arith.constant 0 : i32
    return %arg0, %c0_i32 : i32, i32
  }
  func.func @transform_9(%arg0: i32, %arg1: i32) -> (i32, i32) {
    %c0_i32 = arith.constant 0 : i32
    %c0_i32_0 = arith.constant 0 : i32
    return %arg0, %c0_i32 : i32, i32
  }
}

module attributes {stable_mosaic.version = 11 : i64} {
  func.func @_bn_act_kernel(%arg0: i32, %arg1: memref<1024x128xbf16, #tpu.memory_space<vmem>>, %arg2: memref<1x128xf32, #tpu.memory_space<vmem>>, %arg3: memref<1x128xf32, #tpu.memory_space<vmem>>, %arg4: memref<1024x128xbf16, #tpu.memory_space<vmem>>) attributes {dimension_semantics = [#tpu.dimension_semantics<parallel>], iteration_bounds = array<i64: 1>, scalar_prefetch = 0 : i64, scratch_operands = 0 : i64, tpu.core_type = #tpu.core_type<tc>, window_params = [{transform_indices = @transform_0, window_bounds = array<i64: 1024, 128>}, {pipeline_mode = #tpu.pipeline_mode<synchronous>, transform_indices = @transform_1, window_bounds = array<i64: 1, 128>}, {pipeline_mode = #tpu.pipeline_mode<synchronous>, transform_indices = @transform_2, window_bounds = array<i64: 1, 128>}, {transform_indices = @transform_3, window_bounds = array<i64: 1024, 128>}]} {
    %c0 = arith.constant 0 : index
    %c0_0 = arith.constant 0 : index
    %0 = vector.load %arg1[%c0, %c0_0] : memref<1024x128xbf16, #tpu.memory_space<vmem>>, vector<1024x128xbf16>
    %1 = arith.extf %0 : vector<1024x128xbf16> to vector<1024x128xf32>
    %c0_1 = arith.constant 0 : index
    %c0_2 = arith.constant 0 : index
    %2 = vector.load %arg2[%c0_1, %c0_2] : memref<1x128xf32, #tpu.memory_space<vmem>>, vector<1x128xf32>
    %3 = vector.broadcast %2 : vector<1x128xf32> to vector<1024x128xf32>
    %4 = arith.mulf %1, %3 : vector<1024x128xf32>
    %c0_3 = arith.constant 0 : index
    %c0_4 = arith.constant 0 : index
    %5 = vector.load %arg3[%c0_3, %c0_4] : memref<1x128xf32, #tpu.memory_space<vmem>>, vector<1x128xf32>
    %6 = vector.broadcast %5 : vector<1x128xf32> to vector<1024x128xf32>
    %7 = arith.addf %4, %6 : vector<1024x128xf32>
    %cst = arith.constant 0.000000e+00 : f32
    %8 = vector.broadcast %cst : f32 to vector<1024x128xf32>
    %9 = arith.maximumf %7, %8 : vector<1024x128xf32>
    %10 = arith.truncf %9 : vector<1024x128xf32> to vector<1024x128xbf16>
    %c0_5 = arith.constant 0 : index
    %c0_6 = arith.constant 0 : index
    %11 = vector.load %arg4[%c0_5, %c0_6] : memref<1024x128xbf16, #tpu.memory_space<vmem>>, vector<1024x128xbf16>
    tpu.vector_store %arg4[%c0_5, %c0_6], %10 {strides = array<i32>} : memref<1024x128xbf16, #tpu.memory_space<vmem>>, vector<1024x128xbf16>,
    return
  }
  func.func @transform_0(%arg0: i32) -> (i32, i32) {
    %c0_i32 = arith.constant 0 : i32
    %c0_i32_0 = arith.constant 0 : i32
    return %arg0, %c0_i32 : i32, i32
  }
  func.func @transform_1(%arg0: i32) -> (i32, i32) {
    %c0_i32 = arith.constant 0 : i32
    %c0_i32_0 = arith.constant 0 : i32
    %c0_i32_1 = arith.constant 0 : i32
    return %c0_i32, %c0_i32_0 : i32, i32
  }
  func.func @transform_2(%arg0: i32) -> (i32, i32) {
    %c0_i32 = arith.constant 0 : i32
    %c0_i32_0 = arith.constant 0 : i32
    %c0_i32_1 = arith.constant 0 : i32
    return %c0_i32, %c0_i32_0 : i32, i32
  }
  func.func @transform_3(%arg0: i32) -> (i32, i32) {
    %c0_i32 = arith.constant 0 : i32
    %c0_i32_0 = arith.constant 0 : i32
    return %arg0, %c0_i32 : i32, i32
  }
}

module attributes {stable_mosaic.version = 11 : i64} {
  func.func @_mm_stats_kernel(%arg0: i32, %arg1: i32, %arg2: memref<512x256xbf16, #tpu.memory_space<vmem>>, %arg3: memref<256x128xbf16, #tpu.memory_space<vmem>>, %arg4: memref<512x128xbf16, #tpu.memory_space<vmem>>, %arg5: memref<8x128xf32, #tpu.memory_space<vmem>>, %arg6: memref<8x128xf32, #tpu.memory_space<vmem>>, %arg7: memref<512x128xf32, #tpu.memory_space<vmem>>) attributes {dimension_semantics = [#tpu.dimension_semantics<parallel>, #tpu.dimension_semantics<arbitrary>], iteration_bounds = array<i64: 2, 1>, scalar_prefetch = 0 : i64, scratch_operands = 1 : i64, tpu.core_type = #tpu.core_type<tc>, window_params = [{transform_indices = @transform_0, window_bounds = array<i64: 512, 256>}, {transform_indices = @transform_1, window_bounds = array<i64: 256, 128>}, {transform_indices = @transform_2, window_bounds = array<i64: 512, 128>}, {transform_indices = @transform_3, window_bounds = array<i64: 8, 128>}, {transform_indices = @transform_4, window_bounds = array<i64: 8, 128>}]} {
    %c0_i32 = arith.constant 0 : i32
    %0 = arith.cmpi eq, %arg1, %c0_i32 : i32
    %1 = arith.extui %0 : i1 to i32
    %c0_i32_0 = arith.constant 0 : i32
    %2 = arith.cmpi ne, %1, %c0_i32_0 : i32
    scf.if %2 {
      %cst_10 = arith.constant 0.000000e+00 : f32
      %12 = vector.broadcast %cst_10 : f32 to vector<512x128xf32>
      %c0_11 = arith.constant 0 : index
      %c0_12 = arith.constant 0 : index
      %13 = vector.load %arg7[%c0_11, %c0_12] : memref<512x128xf32, #tpu.memory_space<vmem>>, vector<512x128xf32>
      tpu.vector_store %arg7[%c0_11, %c0_12], %12 {strides = array<i32>} : memref<512x128xf32, #tpu.memory_space<vmem>>, vector<512x128xf32>,
    } else {
    }
    %c0 = arith.constant 0 : index
    %c0_1 = arith.constant 0 : index
    %3 = vector.load %arg7[%c0, %c0_1] : memref<512x128xf32, #tpu.memory_space<vmem>>, vector<512x128xf32>
    %c0_2 = arith.constant 0 : index
    %c0_3 = arith.constant 0 : index
    %4 = vector.load %arg2[%c0_2, %c0_3] : memref<512x256xbf16, #tpu.memory_space<vmem>>, vector<512x256xbf16>
    %c0_4 = arith.constant 0 : index
    %c0_5 = arith.constant 0 : index
    %5 = vector.load %arg3[%c0_4, %c0_5] : memref<256x128xbf16, #tpu.memory_space<vmem>>, vector<256x128xbf16>
    %cst = arith.constant dense<0.000000e+00> : vector<512x128xf32>
    %6 = tpu.matmul %4, %5, %cst {dimension_numbers = #tpu.dot_dimension_numbers<[1], [0], [0], [1], [0, 0, 1, 1], [], []>} : vector<512x256xbf16>, vector<256x128xbf16>, vector<512x128xf32> -> vector<512x128xf32>
    %7 = arith.addf %3, %6 : vector<512x128xf32>
    %c0_6 = arith.constant 0 : index
    %c0_7 = arith.constant 0 : index
    %8 = vector.load %arg7[%c0_6, %c0_7] : memref<512x128xf32, #tpu.memory_space<vmem>>, vector<512x128xf32>
    tpu.vector_store %arg7[%c0_6, %c0_7], %7 {strides = array<i32>} : memref<512x128xf32, #tpu.memory_space<vmem>>, vector<512x128xf32>,
    %c0_i32_8 = arith.constant 0 : i32
    %9 = arith.cmpi eq, %arg1, %c0_i32_8 : i32
    %10 = arith.extui %9 : i1 to i32
    %c0_i32_9 = arith.constant 0 : i32
    %11 = arith.cmpi ne, %10, %c0_i32_9 : i32
    scf.if %11 {
      %c0_10 = arith.constant 0 : index
      %c0_11 = arith.constant 0 : index
      %12 = vector.load %arg7[%c0_10, %c0_11] : memref<512x128xf32, #tpu.memory_space<vmem>>, vector<512x128xf32>
      %13 = arith.truncf %12 : vector<512x128xf32> to vector<512x128xbf16>
      %c0_12 = arith.constant 0 : index
      %c0_13 = arith.constant 0 : index
      %14 = vector.load %arg4[%c0_12, %c0_13] : memref<512x128xbf16, #tpu.memory_space<vmem>>, vector<512x128xbf16>
      tpu.vector_store %arg4[%c0_12, %c0_13], %13 {strides = array<i32>} : memref<512x128xbf16, #tpu.memory_space<vmem>>, vector<512x128xbf16>,
      %cst_14 = arith.constant dense<0.000000e+00> : vector<128xf32>
      %15 = vector.multi_reduction <add>, %12, %cst_14 [0] : vector<512x128xf32> to vector<128xf32>
      %16 = vector.shape_cast %15 : vector<128xf32> to vector<1x128xf32>
      %17 = vector.shape_cast %16 : vector<1x128xf32> to vector<1x128xf32>
      %18 = vector.broadcast %17 : vector<1x128xf32> to vector<8x128xf32>
      %c0_15 = arith.constant 0 : index
      %c0_16 = arith.constant 0 : index
      %19 = vector.load %arg5[%c0_15, %c0_16] : memref<8x128xf32, #tpu.memory_space<vmem>>, vector<8x128xf32>
      tpu.vector_store %arg5[%c0_15, %c0_16], %18 {strides = array<i32>} : memref<8x128xf32, #tpu.memory_space<vmem>>, vector<8x128xf32>,
      %20 = arith.mulf %12, %12 : vector<512x128xf32>
      %cst_17 = arith.constant dense<0.000000e+00> : vector<128xf32>
      %21 = vector.multi_reduction <add>, %20, %cst_17 [0] : vector<512x128xf32> to vector<128xf32>
      %22 = vector.shape_cast %21 : vector<128xf32> to vector<1x128xf32>
      %23 = vector.shape_cast %22 : vector<1x128xf32> to vector<1x128xf32>
      %24 = vector.broadcast %23 : vector<1x128xf32> to vector<8x128xf32>
      %c0_18 = arith.constant 0 : index
      %c0_19 = arith.constant 0 : index
      %25 = vector.load %arg6[%c0_18, %c0_19] : memref<8x128xf32, #tpu.memory_space<vmem>>, vector<8x128xf32>
      tpu.vector_store %arg6[%c0_18, %c0_19], %24 {strides = array<i32>} : memref<8x128xf32, #tpu.memory_space<vmem>>, vector<8x128xf32>,
    } else {
    }
    return
  }
  func.func @transform_0(%arg0: i32, %arg1: i32) -> (i32, i32) {
    %c0_i32 = arith.constant 0 : i32
    return %arg0, %arg1 : i32, i32
  }
  func.func @transform_1(%arg0: i32, %arg1: i32) -> (i32, i32) {
    %c0_i32 = arith.constant 0 : i32
    %c0_i32_0 = arith.constant 0 : i32
    return %arg1, %c0_i32 : i32, i32
  }
  func.func @transform_2(%arg0: i32, %arg1: i32) -> (i32, i32) {
    %c0_i32 = arith.constant 0 : i32
    %c0_i32_0 = arith.constant 0 : i32
    return %arg0, %c0_i32 : i32, i32
  }
  func.func @transform_3(%arg0: i32, %arg1: i32) -> (i32, i32) {
    %c0_i32 = arith.constant 0 : i32
    %c0_i32_0 = arith.constant 0 : i32
    return %arg0, %c0_i32 : i32, i32
  }
  func.func @transform_4(%arg0: i32, %arg1: i32) -> (i32, i32) {
    %c0_i32 = arith.constant 0 : i32
    %c0_i32_0 = arith.constant 0 : i32
    return %arg0, %c0_i32 : i32, i32
  }
}

module attributes {stable_mosaic.version = 11 : i64} {
  func.func @_bn_add_bn_relu_kernel(%arg0: i32, %arg1: memref<1024x128xbf16, #tpu.memory_space<vmem>>, %arg2: memref<1x128xf32, #tpu.memory_space<vmem>>, %arg3: memref<1x128xf32, #tpu.memory_space<vmem>>, %arg4: memref<1024x128xbf16, #tpu.memory_space<vmem>>, %arg5: memref<1x128xf32, #tpu.memory_space<vmem>>, %arg6: memref<1x128xf32, #tpu.memory_space<vmem>>, %arg7: memref<1024x128xf32, #tpu.memory_space<vmem>>) attributes {dimension_semantics = [#tpu.dimension_semantics<parallel>], iteration_bounds = array<i64: 1>, scalar_prefetch = 0 : i64, scratch_operands = 0 : i64, tpu.core_type = #tpu.core_type<tc>, window_params = [{transform_indices = @transform_0, window_bounds = array<i64: 1024, 128>}, {pipeline_mode = #tpu.pipeline_mode<synchronous>, transform_indices = @transform_1, window_bounds = array<i64: 1, 128>}, {pipeline_mode = #tpu.pipeline_mode<synchronous>, transform_indices = @transform_2, window_bounds = array<i64: 1, 128>}, {transform_indices = @transform_3, window_bounds = array<i64: 1024, 128>}, {pipeline_mode = #tpu.pipeline_mode<synchronous>, transform_indices = @transform_4, window_bounds = array<i64: 1, 128>}, {pipeline_mode = #tpu.pipeline_mode<synchronous>, transform_indices = @transform_5, window_bounds = array<i64: 1, 128>}, {transform_indices = @transform_6, window_bounds = array<i64: 1024, 128>}]} {
    %c0 = arith.constant 0 : index
    %c0_0 = arith.constant 0 : index
    %0 = vector.load %arg1[%c0, %c0_0] : memref<1024x128xbf16, #tpu.memory_space<vmem>>, vector<1024x128xbf16>
    %1 = arith.extf %0 : vector<1024x128xbf16> to vector<1024x128xf32>
    %c0_1 = arith.constant 0 : index
    %c0_2 = arith.constant 0 : index
    %2 = vector.load %arg2[%c0_1, %c0_2] : memref<1x128xf32, #tpu.memory_space<vmem>>, vector<1x128xf32>
    %3 = vector.broadcast %2 : vector<1x128xf32> to vector<1024x128xf32>
    %4 = arith.mulf %1, %3 : vector<1024x128xf32>
    %c0_3 = arith.constant 0 : index
    %c0_4 = arith.constant 0 : index
    %5 = vector.load %arg3[%c0_3, %c0_4] : memref<1x128xf32, #tpu.memory_space<vmem>>, vector<1x128xf32>
    %6 = vector.broadcast %5 : vector<1x128xf32> to vector<1024x128xf32>
    %7 = arith.addf %4, %6 : vector<1024x128xf32>
    %c0_5 = arith.constant 0 : index
    %c0_6 = arith.constant 0 : index
    %8 = vector.load %arg4[%c0_5, %c0_6] : memref<1024x128xbf16, #tpu.memory_space<vmem>>, vector<1024x128xbf16>
    %9 = arith.extf %8 : vector<1024x128xbf16> to vector<1024x128xf32>
    %c0_7 = arith.constant 0 : index
    %c0_8 = arith.constant 0 : index
    %10 = vector.load %arg5[%c0_7, %c0_8] : memref<1x128xf32, #tpu.memory_space<vmem>>, vector<1x128xf32>
    %11 = vector.broadcast %10 : vector<1x128xf32> to vector<1024x128xf32>
    %12 = arith.mulf %9, %11 : vector<1024x128xf32>
    %c0_9 = arith.constant 0 : index
    %c0_10 = arith.constant 0 : index
    %13 = vector.load %arg6[%c0_9, %c0_10] : memref<1x128xf32, #tpu.memory_space<vmem>>, vector<1x128xf32>
    %14 = vector.broadcast %13 : vector<1x128xf32> to vector<1024x128xf32>
    %15 = arith.addf %12, %14 : vector<1024x128xf32>
    %16 = arith.addf %7, %15 : vector<1024x128xf32>
    %cst = arith.constant 0.000000e+00 : f32
    %17 = vector.broadcast %cst : f32 to vector<1024x128xf32>
    %18 = arith.maximumf %16, %17 : vector<1024x128xf32>
    %c0_11 = arith.constant 0 : index
    %c0_12 = arith.constant 0 : index
    %19 = vector.load %arg7[%c0_11, %c0_12] : memref<1024x128xf32, #tpu.memory_space<vmem>>, vector<1024x128xf32>
    tpu.vector_store %arg7[%c0_11, %c0_12], %18 {strides = array<i32>} : memref<1024x128xf32, #tpu.memory_space<vmem>>, vector<1024x128xf32>,
    return
  }
  func.func @transform_0(%arg0: i32) -> (i32, i32) {
    %c0_i32 = arith.constant 0 : i32
    %c0_i32_0 = arith.constant 0 : i32
    return %arg0, %c0_i32 : i32, i32
  }
  func.func @transform_1(%arg0: i32) -> (i32, i32) {
    %c0_i32 = arith.constant 0 : i32
    %c0_i32_0 = arith.constant 0 : i32
    %c0_i32_1 = arith.constant 0 : i32
    return %c0_i32, %c0_i32_0 : i32, i32
  }
  func.func @transform_2(%arg0: i32) -> (i32, i32) {
    %c0_i32 = arith.constant 0 : i32
    %c0_i32_0 = arith.constant 0 : i32
    %c0_i32_1 = arith.constant 0 : i32
    return %c0_i32, %c0_i32_0 : i32, i32
  }
  func.func @transform_3(%arg0: i32) -> (i32, i32) {
    %c0_i32 = arith.constant 0 : i32
    %c0_i32_0 = arith.constant 0 : i32
    return %arg0, %c0_i32 : i32, i32
  }
  func.func @transform_4(%arg0: i32) -> (i32, i32) {
    %c0_i32 = arith.constant 0 : i32
    %c0_i32_0 = arith.constant 0 : i32
    %c0_i32_1 = arith.constant 0 : i32
    return %c0_i32, %c0_i32_0 : i32, i32
  }
  func.func @transform_5(%arg0: i32) -> (i32, i32) {
    %c0_i32 = arith.constant 0 : i32
    %c0_i32_0 = arith.constant 0 : i32
    %c0_i32_1 = arith.constant 0 : i32
    return %c0_i32, %c0_i32_0 : i32, i32
  }
  func.func @transform_6(%arg0: i32) -> (i32, i32) {
    %c0_i32 = arith.constant 0 : i32
    %c0_i32_0 = arith.constant 0 : i32
    return %arg0, %c0_i32 : i32, i32
  }
}

</mosaic_0001>

<bundles_post_ra>
// kernel: basic_block_3d.5
= control target key start
LH: loop header
LB: loop body
LE: loop exit
PB: predicated region body
PF: predicated region fallthrough
CT: control target
= control target key end

     0   :  { %s2308_s0 = inlined_call_operand.vmem [shape: bf16[1024,128], index: 0, kind: input, shape index: {}]   ;;  %s2309_s1 = inlined_call_operand.vmem [shape: f32[1,128], index: 1, kind: input, shape index: {}]   ;;  %s2310_s2 = inlined_call_operand.vmem [shape: f32[1,128], index: 2, kind: input, shape index: {}]   ;;  %s2311_s3 = inlined_call_operand.vmem [shape: bf16[1024,128], index: 3, kind: output, shape index: {}]  }
   0x1   :  { %v923_v0 = vld [vmem:[%s2308_s0] sm:$0xff]   ;;  %v1498_v5 = vld [vmem:[%s2308_s0 + $0x8] sm:$0xff]   ;;  %v1499_v8 = vld [vmem:[%s2308_s0 + $0x10] sm:$0xff]  }
   0x2   :  { %v1654_v1 = vld [vmem:[%s2309_s1] ss:$0 sm:$0xff]  ;;  %v924_v2 = vunpack.c.l.bf16 %v923_v0  ;;  %v925_v3 = vunpack.c.h.bf16 %v923_v0  ;;  %v928_v6 = vunpack.c.l.bf16 %v1498_v5  ;;  %v929_v7 = vunpack.c.h.bf16 %v1498_v5  ;;  %v1500_v9 = vld [vmem:[%s2308_s0 + $0x18] sm:$0xff]   ;;  %v1502_v35 = vld [vmem:[%s2308_s0 + $0x28] sm:$0xff]  }
   0x3   :  { %v1659_v4 = vld [vmem:[%s2310_s2] ss:$0 sm:$0xff]  ;;  %v932_v12 = vunpack.c.l.bf16 %v1499_v8  ;;  %v933_v13 = vunpack.c.h.bf16 %v1499_v8  ;;  %v936_v16 = vunpack.c.l.bf16 %v1500_v9  ;;  %v937_v17 = vunpack.c.h.bf16 %v1500_v9  ;;  %v1503_v40 = vld [vmem:[%s2308_s0 + $0x30] sm:$0xff]   ;;  %v1504_v45 = vld [vmem:[%s2308_s0 + $0x38] sm:$0xff]  }
   0x4   :  { %v274_v10 = vmul.f32 %v1654_v1, %v924_v2  ;;  %v275_v11 = vmul.f32 %v1654_v1, %v925_v3  ;;  %v276_v14 = vmul.f32 %v1654_v1, %v928_v6  ;;  %v277_v15 = vmul.f32 %v1654_v1, %v929_v7  ;;  %v1501_v26 = vld [vmem:[%s2308_s0 + $0x20] sm:$0xff]  }
   0x5   :  { %v278_v20 = vmul.f32 %v1654_v1, %v932_v12  ;;  %v279_v21 = vmul.f32 %v1654_v1, %v933_v13  ;;  %v280_v24 = vmul.f32 %v1654_v1, %v936_v16  ;;  %v281_v25 = vmul.f32 %v1654_v1, %v937_v17  ;;  %v1505_v62 = vld [vmem:[%s2308_s0 + $0x40] sm:$0xff]   ;;  %v1506_v13 = vld [vmem:[%s2308_s0 + $0x48] sm:$0xff]  }
   0x6   :  { %v406_v18 = vadd.f32 %v1659_v4, %v274_v10  ;;  %v407_v19 = vadd.f32 %v1659_v4, %v275_v11  ;;  %v408_v22 = vadd.f32 %v1659_v4, %v276_v14  ;;  %v409_v23 = vadd.f32 %v1659_v4, %v277_v15 }
   0x7   :  { %v410_v29 = vadd.f32 %v1659_v4, %v278_v20  ;;  %v411_v30 = vadd.f32 %v1659_v4, %v279_v21  ;;  %v412_v33 = vadd.f32 %v1659_v4, %v280_v24  ;;  %v413_v34 = vadd.f32 %v1659_v4, %v281_v25 }
   0x8   :  { %v534_v27 = vmax.f32 %v406_v18, 0.0  ;;  %v535_v28 = vmax.f32 %v407_v19, 0.0  ;;  %v536_v31 = vmax.f32 %v408_v22, 0.0  ;;  %v537_v32 = vmax.f32 %v409_v23, 0.0  ;;  %v1507_v18 = vld [vmem:[%s2308_s0 + $0x50] sm:$0xff]   ;;  %v1508_v23 = vld [vmem:[%s2308_s0 + $0x58] sm:$0xff]  }
   0x9   :  { %v538_v37 = vmax.f32 %v410_v29, 0.0  ;;  %v539_v38 = vmax.f32 %v411_v30, 0.0  ;;  %v940_v39 = vunpack.c.l.bf16 %v1501_v26  ;;  %v540_v42 = vmax.f32 %v412_v33, 0.0 }
   0xa   :  { %v1181_v36 = vpack.c.bf16 %v535_v28, %v534_v27  ;;  %v1186_v41 = vpack.c.bf16 %v537_v32, %v536_v31  ;;  %v541_v43 = vmax.f32 %v413_v34, 0.0  ;;  %v941_v44 = vunpack.c.h.bf16 %v1501_v26 }
   0xb   :  { %v1191_v46 = vpack.c.bf16 %v539_v38, %v538_v37  ;;  %v282_v47 = vmul.f32 %v1654_v1, %v940_v39  ;;  %v944_v48 = vunpack.c.l.bf16 %v1502_v35  ;;  %v945_v49 = vunpack.c.h.bf16 %v1502_v35 }
   0xc   :  { %1182 = vst [vmem:[%s2311_s3] sm:$0xff] %v1181_v36   ;;  %v1196_v50 = vpack.c.bf16 %v541_v43, %v540_v42  ;;  %v283_v51 = vmul.f32 %v1654_v1, %v941_v44  ;;  %v948_v52 = vunpack.c.l.bf16 %v1503_v40  ;;  %v949_v53 = vunpack.c.h.bf16 %v1503_v40  ;;  %v1509_v36 = vld [vmem:[%s2308_s0 + $0x60] sm:$0xff]  }
   0xd   :  { %1561 = vst [vmem:[%s2311_s3 + $0x8] sm:$0xff] %v1186_v41   ;;  %v414_v54 = vadd.f32 %v1659_v4, %v282_v47  ;;  %v284_v55 = vmul.f32 %v1654_v1, %v944_v48  ;;  %v285_v56 = vmul.f32 %v1654_v1, %v945_v49  ;;  %v952_v57 = vunpack.c.l.bf16 %v1504_v45 }
   0xe   :  { %1562 = vst [vmem:[%s2311_s3 + $0x10] sm:$0xff] %v1191_v46   ;;  %v415_v58 = vadd.f32 %v1659_v4, %v283_v51  ;;  %v286_v59 = vmul.f32 %v1654_v1, %v948_v52  ;;  %v287_v60 = vmul.f32 %v1654_v1, %v949_v53  ;;  %v953_v61 = vunpack.c.h.bf16 %v1504_v45  ;;  %v1510_v53 = vld [vmem:[%s2308_s0 + $0x68] sm:$0xff]  }
   0xf   :  { %1563 = vst [vmem:[%s2311_s3 + $0x18] sm:$0xff] %v1196_v50   ;;  %v542_v63 = vmax.f32 %v414_v54, 0.0  ;;  %v416_v0 = vadd.f32 %v1659_v4, %v284_v55  ;;  %v417_v2 = vadd.f32 %v1659_v4, %v285_v56  ;;  %v288_v3 = vmul.f32 %v1654_v1, %v952_v57 }
  0x10   :  { %v543_v5 = vmax.f32 %v415_v58, 0.0  ;;  %v418_v6 = vadd.f32 %v1659_v4, %v286_v59  ;;  %v419_v7 = vadd.f32 %v1659_v4, %v287_v60  ;;  %v289_v8 = vmul.f32 %v1654_v1, %v953_v61  ;;  %v1511_v58 = vld [vmem:[%s2308_s0 + $0x70] sm:$0xff]  }
  0x11   :  { %v544_v9 = vmax.f32 %v416_v0, 0.0  ;;  %v545_v10 = vmax.f32 %v417_v2, 0.0  ;;  %v420_v11 = vadd.f32 %v1659_v4, %v288_v3  ;;  %v956_v12 = vunpack.c.l.bf16 %v1505_v62 }
  0x12   :  { %v1201_v14 = vpack.c.bf16 %v543_v5, %v542_v63  ;;  %v546_v15 = vmax.f32 %v418_v6, 0.0  ;;  %v547_v16 = vmax.f32 %v419_v7, 0.0  ;;  %v421_v17 = vadd.f32 %v1659_v4, %v289_v8  ;;  %v1512_v63 = vld [vmem:[%s2308_s0 + $0x78] sm:$0xff]  }
  0x13   :  { %v1206_v19 = vpack.c.bf16 %v545_v10, %v544_v9  ;;  %v548_v20 = vmax.f32 %v420_v11, 0.0  ;;  %v957_v21 = vunpack.c.h.bf16 %v1505_v62  ;;  %v290_v22 = vmul.f32 %v1654_v1, %v956_v12 }
  0x14   :  { %1564 = vst [vmem:[%s2311_s3 + $0x20] sm:$0xff] %v1201_v14   ;;  %v1211_v24 = vpack.c.bf16 %v547_v16, %v546_v15  ;;  %v549_v25 = vmax.f32 %v421_v17, 0.0  ;;  %v960_v26 = vunpack.c.l.bf16 %v1506_v13  ;;  %v961_v27 = vunpack.c.h.bf16 %v1506_v13  ;;  %v1513_v14 = vld [vmem:[%s2308_s0 + $0x80] sm:$0xff]  }
  0x15   :  { %1565 = vst [vmem:[%s2311_s3 + $0x28] sm:$0xff] %v1206_v19   ;;  %v291_v28 = vmul.f32 %v1654_v1, %v957_v21  ;;  %v422_v29 = vadd.f32 %v1659_v4, %v290_v22  ;;  %v964_v30 = vunpack.c.l.bf16 %v1507_v18  ;;  %v965_v31 = vunpack.c.h.bf16 %v1507_v18 }
  0x16   :  { %1566 = vst [vmem:[%s2311_s3 + $0x30] sm:$0xff] %v1211_v24   ;;  %v1216_v32 = vpack.c.bf16 %v549_v25, %v548_v20  ;;  %v292_v33 = vmul.f32 %v1654_v1, %v960_v26  ;;  %v293_v34 = vmul.f32 %v1654_v1, %v961_v27  ;;  %v968_v35 = vunpack.c.l.bf16 %v1508_v23  ;;  %v1514_v27 = vld [vmem:[%s2308_s0 + $0x88] sm:$0xff]  }
  0x17   :  { %v423_v37 = vadd.f32 %v1659_v4, %v291_v28  ;;  %v550_v38 = vmax.f32 %v422_v29, 0.0  ;;  %v294_v39 = vmul.f32 %v1654_v1, %v964_v30  ;;  %v295_v40 = vmul.f32 %v1654_v1, %v965_v31 }
  0x18   :  { %1567 = vst [vmem:[%s2311_s3 + $0x38] sm:$0xff] %v1216_v32   ;;  %v424_v41 = vadd.f32 %v1659_v4, %v292_v33  ;;  %v425_v42 = vadd.f32 %v1659_v4, %v293_v34  ;;  %v969_v43 = vunpack.c.h.bf16 %v1508_v23  ;;  %v296_v44 = vmul.f32 %v1654_v1, %v968_v35 }
  0x19   :  { %v551_v45 = vmax.f32 %v423_v37, 0.0  ;;  %v426_v46 = vadd.f32 %v1659_v4, %v294_v39  ;;  %v427_v47 = vadd.f32 %v1659_v4, %v295_v40  ;;  %v972_v48 = vunpack.c.l.bf16 %v1509_v36 }
  0x1a   :  { %v552_v49 = vmax.f32 %v424_v41, 0.0  ;;  %v553_v50 = vmax.f32 %v425_v42, 0.0  ;;  %v297_v51 = vmul.f32 %v1654_v1, %v969_v43  ;;  %v428_v52 = vadd.f32 %v1659_v4, %v296_v44  ;;  %v1516_v41 = vld [vmem:[%s2308_s0 + $0x98] sm:$0xff]  }
  0x1b   :  { %v1221_v54 = vpack.c.bf16 %v551_v45, %v550_v38  ;;  %v554_v55 = vmax.f32 %v426_v46, 0.0  ;;  %v555_v56 = vmax.f32 %v427_v47, 0.0  ;;  %v973_v57 = vunpack.c.h.bf16 %v1509_v36  ;;  %v1515_v36 = vld [vmem:[%s2308_s0 + $0x90] sm:$0xff]  }
  0x1c   :  { %v1226_v59 = vpack.c.bf16 %v553_v50, %v552_v49  ;;  %v429_v60 = vadd.f32 %v1659_v4, %v297_v51  ;;  %v556_v61 = vmax.f32 %v428_v52, 0.0  ;;  %v298_v62 = vmul.f32 %v1654_v1, %v972_v48 }
  0x1d   :  { %1568 = vst [vmem:[%s2311_s3 + $0x40] sm:$0xff] %v1221_v54   ;;  %v1231_v0 = vpack.c.bf16 %v555_v56, %v554_v55  ;;  %v299_v2 = vmul.f32 %v1654_v1, %v973_v57  ;;  %v976_v3 = vunpack.c.l.bf16 %v1510_v53  ;;  %v977_v5 = vunpack.c.h.bf16 %v1510_v53  ;;  %v1517_v54 = vld [vmem:[%s2308_s0 + $0xa0] sm:$0xff]  }
  0x1e   :  { %1569 = vst [vmem:[%s2311_s3 + $0x48] sm:$0xff] %v1226_v59   ;;  %v557_v6 = vmax.f32 %v429_v60, 0.0  ;;  %v430_v7 = vadd.f32 %v1659_v4, %v298_v62  ;;  %v980_v8 = vunpack.c.l.bf16 %v1511_v58  ;;  %v981_v9 = vunpack.c.h.bf16 %v1511_v58 }
  0x1f   :  { %1570 = vst [vmem:[%s2311_s3 + $0x50] sm:$0xff] %v1231_v0   ;;  %v431_v10 = vadd.f32 %v1659_v4, %v299_v2  ;;  %v300_v11 = vmul.f32 %v1654_v1, %v976_v3  ;;  %v301_v12 = vmul.f32 %v1654_v1, %v977_v5  ;;  %v984_v13 = vunpack.c.l.bf16 %v1512_v63  ;;  %v1518_v5 = vld [vmem:[%s2308_s0 + $0xa8] sm:$0xff]  }
  0x20   :  { %v1236_v15 = vpack.c.bf16 %v557_v6, %v556_v61  ;;  %v558_v16 = vmax.f32 %v430_v7, 0.0  ;;  %v302_v17 = vmul.f32 %v1654_v1, %v980_v8  ;;  %v303_v18 = vmul.f32 %v1654_v1, %v981_v9 }
  0x21   :  { %v559_v19 = vmax.f32 %v431_v10, 0.0  ;;  %v432_v20 = vadd.f32 %v1659_v4, %v300_v11  ;;  %v433_v21 = vadd.f32 %v1659_v4, %v301_v12  ;;  %v985_v22 = vunpack.c.h.bf16 %v1512_v63 }
  0x22   :  { %1571 = vst [vmem:[%s2311_s3 + $0x58] sm:$0xff] %v1236_v15   ;;  %v434_v23 = vadd.f32 %v1659_v4, %v302_v17  ;;  %v435_v24 = vadd.f32 %v1659_v4, %v303_v18  ;;  %v304_v25 = vmul.f32 %v1654_v1, %v984_v13  ;;  %v988_v26 = vunpack.c.l.bf16 %v1513_v14 }
  0x23   :  { %v1241_v28 = vpack.c.bf16 %v559_v19, %v558_v16  ;;  %v560_v29 = vmax.f32 %v432_v20, 0.0  ;;  %v561_v30 = vmax.f32 %v433_v21, 0.0  ;;  %v305_v31 = vmul.f32 %v1654_v1, %v985_v22 }
  0x24   :  { %v562_v32 = vmax.f32 %v434_v23, 0.0  ;;  %v563_v33 = vmax.f32 %v435_v24, 0.0  ;;  %v436_v34 = vadd.f32 %v1659_v4, %v304_v25  ;;  %v989_v35 = vunpack.c.h.bf16 %v1513_v14  ;;  %v1519_v14 = vld [vmem:[%s2308_s0 + $0xb0] sm:$0xff]   ;;  %v1520_v23 = vld [vmem:[%s2308_s0 + $0xb8] sm:$0xff]  }
  0x25   :  { %1572 = vst [vmem:[%s2311_s3 + $0x60] sm:$0xff] %v1241_v28   ;;  %v1246_v37 = vpack.c.bf16 %v561_v30, %v560_v29  ;;  %v437_v38 = vadd.f32 %v1659_v4, %v305_v31  ;;  %v306_v39 = vmul.f32 %v1654_v1, %v988_v26  ;;  %v992_v40 = vunpack.c.l.bf16 %v1514_v27 }
  0x26   :  { %v1251_v42 = vpack.c.bf16 %v563_v33, %v562_v32  ;;  %v564_v43 = vmax.f32 %v436_v34, 0.0  ;;  %v307_v44 = vmul.f32 %v1654_v1, %v989_v35  ;;  %v993_v45 = vunpack.c.h.bf16 %v1514_v27  ;;  %v1521_v32 = vld [vmem:[%s2308_s0 + $0xc0] sm:$0xff]  }
  0x27   :  { %1573 = vst [vmem:[%s2311_s3 + $0x68] sm:$0xff] %v1246_v37   ;;  %v565_v46 = vmax.f32 %v437_v38, 0.0  ;;  %v438_v47 = vadd.f32 %v1659_v4, %v306_v39  ;;  %v308_v48 = vmul.f32 %v1654_v1, %v992_v40  ;;  %v996_v49 = vunpack.c.l.bf16 %v1515_v36 }
  0x28   :  { %1574 = vst [vmem:[%s2311_s3 + $0x70] sm:$0xff] %v1251_v42   ;;  %v439_v50 = vadd.f32 %v1659_v4, %v307_v44  ;;  %v309_v51 = vmul.f32 %v1654_v1, %v993_v45  ;;  %v997_v52 = vunpack.c.h.bf16 %v1515_v36  ;;  %v1000_v53 = vunpack.c.l.bf16 %v1516_v41  ;;  %v1522_v45 = vld [vmem:[%s2308_s0 + $0xc8] sm:$0xff]  }
  0x29   :  { %v1256_v55 = vpack.c.bf16 %v565_v46, %v564_v43  ;;  %v566_v56 = vmax.f32 %v438_v47, 0.0  ;;  %v440_v57 = vadd.f32 %v1659_v4, %v308_v48  ;;  %v310_v58 = vmul.f32 %v1654_v1, %v996_v49 }
  0x2a   :  { %v567_v59 = vmax.f32 %v439_v50, 0.0  ;;  %v441_v60 = vadd.f32 %v1659_v4, %v309_v51  ;;  %v311_v61 = vmul.f32 %v1654_v1, %v997_v52  ;;  %v1001_v62 = vunpack.c.h.bf16 %v1516_v41 }
  0x2b   :  { %1575 = vst [vmem:[%s2311_s3 + $0x78] sm:$0xff] %v1256_v55   ;;  %v568_v63 = vmax.f32 %v440_v57, 0.0  ;;  %v442_v0 = vadd.f32 %v1659_v4, %v310_v58  ;;  %v312_v2 = vmul.f32 %v1654_v1, %v1000_v53  ;;  %v1004_v3 = vunpack.c.l.bf16 %v1517_v54 }
  0x2c   :  { %v1261_v6 = vpack.c.bf16 %v567_v59, %v566_v56  ;;  %v569_v7 = vmax.f32 %v441_v60, 0.0  ;;  %v443_v8 = vadd.f32 %v1659_v4, %v311_v61  ;;  %v313_v9 = vmul.f32 %v1654_v1, %v1001_v62 }
  0x2d   :  { %v570_v10 = vmax.f32 %v442_v0, 0.0  ;;  %v444_v11 = vadd.f32 %v1659_v4, %v312_v2  ;;  %v1005_v12 = vunpack.c.h.bf16 %v1517_v54  ;;  %v314_v13 = vmul.f32 %v1654_v1, %v1004_v3  ;;  %v1523_v54 = vld [vmem:[%s2308_s0 + $0xd0] sm:$0xff]  }
  0x2e   :  { %1576 = vst [vmem:[%s2311_s3 + $0x80] sm:$0xff] %v1261_v6   ;;  %v1266_v15 = vpack.c.bf16 %v569_v7, %v568_v63  ;;  %v571_v16 = vmax.f32 %v443_v8, 0.0  ;;  %v445_v17 = vadd.f32 %v1659_v4, %v313_v9  ;;  %v1008_v18 = vunpack.c.l.bf16 %v1518_v5  ;;  %v1524_v63 = vld [vmem:[%s2308_s0 + $0xd8] sm:$0xff]  }
  0x2f   :  { %v572_v19 = vmax.f32 %v444_v11, 0.0  ;;  %v315_v20 = vmul.f32 %v1654_v1, %v1005_v12  ;;  %v446_v21 = vadd.f32 %v1659_v4, %v314_v13  ;;  %v1009_v22 = vunpack.c.h.bf16 %v1518_v5 }
  0x30   :  { %1577 = vst [vmem:[%s2311_s3 + $0x88] sm:$0xff] %v1266_v15   ;;  %v1271_v24 = vpack.c.bf16 %v571_v16, %v570_v10  ;;  %v573_v25 = vmax.f32 %v445_v17, 0.0  ;;  %v316_v26 = vmul.f32 %v1654_v1, %v1008_v18  ;;  %v1012_v27 = vunpack.c.l.bf16 %v1519_v14  ;;  %v1525_v10 = vld [vmem:[%s2308_s0 + $0xe0] sm:$0xff]  }
  0x31   :  { %v447_v28 = vadd.f32 %v1659_v4, %v315_v20  ;;  %v574_v29 = vmax.f32 %v446_v21, 0.0  ;;  %v317_v30 = vmul.f32 %v1654_v1, %v1009_v22  ;;  %v1013_v31 = vunpack.c.h.bf16 %v1519_v14 }
  0x32   :  { %1578 = vst [vmem:[%s2311_s3 + $0x90] sm:$0xff] %v1271_v24   ;;  %v1276_v33 = vpack.c.bf16 %v573_v25, %v572_v19  ;;  %v448_v34 = vadd.f32 %v1659_v4, %v316_v26  ;;  %v318_v35 = vmul.f32 %v1654_v1, %v1012_v27  ;;  %v1016_v36 = vunpack.c.l.bf16 %v1520_v23 }
  0x33   :  { %v575_v37 = vmax.f32 %v447_v28, 0.0  ;;  %v449_v38 = vadd.f32 %v1659_v4, %v317_v30  ;;  %v319_v39 = vmul.f32 %v1654_v1, %v1013_v31  ;;  %v1017_v40 = vunpack.c.h.bf16 %v1520_v23  ;;  %v1526_v23 = vld [vmem:[%s2308_s0 + $0xe8] sm:$0xff]  }
  0x34   :  { %1579 = vst [vmem:[%s2311_s3 + $0x98] sm:$0xff] %v1276_v33   ;;  %v576_v41 = vmax.f32 %v448_v34, 0.0  ;;  %v450_v42 = vadd.f32 %v1659_v4, %v318_v35  ;;  %v320_v43 = vmul.f32 %v1654_v1, %v1016_v36  ;;  %v1020_v44 = vunpack.c.l.bf16 %v1521_v32 }
  0x35   :  { %v1281_v46 = vpack.c.bf16 %v575_v37, %v574_v29  ;;  %v577_v47 = vmax.f32 %v449_v38, 0.0  ;;  %v451_v48 = vadd.f32 %v1659_v4, %v319_v39  ;;  %v321_v49 = vmul.f32 %v1654_v1, %v1017_v40 }
  0x36   :  { %v578_v50 = vmax.f32 %v450_v42, 0.0  ;;  %v452_v51 = vadd.f32 %v1659_v4, %v320_v43  ;;  %v1021_v52 = vunpack.c.h.bf16 %v1521_v32  ;;  %v322_v53 = vmul.f32 %v1654_v1, %v1020_v44  ;;  %v1527_v32 = vld [vmem:[%s2308_s0 + $0xf0] sm:$0xff]  }
  0x37   :  { %1580 = vst [vmem:[%s2311_s3 + $0xa0] sm:$0xff] %v1281_v46   ;;  %v1286_v55 = vpack.c.bf16 %v577_v47, %v576_v41  ;;  %v579_v56 = vmax.f32 %v451_v48, 0.0  ;;  %v453_v57 = vadd.f32 %v1659_v4, %v321_v49  ;;  %v1024_v58 = vunpack.c.l.bf16 %v1522_v45  ;;  %v1528_v41 = vld [vmem:[%s2308_s0 + $0xf8] sm:$0xff]  }
  0x38   :  { %v580_v59 = vmax.f32 %v452_v51, 0.0  ;;  %v323_v60 = vmul.f32 %v1654_v1, %v1021_v52  ;;  %v454_v61 = vadd.f32 %v1659_v4, %v322_v53  ;;  %v1025_v62 = vunpack.c.h.bf16 %v1522_v45 }
  0x39   :  { %1581 = vst [vmem:[%s2311_s3 + $0xa8] sm:$0xff] %v1286_v55   ;;  %v1291_v0 = vpack.c.bf16 %v579_v56, %v578_v50  ;;  %v581_v2 = vmax.f32 %v453_v57, 0.0  ;;  %v324_v3 = vmul.f32 %v1654_v1, %v1024_v58  ;;  %v1028_v5 = vunpack.c.l.bf16 %v1523_v54  ;;  %v1529_v50 = vld [vmem:[%s2308_s0 + $0x100] sm:$0xff]  }
  0x3a   :  { %v455_v6 = vadd.f32 %v1659_v4, %v323_v60  ;;  %v582_v7 = vmax.f32 %v454_v61, 0.0  ;;  %v325_v8 = vmul.f32 %v1654_v1, %v1025_v62  ;;  %v1029_v9 = vunpack.c.h.bf16 %v1523_v54 }
  0x3b   :  { %1582 = vst [vmem:[%s2311_s3 + $0xb0] sm:$0xff] %v1291_v0   ;;  %v1296_v11 = vpack.c.bf16 %v581_v2, %v580_v59  ;;  %v456_v12 = vadd.f32 %v1659_v4, %v324_v3  ;;  %v326_v13 = vmul.f32 %v1654_v1, %v1028_v5  ;;  %v1032_v14 = vunpack.c.l.bf16 %v1524_v63 }
  0x3c   :  { %v583_v15 = vmax.f32 %v455_v6, 0.0  ;;  %v457_v16 = vadd.f32 %v1659_v4, %v325_v8  ;;  %v327_v17 = vmul.f32 %v1654_v1, %v1029_v9  ;;  %v1033_v18 = vunpack.c.h.bf16 %v1524_v63  ;;  %v1530_v63 = vld [vmem:[%s2308_s0 + $0x108] sm:$0xff]  }
  0x3d   :  { %1583 = vst [vmem:[%s2311_s3 + $0xb8] sm:$0xff] %v1296_v11   ;;  %v584_v19 = vmax.f32 %v456_v12, 0.0  ;;  %v458_v20 = vadd.f32 %v1659_v4, %v326_v13  ;;  %v328_v21 = vmul.f32 %v1654_v1, %v1032_v14  ;;  %v1036_v22 = vunpack.c.l.bf16 %v1525_v10 }
  0x3e   :  { %v1301_v24 = vpack.c.bf16 %v583_v15, %v582_v7  ;;  %v585_v25 = vmax.f32 %v457_v16, 0.0  ;;  %v459_v26 = vadd.f32 %v1659_v4, %v327_v17  ;;  %v329_v27 = vmul.f32 %v1654_v1, %v1033_v18 }
  0x3f   :  { %v586_v28 = vmax.f32 %v458_v20, 0.0  ;;  %v460_v29 = vadd.f32 %v1659_v4, %v328_v21  ;;  %v1037_v30 = vunpack.c.h.bf16 %v1525_v10  ;;  %v330_v31 = vmul.f32 %v1654_v1, %v1036_v22  ;;  %v1531_v10 = vld [vmem:[%s2308_s0 + $0x110] sm:$0xff]  }
  0x40   :  { %1584 = vst [vmem:[%s2311_s3 + $0xc0] sm:$0xff] %v1301_v24   ;;  %v1306_v33 = vpack.c.bf16 %v585_v25, %v584_v19  ;;  %v587_v34 = vmax.f32 %v459_v26, 0.0  ;;  %v461_v35 = vadd.f32 %v1659_v4, %v329_v27  ;;  %v1040_v36 = vunpack.c.l.bf16 %v1526_v23  ;;  %v1532_v19 = vld [vmem:[%s2308_s0 + $0x118] sm:$0xff]  }
  0x41   :  { %v588_v37 = vmax.f32 %v460_v29, 0.0  ;;  %v331_v38 = vmul.f32 %v1654_v1, %v1037_v30  ;;  %v462_v39 = vadd.f32 %v1659_v4, %v330_v31  ;;  %v1041_v40 = vunpack.c.h.bf16 %v1526_v23 }
  0x42   :  { %1585 = vst [vmem:[%s2311_s3 + $0xc8] sm:$0xff] %v1306_v33   ;;  %v1311_v42 = vpack.c.bf16 %v587_v34, %v586_v28  ;;  %v589_v43 = vmax.f32 %v461_v35, 0.0  ;;  %v332_v44 = vmul.f32 %v1654_v1, %v1040_v36  ;;  %v1044_v45 = vunpack.c.l.bf16 %v1527_v32  ;;  %v1533_v28 = vld [vmem:[%s2308_s0 + $0x120] sm:$0xff]  }
  0x43   :  { %v463_v46 = vadd.f32 %v1659_v4, %v331_v38  ;;  %v590_v47 = vmax.f32 %v462_v39, 0.0  ;;  %v333_v48 = vmul.f32 %v1654_v1, %v1041_v40  ;;  %v1045_v49 = vunpack.c.h.bf16 %v1527_v32 }
  0x44   :  { %1586 = vst [vmem:[%s2311_s3 + $0xd0] sm:$0xff] %v1311_v42   ;;  %v1316_v51 = vpack.c.bf16 %v589_v43, %v588_v37  ;;  %v464_v52 = vadd.f32 %v1659_v4, %v332_v44  ;;  %v334_v53 = vmul.f32 %v1654_v1, %v1044_v45  ;;  %v1048_v54 = vunpack.c.l.bf16 %v1528_v41 }
  0x45   :  { %v591_v55 = vmax.f32 %v463_v46, 0.0  ;;  %v465_v56 = vadd.f32 %v1659_v4, %v333_v48  ;;  %v335_v57 = vmul.f32 %v1654_v1, %v1045_v49  ;;  %v1049_v58 = vunpack.c.h.bf16 %v1528_v41  ;;  %v1534_v41 = vld [vmem:[%s2308_s0 + $0x128] sm:$0xff]  }
  0x46   :  { %1587 = vst [vmem:[%s2311_s3 + $0xd8] sm:$0xff] %v1316_v51   ;;  %v592_v59 = vmax.f32 %v464_v52, 0.0  ;;  %v466_v60 = vadd.f32 %v1659_v4, %v334_v53  ;;  %v336_v61 = vmul.f32 %v1654_v1, %v1048_v54  ;;  %v1052_v62 = vunpack.c.l.bf16 %v1529_v50 }
  0x47   :  { %v1321_v0 = vpack.c.bf16 %v591_v55, %v590_v47  ;;  %v593_v2 = vmax.f32 %v465_v56, 0.0  ;;  %v467_v3 = vadd.f32 %v1659_v4, %v335_v57  ;;  %v337_v5 = vmul.f32 %v1654_v1, %v1049_v58 }
  0x48   :  { %v594_v6 = vmax.f32 %v466_v60, 0.0  ;;  %v468_v7 = vadd.f32 %v1659_v4, %v336_v61  ;;  %v1053_v8 = vunpack.c.h.bf16 %v1529_v50  ;;  %v338_v9 = vmul.f32 %v1654_v1, %v1052_v62  ;;  %v1535_v50 = vld [vmem:[%s2308_s0 + $0x130] sm:$0xff]  }
  0x49   :  { %1588 = vst [vmem:[%s2311_s3 + $0xe0] sm:$0xff] %v1321_v0   ;;  %v1326_v11 = vpack.c.bf16 %v593_v2, %v592_v59  ;;  %v595_v12 = vmax.f32 %v467_v3, 0.0  ;;  %v469_v13 = vadd.f32 %v1659_v4, %v337_v5  ;;  %v1056_v14 = vunpack.c.l.bf16 %v1530_v63  ;;  %v1536_v59 = vld [vmem:[%s2308_s0 + $0x138] sm:$0xff]  }
  0x4a   :  { %v596_v15 = vmax.f32 %v468_v7, 0.0  ;;  %v339_v16 = vmul.f32 %v1654_v1, %v1053_v8  ;;  %v470_v17 = vadd.f32 %v1659_v4, %v338_v9  ;;  %v1057_v18 = vunpack.c.h.bf16 %v1530_v63 }
  0x4b   :  { %1589 = vst [vmem:[%s2311_s3 + $0xe8] sm:$0xff] %v1326_v11   ;;  %v1331_v20 = vpack.c.bf16 %v595_v12, %v594_v6  ;;  %v597_v21 = vmax.f32 %v469_v13, 0.0  ;;  %v340_v22 = vmul.f32 %v1654_v1, %v1056_v14  ;;  %v1060_v23 = vunpack.c.l.bf16 %v1531_v10  ;;  %v1537_v6 = vld [vmem:[%s2308_s0 + $0x140] sm:$0xff]  }
  0x4c   :  { %v471_v24 = vadd.f32 %v1659_v4, %v339_v16  ;;  %v598_v25 = vmax.f32 %v470_v17, 0.0  ;;  %v341_v26 = vmul.f32 %v1654_v1, %v1057_v18  ;;  %v1061_v27 = vunpack.c.h.bf16 %v1531_v10 }
  0x4d   :  { %1590 = vst [vmem:[%s2311_s3 + $0xf0] sm:$0xff] %v1331_v20   ;;  %v1336_v29 = vpack.c.bf16 %v597_v21, %v596_v15  ;;  %v472_v30 = vadd.f32 %v1659_v4, %v340_v22  ;;  %v342_v31 = vmul.f32 %v1654_v1, %v1060_v23  ;;  %v1064_v32 = vunpack.c.l.bf16 %v1532_v19 }
  0x4e   :  { %v599_v33 = vmax.f32 %v471_v24, 0.0  ;;  %v473_v34 = vadd.f32 %v1659_v4, %v341_v26  ;;  %v343_v35 = vmul.f32 %v1654_v1, %v1061_v27  ;;  %v1065_v36 = vunpack.c.h.bf16 %v1532_v19  ;;  %v1538_v19 = vld [vmem:[%s2308_s0 + $0x148] sm:$0xff]  }
  0x4f   :  { %1591 = vst [vmem:[%s2311_s3 + $0xf8] sm:$0xff] %v1336_v29   ;;  %v600_v37 = vmax.f32 %v472_v30, 0.0  ;;  %v474_v38 = vadd.f32 %v1659_v4, %v342_v31  ;;  %v344_v39 = vmul.f32 %v1654_v1, %v1064_v32  ;;  %v1068_v40 = vunpack.c.l.bf16 %v1533_v28 }
  0x50   :  { %v1341_v42 = vpack.c.bf16 %v599_v33, %v598_v25  ;;  %v601_v43 = vmax.f32 %v473_v34, 0.0  ;;  %v475_v44 = vadd.f32 %v1659_v4, %v343_v35  ;;  %v345_v45 = vmul.f32 %v1654_v1, %v1065_v36 }
  0x51   :  { %v602_v46 = vmax.f32 %v474_v38, 0.0  ;;  %v476_v47 = vadd.f32 %v1659_v4, %v344_v39  ;;  %v1069_v48 = vunpack.c.h.bf16 %v1533_v28  ;;  %v346_v49 = vmul.f32 %v1654_v1, %v1068_v40  ;;  %v1539_v28 = vld [vmem:[%s2308_s0 + $0x150] sm:$0xff]  }
  0x52   :  { %1592 = vst [vmem:[%s2311_s3 + $0x100] sm:$0xff] %v1341_v42   ;;  %v1346_v51 = vpack.c.bf16 %v601_v43, %v600_v37  ;;  %v603_v52 = vmax.f32 %v475_v44, 0.0  ;;  %v477_v53 = vadd.f32 %v1659_v4, %v345_v45  ;;  %v1072_v54 = vunpack.c.l.bf16 %v1534_v41  ;;  %v1540_v37 = vld [vmem:[%s2308_s0 + $0x158] sm:$0xff]  }
  0x53   :  { %v604_v55 = vmax.f32 %v476_v47, 0.0  ;;  %v347_v56 = vmul.f32 %v1654_v1, %v1069_v48  ;;  %v478_v57 = vadd.f32 %v1659_v4, %v346_v49  ;;  %v1073_v58 = vunpack.c.h.bf16 %v1534_v41 }
  0x54   :  { %1593 = vst [vmem:[%s2311_s3 + $0x108] sm:$0xff] %v1346_v51   ;;  %v1351_v60 = vpack.c.bf16 %v603_v52, %v602_v46  ;;  %v605_v61 = vmax.f32 %v477_v53, 0.0  ;;  %v348_v62 = vmul.f32 %v1654_v1, %v1072_v54  ;;  %v1076_v63 = vunpack.c.l.bf16 %v1535_v50  ;;  %v1541_v46 = vld [vmem:[%s2308_s0 + $0x160] sm:$0xff]  }
  0x55   :  { %v479_v0 = vadd.f32 %v1659_v4, %v347_v56  ;;  %v606_v2 = vmax.f32 %v478_v57, 0.0  ;;  %v349_v3 = vmul.f32 %v1654_v1, %v1073_v58  ;;  %v1077_v5 = vunpack.c.h.bf16 %v1535_v50 }
  0x56   :  { %1594 = vst [vmem:[%s2311_s3 + $0x110] sm:$0xff] %v1351_v60   ;;  %v1356_v7 = vpack.c.bf16 %v605_v61, %v604_v55  ;;  %v480_v8 = vadd.f32 %v1659_v4, %v348_v62  ;;  %v350_v9 = vmul.f32 %v1654_v1, %v1076_v63  ;;  %v1080_v10 = vunpack.c.l.bf16 %v1536_v59 }
  0x57   :  { %v607_v11 = vmax.f32 %v479_v0, 0.0  ;;  %v481_v12 = vadd.f32 %v1659_v4, %v349_v3  ;;  %v351_v13 = vmul.f32 %v1654_v1, %v1077_v5  ;;  %v1081_v14 = vunpack.c.h.bf16 %v1536_v59  ;;  %v1542_v59 = vld [vmem:[%s2308_s0 + $0x168] sm:$0xff]  }
  0x58   :  { %1595 = vst [vmem:[%s2311_s3 + $0x118] sm:$0xff] %v1356_v7   ;;  %v608_v15 = vmax.f32 %v480_v8, 0.0  ;;  %v482_v16 = vadd.f32 %v1659_v4, %v350_v9  ;;  %v352_v17 = vmul.f32 %v1654_v1, %v1080_v10  ;;  %v1084_v18 = vunpack.c.l.bf16 %v1537_v6 }
  0x59   :  { %v1361_v20 = vpack.c.bf16 %v607_v11, %v606_v2  ;;  %v609_v21 = vmax.f32 %v481_v12, 0.0  ;;  %v483_v22 = vadd.f32 %v1659_v4, %v351_v13  ;;  %v353_v23 = vmul.f32 %v1654_v1, %v1081_v14 }
  0x5a   :  { %v610_v24 = vmax.f32 %v482_v16, 0.0  ;;  %v484_v25 = vadd.f32 %v1659_v4, %v352_v17  ;;  %v1085_v26 = vunpack.c.h.bf16 %v1537_v6  ;;  %v354_v27 = vmul.f32 %v1654_v1, %v1084_v18  ;;  %v1543_v6 = vld [vmem:[%s2308_s0 + $0x170] sm:$0xff]  }
  0x5b   :  { %1596 = vst [vmem:[%s2311_s3 + $0x120] sm:$0xff] %v1361_v20   ;;  %v1366_v29 = vpack.c.bf16 %v609_v21, %v608_v15  ;;  %v611_v30 = vmax.f32 %v483_v22, 0.0  ;;  %v485_v31 = vadd.f32 %v1659_v4, %v353_v23  ;;  %v1088_v32 = vunpack.c.l.bf16 %v1538_v19  ;;  %v1544_v15 = vld [vmem:[%s2308_s0 + $0x178] sm:$0xff]  }
  0x5c   :  { %v612_v33 = vmax.f32 %v484_v25, 0.0  ;;  %v355_v34 = vmul.f32 %v1654_v1, %v1085_v26  ;;  %v486_v35 = vadd.f32 %v1659_v4, %v354_v27  ;;  %v1089_v36 = vunpack.c.h.bf16 %v1538_v19 }
  0x5d   :  { %1597 = vst [vmem:[%s2311_s3 + $0x128] sm:$0xff] %v1366_v29   ;;  %v1371_v38 = vpack.c.bf16 %v611_v30, %v610_v24  ;;  %v613_v39 = vmax.f32 %v485_v31, 0.0  ;;  %v356_v40 = vmul.f32 %v1654_v1, %v1088_v32  ;;  %v1092_v41 = vunpack.c.l.bf16 %v1539_v28  ;;  %v1545_v24 = vld [vmem:[%s2308_s0 + $0x180] sm:$0xff]  }
  0x5e   :  { %v487_v42 = vadd.f32 %v1659_v4, %v355_v34  ;;  %v614_v43 = vmax.f32 %v486_v35, 0.0  ;;  %v357_v44 = vmul.f32 %v1654_v1, %v1089_v36  ;;  %v1093_v45 = vunpack.c.h.bf16 %v1539_v28  ;;  %v2127_v35 = vld [vmem:[%s2309_s1] ss:$0 sm:$0xff] }
  0x5f   :  { %1598 = vst [vmem:[%s2311_s3 + $0x130] sm:$0xff] %v1371_v38   ;;  %v1376_v47 = vpack.c.bf16 %v613_v39, %v612_v33  ;;  %v488_v48 = vadd.f32 %v1659_v4, %v356_v40  ;;  %v358_v49 = vmul.f32 %v1654_v1, %v1092_v41  ;;  %v1096_v50 = vunpack.c.l.bf16 %v1540_v37  ;;  %v2136_v40 = vld [vmem:[%s2310_s2] ss:$0 sm:$0xff] }
  0x60   :  { %v615_v51 = vmax.f32 %v487_v42, 0.0  ;;  %v489_v52 = vadd.f32 %v1659_v4, %v357_v44  ;;  %v359_v53 = vmul.f32 %v1654_v1, %v1093_v45  ;;  %v1097_v54 = vunpack.c.h.bf16 %v1540_v37 }
  0x61   :  { %1599 = vst [vmem:[%s2311_s3 + $0x138] sm:$0xff] %v1376_v47   ;;  %v616_v55 = vmax.f32 %v488_v48, 0.0  ;;  %v490_v56 = vadd.f32 %v1659_v4, %v358_v49  ;;  %v360_v57 = vmul.f32 %v1654_v1, %v1096_v50  ;;  %v1100_v58 = vunpack.c.l.bf16 %v1541_v46 }
  0x62   :  { %v1381_v60 = vpack.c.bf16 %v615_v51, %v614_v43  ;;  %v617_v61 = vmax.f32 %v489_v52, 0.0  ;;  %v491_v62 = vadd.f32 %v1659_v4, %v359_v53  ;;  %v361_v63 = vmul.f32 %v1654_v1, %v1097_v54 }
  0x63   :  { %v618_v0 = vmax.f32 %v490_v56, 0.0  ;;  %v492_v2 = vadd.f32 %v1659_v4, %v360_v57  ;;  %v1101_v3 = vunpack.c.h.bf16 %v1541_v46  ;;  %v362_v5 = vmul.f32 %v1654_v1, %v1100_v58  ;;  %v1547_v46 = vld [vmem:[%s2308_s0 + $0x190] sm:$0xff]  }
  0x64   :  { %1600 = vst [vmem:[%s2311_s3 + $0x140] sm:$0xff] %v1381_v60   ;;  %v1386_v7 = vpack.c.bf16 %v617_v61, %v616_v55  ;;  %v619_v8 = vmax.f32 %v491_v62, 0.0  ;;  %v493_v9 = vadd.f32 %v1659_v4, %v361_v63  ;;  %v1104_v10 = vunpack.c.l.bf16 %v1542_v59  ;;  %v1548_v55 = vld [vmem:[%s2308_s0 + $0x198] sm:$0xff]  }
  0x65   :  { %v620_v11 = vmax.f32 %v492_v2, 0.0  ;;  %v363_v12 = vmul.f32 %v1654_v1, %v1101_v3  ;;  %v494_v13 = vadd.f32 %v1659_v4, %v362_v5  ;;  %v1105_v14 = vunpack.c.h.bf16 %v1542_v59 }
  0x66   :  { %1601 = vst [vmem:[%s2311_s3 + $0x148] sm:$0xff] %v1386_v7   ;;  %v1391_v16 = vpack.c.bf16 %v619_v8, %v618_v0  ;;  %v621_v17 = vmax.f32 %v493_v9, 0.0  ;;  %v364_v18 = vmul.f32 %v1654_v1, %v1104_v10  ;;  %v1108_v19 = vunpack.c.l.bf16 %v1543_v6  ;;  %v1549_v0 = vld [vmem:[%s2308_s0 + $0x1a0] sm:$0xff]  }
  0x67   :  { %v495_v20 = vadd.f32 %v1659_v4, %v363_v12  ;;  %v622_v21 = vmax.f32 %v494_v13, 0.0  ;;  %v365_v22 = vmul.f32 %v1654_v1, %v1105_v14  ;;  %v1109_v23 = vunpack.c.h.bf16 %v1543_v6 }
  0x68   :  { %1602 = vst [vmem:[%s2311_s3 + $0x150] sm:$0xff] %v1391_v16   ;;  %v1396_v25 = vpack.c.bf16 %v621_v17, %v620_v11  ;;  %v496_v26 = vadd.f32 %v1659_v4, %v364_v18  ;;  %v366_v27 = vmul.f32 %v1654_v1, %v1108_v19  ;;  %v1112_v28 = vunpack.c.l.bf16 %v1544_v15 }
  0x69   :  { %v623_v29 = vmax.f32 %v495_v20, 0.0  ;;  %v497_v30 = vadd.f32 %v1659_v4, %v365_v22  ;;  %v367_v31 = vmul.f32 %v1654_v1, %v1109_v23  ;;  %v1113_v32 = vunpack.c.h.bf16 %v1544_v15  ;;  %v1546_v1 = vld [vmem:[%s2308_s0 + $0x188] sm:$0xff]  }
  0x6a   :  { %1603 = vst [vmem:[%s2311_s3 + $0x158] sm:$0xff] %v1396_v25   ;;  %v624_v33 = vmax.f32 %v496_v26, 0.0  ;;  %v498_v34 = vadd.f32 %v1659_v4, %v366_v27  ;;  %v368_v36 = vmul.f32 %v2127_v35, %v1112_v28  ;;  %v1116_v37 = vunpack.c.l.bf16 %v1545_v24  ;;  %v1550_v15 = vld [vmem:[%s2308_s0 + $0x1a8] sm:$0xff]  }
  0x6b   :  { %v1401_v38 = vpack.c.bf16 %v623_v29, %v622_v21  ;;  %v625_v39 = vmax.f32 %v497_v30, 0.0  ;;  %v499_v4 = vadd.f32 %v2136_v40, %v367_v31  ;;  %v369_v41 = vmul.f32 %v2127_v35, %v1113_v32 }
  0x6c   :  { %v626_v42 = vmax.f32 %v498_v34, 0.0  ;;  %v500_v43 = vadd.f32 %v2136_v40, %v368_v36  ;;  %v1117_v44 = vunpack.c.h.bf16 %v1545_v24  ;;  %v370_v45 = vmul.f32 %v2127_v35, %v1116_v37  ;;  %v1551_v24 = vld [vmem:[%s2308_s0 + $0x1b0] sm:$0xff]  }
  0x6d   :  { %1604 = vst [vmem:[%s2311_s3 + $0x160] sm:$0xff] %v1401_v38   ;;  %v1406_v47 = vpack.c.bf16 %v625_v39, %v624_v33  ;;  %v627_v48 = vmax.f32 %v499_v4, 0.0  ;;  %v501_v49 = vadd.f32 %v2136_v40, %v369_v41  ;;  %v1120_v50 = vunpack.c.l.bf16 %v1546_v1  ;;  %v1552_v33 = vld [vmem:[%s2308_s0 + $0x1b8] sm:$0xff]  }
  0x6e   :  { %v628_v51 = vmax.f32 %v500_v43, 0.0  ;;  %v371_v52 = vmul.f32 %v2127_v35, %v1117_v44  ;;  %v502_v53 = vadd.f32 %v2136_v40, %v370_v45  ;;  %v1121_v54 = vunpack.c.h.bf16 %v1546_v1 }
  0x6f   :  { %1605 = vst [vmem:[%s2311_s3 + $0x168] sm:$0xff] %v1406_v47   ;;  %v1411_v56 = vpack.c.bf16 %v627_v48, %v626_v42  ;;  %v629_v57 = vmax.f32 %v501_v49, 0.0  ;;  %v372_v58 = vmul.f32 %v2127_v35, %v1120_v50  ;;  %v1124_v59 = vunpack.c.l.bf16 %v1547_v46  ;;  %v1553_v42 = vld [vmem:[%s2308_s0 + $0x1c0] sm:$0xff]  }
  0x70   :  { %v503_v60 = vadd.f32 %v2136_v40, %v371_v52  ;;  %v630_v61 = vmax.f32 %v502_v53, 0.0  ;;  %v373_v62 = vmul.f32 %v2127_v35, %v1121_v54  ;;  %v1125_v63 = vunpack.c.h.bf16 %v1547_v46 }
  0x71   :  { %1606 = vst [vmem:[%s2311_s3 + $0x170] sm:$0xff] %v1411_v56   ;;  %v1416_v2 = vpack.c.bf16 %v629_v57, %v628_v51  ;;  %v504_v3 = vadd.f32 %v2136_v40, %v372_v58  ;;  %v374_v5 = vmul.f32 %v2127_v35, %v1124_v59  ;;  %v1128_v6 = vunpack.c.l.bf16 %v1548_v55 }
  0x72   :  { %v631_v7 = vmax.f32 %v503_v60, 0.0  ;;  %v505_v8 = vadd.f32 %v2136_v40, %v373_v62  ;;  %v375_v9 = vmul.f32 %v2127_v35, %v1125_v63  ;;  %v1129_v10 = vunpack.c.h.bf16 %v1548_v55  ;;  %v1554_v55 = vld [vmem:[%s2308_s0 + $0x1c8] sm:$0xff]  }
  0x73   :  { %1607 = vst [vmem:[%s2311_s3 + $0x178] sm:$0xff] %v1416_v2   ;;  %v632_v11 = vmax.f32 %v504_v3, 0.0  ;;  %v506_v12 = vadd.f32 %v2136_v40, %v374_v5  ;;  %v376_v13 = vmul.f32 %v2127_v35, %v1128_v6  ;;  %v1132_v14 = vunpack.c.l.bf16 %v1549_v0 }
  0x74   :  { %v1421_v16 = vpack.c.bf16 %v631_v7, %v630_v61  ;;  %v633_v17 = vmax.f32 %v505_v8, 0.0  ;;  %v507_v18 = vadd.f32 %v2136_v40, %v375_v9  ;;  %v377_v19 = vmul.f32 %v2127_v35, %v1129_v10 }
  0x75   :  { %v634_v20 = vmax.f32 %v506_v12, 0.0  ;;  %v508_v21 = vadd.f32 %v2136_v40, %v376_v13  ;;  %v1133_v22 = vunpack.c.h.bf16 %v1549_v0  ;;  %v378_v23 = vmul.f32 %v2127_v35, %v1132_v14  ;;  %v1555_v0 = vld [vmem:[%s2308_s0 + $0x1d0] sm:$0xff]  }
  0x76   :  { %1608 = vst [vmem:[%s2311_s3 + $0x180] sm:$0xff] %v1421_v16   ;;  %v1426_v25 = vpack.c.bf16 %v633_v17, %v632_v11  ;;  %v635_v26 = vmax.f32 %v507_v18, 0.0  ;;  %v509_v27 = vadd.f32 %v2136_v40, %v377_v19  ;;  %v1136_v28 = vunpack.c.l.bf16 %v1550_v15  ;;  %v1556_v11 = vld [vmem:[%s2308_s0 + $0x1d8] sm:$0xff]  }
  0x77   :  { %v636_v29 = vmax.f32 %v508_v21, 0.0  ;;  %v379_v30 = vmul.f32 %v2127_v35, %v1133_v22  ;;  %v510_v31 = vadd.f32 %v2136_v40, %v378_v23  ;;  %v1137_v32 = vunpack.c.h.bf16 %v1550_v15 }
  0x78   :  { %1609 = vst [vmem:[%s2311_s3 + $0x188] sm:$0xff] %v1426_v25   ;;  %v1431_v34 = vpack.c.bf16 %v635_v26, %v634_v20  ;;  %v637_v36 = vmax.f32 %v509_v27, 0.0  ;;  %v380_v37 = vmul.f32 %v2127_v35, %v1136_v28  ;;  %v1140_v1 = vunpack.c.l.bf16 %v1551_v24  ;;  %v1557_v20 = vld [vmem:[%s2308_s0 + $0x1e0] sm:$0xff]  }
  0x79   :  { %v511_v38 = vadd.f32 %v2136_v40, %v379_v30  ;;  %v638_v39 = vmax.f32 %v510_v31, 0.0  ;;  %v381_v4 = vmul.f32 %v2127_v35, %v1137_v32  ;;  %v1141_v41 = vunpack.c.h.bf16 %v1551_v24 }
  0x7a   :  { %1610 = vst [vmem:[%s2311_s3 + $0x190] sm:$0xff] %v1431_v34   ;;  %v1436_v43 = vpack.c.bf16 %v637_v36, %v636_v29  ;;  %v512_v44 = vadd.f32 %v2136_v40, %v380_v37  ;;  %v382_v45 = vmul.f32 %v2127_v35, %v1140_v1  ;;  %v1144_v46 = vunpack.c.l.bf16 %v1552_v33 }
  0x7b   :  { %v639_v47 = vmax.f32 %v511_v38, 0.0  ;;  %v513_v48 = vadd.f32 %v2136_v40, %v381_v4  ;;  %v383_v49 = vmul.f32 %v2127_v35, %v1141_v41  ;;  %v1145_v50 = vunpack.c.h.bf16 %v1552_v33  ;;  %v1558_v33 = vld [vmem:[%s2308_s0 + $0x1e8] sm:$0xff]  }
  0x7c   :  { %1611 = vst [vmem:[%s2311_s3 + $0x198] sm:$0xff] %v1436_v43   ;;  %v640_v51 = vmax.f32 %v512_v44, 0.0  ;;  %v514_v52 = vadd.f32 %v2136_v40, %v382_v45  ;;  %v384_v53 = vmul.f32 %v2127_v35, %v1144_v46  ;;  %v1148_v54 = vunpack.c.l.bf16 %v1553_v42 }
  0x7d   :  { %v1441_v56 = vpack.c.bf16 %v639_v47, %v638_v39  ;;  %v641_v57 = vmax.f32 %v513_v48, 0.0  ;;  %v515_v58 = vadd.f32 %v2136_v40, %v383_v49  ;;  %v385_v59 = vmul.f32 %v2127_v35, %v1145_v50 }
  0x7e   :  { %v642_v60 = vmax.f32 %v514_v52, 0.0  ;;  %v516_v61 = vadd.f32 %v2136_v40, %v384_v53  ;;  %v1149_v62 = vunpack.c.h.bf16 %v1553_v42  ;;  %v386_v63 = vmul.f32 %v2127_v35, %v1148_v54  ;;  %v1559_v42 = vld [vmem:[%s2308_s0 + $0x1f0] sm:$0xff]  }
  0x7f   :  { %1612 = vst [vmem:[%s2311_s3 + $0x1a0] sm:$0xff] %v1441_v56   ;;  %v1446_v2 = vpack.c.bf16 %v641_v57, %v640_v51  ;;  %v643_v3 = vmax.f32 %v515_v58, 0.0  ;;  %v517_v5 = vadd.f32 %v2136_v40, %v385_v59  ;;  %v1152_v6 = vunpack.c.l.bf16 %v1554_v55  ;;  %v1560_v51 = vld [vmem:[%s2308_s0 + $0x1f8] sm:$0xff]  }
  0x80   :  { %v644_v7 = vmax.f32 %v516_v61, 0.0  ;;  %v387_v8 = vmul.f32 %v2127_v35, %v1149_v62  ;;  %v518_v9 = vadd.f32 %v2136_v40, %v386_v63  ;;  %v1153_v10 = vunpack.c.h.bf16 %v1554_v55 }
  0x81   :  { %1613 = vst [vmem:[%s2311_s3 + $0x1a8] sm:$0xff] %v1446_v2   ;;  %v1451_v12 = vpack.c.bf16 %v643_v3, %v642_v60  ;;  %v645_v13 = vmax.f32 %v517_v5, 0.0  ;;  %v388_v14 = vmul.f32 %v2127_v35, %v1152_v6  ;;  %v1156_v15 = vunpack.c.l.bf16 %v1555_v0 }
  0x82   :  { %v519_v16 = vadd.f32 %v2136_v40, %v387_v8  ;;  %v646_v17 = vmax.f32 %v518_v9, 0.0  ;;  %v389_v18 = vmul.f32 %v2127_v35, %v1153_v10  ;;  %v1157_v19 = vunpack.c.h.bf16 %v1555_v0 }
  0x83   :  { %1614 = vst [vmem:[%s2311_s3 + $0x1b0] sm:$0xff] %v1451_v12   ;;  %v1456_v21 = vpack.c.bf16 %v645_v13, %v644_v7  ;;  %v520_v22 = vadd.f32 %v2136_v40, %v388_v14  ;;  %v390_v23 = vmul.f32 %v2127_v35, %v1156_v15  ;;  %v1160_v24 = vunpack.c.l.bf16 %v1556_v11 }
  0x84   :  { %v647_v25 = vmax.f32 %v519_v16, 0.0  ;;  %v521_v26 = vadd.f32 %v2136_v40, %v389_v18  ;;  %v391_v27 = vmul.f32 %v2127_v35, %v1157_v19  ;;  %v1161_v28 = vunpack.c.h.bf16 %v1556_v11 }
  0x85   :  { %1615 = vst [vmem:[%s2311_s3 + $0x1b8] sm:$0xff] %v1456_v21   ;;  %v648_v29 = vmax.f32 %v520_v22, 0.0  ;;  %v522_v30 = vadd.f32 %v2136_v40, %v390_v23  ;;  %v392_v31 = vmul.f32 %v2127_v35, %v1160_v24  ;;  %v1164_v32 = vunpack.c.l.bf16 %v1557_v20 }
  0x86   :  { %v1461_v34 = vpack.c.bf16 %v647_v25, %v646_v17  ;;  %v649_v36 = vmax.f32 %v521_v26, 0.0  ;;  %v523_v37 = vadd.f32 %v2136_v40, %v391_v27  ;;  %v393_v1 = vmul.f32 %v2127_v35, %v1161_v28 }
  0x87   :  { %v650_v38 = vmax.f32 %v522_v30, 0.0  ;;  %v524_v39 = vadd.f32 %v2136_v40, %v392_v31  ;;  %v1165_v4 = vunpack.c.h.bf16 %v1557_v20  ;;  %v394_v41 = vmul.f32 %v2127_v35, %v1164_v32 }
  0x88   :  { %1616 = vst [vmem:[%s2311_s3 + $0x1c0] sm:$0xff] %v1461_v34   ;;  %v1466_v43 = vpack.c.bf16 %v649_v36, %v648_v29  ;;  %v651_v44 = vmax.f32 %v523_v37, 0.0  ;;  %v525_v45 = vadd.f32 %v2136_v40, %v393_v1  ;;  %v1168_v46 = vunpack.c.l.bf16 %v1558_v33 }
  0x89   :  { %v652_v47 = vmax.f32 %v524_v39, 0.0  ;;  %v395_v48 = vmul.f32 %v2127_v35, %v1165_v4  ;;  %v526_v49 = vadd.f32 %v2136_v40, %v394_v41  ;;  %v1169_v50 = vunpack.c.h.bf16 %v1558_v33 }
  0x8a   :  { %1617 = vst [vmem:[%s2311_s3 + $0x1c8] sm:$0xff] %v1466_v43   ;;  %v1471_v52 = vpack.c.bf16 %v651_v44, %v650_v38  ;;  %v653_v53 = vmax.f32 %v525_v45, 0.0  ;;  %v396_v54 = vmul.f32 %v2127_v35, %v1168_v46  ;;  %v1172_v55 = vunpack.c.l.bf16 %v1559_v42 }
  0x8b   :  { %v527_v56 = vadd.f32 %v2136_v40, %v395_v48  ;;  %v654_v57 = vmax.f32 %v526_v49, 0.0  ;;  %v397_v58 = vmul.f32 %v2127_v35, %v1169_v50  ;;  %v1173_v59 = vunpack.c.h.bf16 %v1559_v42 }
  0x8c   :  { %1618 = vst [vmem:[%s2311_s3 + $0x1d0] sm:$0xff] %v1471_v52   ;;  %v1476_v60 = vpack.c.bf16 %v653_v53, %v652_v47  ;;  %v528_v61 = vadd.f32 %v2136_v40, %v396_v54  ;;  %v398_v62 = vmul.f32 %v2127_v35, %v1172_v55  ;;  %v1176_v63 = vunpack.c.l.bf16 %v1560_v51 }
  0x8d   :  { %v655_v0 = vmax.f32 %v527_v56, 0.0  ;;  %v529_v2 = vadd.f32 %v2136_v40, %v397_v58  ;;  %v399_v3 = vmul.f32 %v2127_v35, %v1173_v59  ;;  %v1177_v5 = vunpack.c.h.bf16 %v1560_v51 }
  0x8e   :  { %1619 = vst [vmem:[%s2311_s3 + $0x1d8] sm:$0xff] %v1476_v60   ;;  %v656_v6 = vmax.f32 %v528_v61, 0.0  ;;  %v530_v7 = vadd.f32 %v2136_v40, %v398_v62  ;;  %v400_v8 = vmul.f32 %v2127_v35, %v1176_v63 }
  0x8f   :  { %v1481_v9 = vpack.c.bf16 %v655_v0, %v654_v57  ;;  %v657_v10 = vmax.f32 %v529_v2, 0.0  ;;  %v531_v11 = vadd.f32 %v2136_v40, %v399_v3  ;;  %v401_v12 = vmul.f32 %v2127_v35, %v1177_v5 }
  0x90   :  { %v658_v13 = vmax.f32 %v530_v7, 0.0  ;;  %v532_v14 = vadd.f32 %v2136_v40, %v400_v8 }
  0x91   :  { %1620 = vst [vmem:[%s2311_s3 + $0x1e0] sm:$0xff] %v1481_v9   ;;  %v1486_v15 = vpack.c.bf16 %v657_v10, %v656_v6  ;;  %v659_v16 = vmax.f32 %v531_v11, 0.0  ;;  %v533_v17 = vadd.f32 %v2136_v40, %v401_v12 }
  0x92   :  { %v660_v18 = vmax.f32 %v532_v14, 0.0 }
  0x93   :  { %1621 = vst [vmem:[%s2311_s3 + $0x1e8] sm:$0xff] %v1486_v15   ;;  %v1491_v19 = vpack.c.bf16 %v659_v16, %v658_v13  ;;  %v661_v20 = vmax.f32 %v533_v17, 0.0 }
  0x95   :  { %1622 = vst [vmem:[%s2311_s3 + $0x1f0] sm:$0xff] %v1491_v19   ;;  %v1496_v35 = vpack.c.bf16 %v661_v20, %v660_v18 }
  0x97   :  { %1623 = vst [vmem:[%s2311_s3 + $0x1f8] sm:$0xff] %v1496_v35  }

// kernel: basic_block_3d.4
= control target key start
LH: loop header
LB: loop body
LE: loop exit
PB: predicated region body
PF: predicated region fallthrough
CT: control target
= control target key end

     0   :  { %s3595_s30 = smov 0   ;;  %s3597_s10 = smov 0   ;;  %s4327_s0 = inlined_call_operand.vmem [shape: bf16[1024,128], index: 0, kind: input, shape index: {}]   ;;  %s4328_s1 = inlined_call_operand.vmem [shape: bf16[128,128], index: 1, kind: input, shape index: {}]   ;;  %s4329_s2 = inlined_call_operand.vmem [shape: bf16[1024,128], index: 2, kind: input, shape index: {}]   ;;  %s4330_s3 = inlined_call_operand.vmem [shape: bf16[128,128], index: 3, kind: input, shape index: {}]   ;;  %s4331_s4 = inlined_call_operand.vmem [shape: bf16[1024,128], index: 4, kind: output, shape index: {0}]   ;;  %s4332_s5 = inlined_call_operand.vmem [shape: bf16[1024,128], index: 5, kind: output, shape index: {1}]   ;;  %s4333_s6 = inlined_call_operand.vmem [shape: f32[16,128], index: 6, kind: output, shape index: {2}]   ;;  %s4334_s7 = inlined_call_operand.vmem [shape: f32[16,128], index: 7, kind: output, shape index: {3}]   ;;  %s4335_s8 = inlined_call_operand.vmem [shape: f32[16,128], index: 8, kind: output, shape index: {4}]   ;;  %s4336_s9 = inlined_call_operand.vmem [shape: f32[16,128], index: 9, kind: output, shape index: {5}]  }
   0x1   :  { %s3599_s11 = smov 0  }
   0x2 LB: > { %s32_s12 = sadd.s32 1, %s3539_s10  ;;  %p2684_p0 = scmp.ge.s32.totalorder %s3543_s11, 1  ;;  %s3543_s11 = sphi %s3599_s11, %s20_s11   ;;  %s3539_s10 = sphi %s3597_s10, %s4430_s10   ;;  %s3535_s30 = sphi %s3595_s30, %s4429_s30  }
   0x3   : > { %p34_p1 = scmp.ge.s32.totalorder %s32_s12, 2  ;;  %p338_p2 = scmp.lt.s32.totalorder %s3543_s11, 3 }
   0x5   : > { %s4432_s12 = smov (%p34_p1, %s32_s12), 0  ;;  %p339_p3 = pnand %p2684_p0, %p338_p2 }
   0x7   : > { %342 = sbr.rel (%p339_p3) target bundleno = 500 (0x1f4), region = 36 }
   0xc   : > { %v3058_v0 = vld [vmem:[%s4328_s1 + $0x38] sm:$0xff]  ;;  %v3057_v2 = vld [vmem:[%s4328_s1 + $0x30] sm:$0xff]  ;;  %v3056_v4 = vld [vmem:[%s4328_s1 + $0x28] sm:$0xff]  ;;  %s2685_s29 = sshll.u32 %s3535_s30, 6  ;;  %p441_p5 = scmp.lt.s32.totalorder %s3535_s30, 1 }
   0xd   : > { %v3098_v1 = vld [vmem:[%s4330_s3 + $0x38] sm:$0xff]  ;;  %909 = vmatpush.bf16.msra.mxu0 %v3058_v0  ;;  %v3097_v3 = vld [vmem:[%s4330_s3 + $0x30] sm:$0xff]  ;;  %3481 = vmatpush.bf16.msra.mxu2 %v3058_v0  ;;  %v3096_v5 = vld [vmem:[%s4330_s3 + $0x28] sm:$0xff]  ;;  %p409_p4 = scmp.lt.s32.totalorder %s2685_s29, 127 }
   0xe   : > { %1925 = vmatpush.bf16.msra.mxu1 %v3098_v1  ;;  %3489 = vmatpush.bf16.msra.mxu3 %v3098_v1  ;;  %v3055_v6 = vld [vmem:[%s4328_s1 + $0x20] sm:$0xff]  ;;  %v3054_v8 = vld [vmem:[%s4328_s1 + $0x18] sm:$0xff]  ;;  %v3053_v10 = vld [vmem:[%s4328_s1 + $0x10] sm:$0xff]  ;;  %s4436_s30 = smov (!%p441_p5, %s3535_s30), 1 }
   0xf   : > { %v3095_v7 = vld [vmem:[%s4330_s3 + $0x20] sm:$0xff]  ;;  %v3094_v9 = vld [vmem:[%s4330_s3 + $0x18] sm:$0xff]  ;;  %v3093_v11 = vld [vmem:[%s4330_s3 + $0x10] sm:$0xff]  ;;  %s4434_s29 = smov (!%p409_p4, %s2685_s29), 127 }
  0x10   : > { %v3052_v12 = vld [vmem:[%s4328_s1 + $0x8] sm:$0xff]  ;;  %s3658_s25 = sshll.u32 %s4434_s29, 2  ;;  %v3051_v14 = vld [vmem:[%s4328_s1] sm:$0xff] }
  0x11   : > { %910 = vmatpush.bf16.msra.mxu0 %v3057_v2  ;;  %3482 = vmatpush.bf16.msra.mxu2 %v3057_v2  ;;  %v3092_v13 = vld [vmem:[%s4330_s3 + $0x8] sm:$0xff]  ;;  %v3091_v15 = vld [vmem:[%s4330_s3] sm:$0xff]  ;;  %s3670_s16 = scalar_lea.vmem %s4327_s0, %s3658_s25  ;;  %s3676_s18 = scalar_lea.vmem %s4329_s2, %s3658_s25 }
  0x12   : > { %1926 = vmatpush.bf16.msra.mxu1 %v3097_v3  ;;  %3490 = vmatpush.bf16.msra.mxu3 %v3097_v3  ;;  %v3019_v16 = vld [vmem:[%s3670_s16] sm:$0xff]  ;;  %v3020_v18 = vld [vmem:[%s3670_s16 + $0x8] sm:$0xff]  ;;  %v3021_v22 = vld [vmem:[%s3670_s16 + $0x10] sm:$0xff]  ;;  %s3716_s21 = scalar_lea.vmem %s4331_s4, %s3658_s25  ;;  %s3722_s24 = scalar_lea.vmem %s4332_s5, %s3658_s25 }
  0x13   : > { %v3059_v17 = vld [vmem:[%s3676_s18] sm:$0xff]  ;;  %v3060_v19 = vld [vmem:[%s3676_s18 + $0x8] sm:$0xff]  ;;  %v3061_v23 = vld [vmem:[%s3676_s18 + $0x10] sm:$0xff]  ;;  %s2693_s25 = sshll.u32 %s4436_s30, 3 }
  0x14   : > { %v3035_v20 = vld [vmem:[%s3670_s16 + $0x80] sm:$0xff]  ;;  %v3036_v24 = vld [vmem:[%s3670_s16 + $0x88] sm:$0xff]  ;;  %v3022_v26 = vld [vmem:[%s3670_s16 + $0x18] sm:$0xff]  ;;  %s444_s28 = scalar_lea.vmem %s4333_s6, %s2693_s25  ;;  %s452_s15 = scalar_lea.vmem %s4335_s8, %s2693_s25 }
  0x15   : > { %911 = vmatpush.bf16.msra.mxu0 %v3056_v4  ;;  %3483 = vmatpush.bf16.msra.mxu2 %v3056_v4  ;;  %v3075_v21 = vld [vmem:[%s3676_s18 + $0x80] sm:$0xff]  ;;  %v3076_v25 = vld [vmem:[%s3676_s18 + $0x88] sm:$0xff]  ;;  %v3062_v27 = vld [vmem:[%s3676_s18 + $0x18] sm:$0xff]  ;;  %s448_s29 = scalar_lea.vmem %s4334_s7, %s2693_s25  ;;  %s456_s19 = scalar_lea.vmem %s4336_s9, %s2693_s25 }
  0x16   : > { %1927 = vmatpush.bf16.msra.mxu1 %v3096_v5  ;;  %3491 = vmatpush.bf16.msra.mxu3 %v3096_v5  ;;  %v3037_v28 = vld [vmem:[%s3670_s16 + $0x90] sm:$0xff]  ;;  %v3023_v30 = vld [vmem:[%s3670_s16 + $0x20] sm:$0xff]  ;;  %v3038_v32 = vld [vmem:[%s3670_s16 + $0x98] sm:$0xff] }
  0x17   : > { %v3077_v29 = vld [vmem:[%s3676_s18 + $0x90] sm:$0xff]  ;;  %v3063_v31 = vld [vmem:[%s3676_s18 + $0x20] sm:$0xff]  ;;  %v3078_v33 = vld [vmem:[%s3676_s18 + $0x98] sm:$0xff] }
  0x18   : > { %v3024_v34 = vld [vmem:[%s3670_s16 + $0x28] sm:$0xff]  ;;  %v3039_v36 = vld [vmem:[%s3670_s16 + $0xa0] sm:$0xff]  ;;  %v3025_v38 = vld [vmem:[%s3670_s16 + $0x30] sm:$0xff] }
  0x19   : > { %912 = vmatpush.bf16.msra.mxu0 %v3055_v6  ;;  %3484 = vmatpush.bf16.msra.mxu2 %v3055_v6  ;;  %v3064_v35 = vld [vmem:[%s3676_s18 + $0x28] sm:$0xff]  ;;  %v3079_v37 = vld [vmem:[%s3676_s18 + $0xa0] sm:$0xff]  ;;  %v3065_v39 = vld [vmem:[%s3676_s18 + $0x30] sm:$0xff] }
  0x1a   : > { %1928 = vmatpush.bf16.msra.mxu1 %v3095_v7  ;;  %3492 = vmatpush.bf16.msra.mxu3 %v3095_v7  ;;  %v3040_v40 = vld [vmem:[%s3670_s16 + $0xa8] sm:$0xff]  ;;  %v3026_v42 = vld [vmem:[%s3670_s16 + $0x38] sm:$0xff]  ;;  %v3041_v44 = vld [vmem:[%s3670_s16 + $0xb0] sm:$0xff] }
  0x1b   : > { %v3080_v41 = vld [vmem:[%s3676_s18 + $0xa8] sm:$0xff]  ;;  %v3066_v43 = vld [vmem:[%s3676_s18 + $0x38] sm:$0xff]  ;;  %v3081_v45 = vld [vmem:[%s3676_s18 + $0xb0] sm:$0xff] }
  0x1c   : > { %v3027_v46 = vld [vmem:[%s3670_s16 + $0x40] sm:$0xff]  ;;  %v3042_v50 = vld [vmem:[%s3670_s16 + $0xb8] sm:$0xff]  ;;  %v3028_v0 = vld [vmem:[%s3670_s16 + $0x48] sm:$0xff] }
  0x1d   : > { %913 = vmatpush.bf16.msra.mxu0 %v3054_v8  ;;  %3485 = vmatpush.bf16.msra.mxu2 %v3054_v8  ;;  %v3067_v47 = vld [vmem:[%s3676_s18 + $0x40] sm:$0xff]  ;;  %v3082_v51 = vld [vmem:[%s3676_s18 + $0xb8] sm:$0xff]  ;;  %v3068_v1 = vld [vmem:[%s3676_s18 + $0x48] sm:$0xff] }
  0x1e   : > { %1929 = vmatpush.bf16.msra.mxu1 %v3094_v9  ;;  %3493 = vmatpush.bf16.msra.mxu3 %v3094_v9 }
  0x21   : > { %914 = vmatpush.bf16.msra.mxu0 %v3053_v10  ;;  %3486 = vmatpush.bf16.msra.mxu2 %v3053_v10  ;;  %v3043_v10 = vld [vmem:[%s3670_s16 + $0xc0] sm:$0xff] }
  0x22   : > { %1930 = vmatpush.bf16.msra.mxu1 %v3093_v11  ;;  %3494 = vmatpush.bf16.msra.mxu3 %v3093_v11  ;;  %v3083_v11 = vld [vmem:[%s3676_s18 + $0xc0] sm:$0xff] }
  0x25   : > { %915 = vmatpush.bf16.msra.mxu0 %v3052_v12  ;;  %3487 = vmatpush.bf16.msra.mxu2 %v3052_v12 }
  0x26   : > { %1931 = vmatpush.bf16.msra.mxu1 %v3092_v13  ;;  %3495 = vmatpush.bf16.msra.mxu3 %v3092_v13 }
  0x29   : > { %916 = vmatpush.bf16.msra.mxu0 %v3051_v14  ;;  %3488 = vmatpush.bf16.msra.mxu2 %v3051_v14 }
  0x2a   : > { %1932 = vmatpush.bf16.msra.mxu1 %v3091_v15  ;;  %3496 = vmatpush.bf16.msra.mxu3 %v3091_v15 }
  0x2c   : > { %917 = vmatmul.bf16.vlgmr.msra.gmra.mxu0 %v3019_v16  ;;  %997 = vmatmul.bf16.vlgmr.msra.gmra.mxu2 %v3035_v20 }
  0x2d   : > { %1933 = vmatmul.bf16.vlgmr.msra.gmra.mxu1 %v3059_v17  ;;  %2013 = vmatmul.bf16.vlgmr.msra.gmra.mxu3 %v3075_v21 }
  0x3c   : > { %922 = vmatmul.bf16.gmra.mxu0 %v3020_v18  ;;  %1002 = vmatmul.bf16.gmra.mxu2 %v3036_v24  ;;  %v3029_v24 = vld [vmem:[%s3670_s16 + $0x50] sm:$0xff] }
  0x3d   : > { %1938 = vmatmul.bf16.gmra.mxu1 %v3060_v19  ;;  %2018 = vmatmul.bf16.gmra.mxu3 %v3076_v25  ;;  %v3069_v25 = vld [vmem:[%s3676_s18 + $0x50] sm:$0xff] }
  0x4c   : > { %927 = vmatmul.bf16.gmra.mxu0 %v3021_v22  ;;  %1007 = vmatmul.bf16.gmra.mxu2 %v3037_v28 }
  0x4d   : > { %1943 = vmatmul.bf16.gmra.mxu1 %v3061_v23  ;;  %2023 = vmatmul.bf16.gmra.mxu3 %v3077_v29 }
  0x5c   : > { %932 = vmatmul.bf16.gmra.mxu0 %v3022_v26  ;;  %1012 = vmatmul.bf16.gmra.mxu2 %v3038_v32 }
  0x5d   : > { %1948 = vmatmul.bf16.gmra.mxu1 %v3062_v27  ;;  %2028 = vmatmul.bf16.gmra.mxu3 %v3078_v33 }
  0x6c   : > { %937 = vmatmul.bf16.gmra.mxu0 %v3023_v30  ;;  %1017 = vmatmul.bf16.gmra.mxu2 %v3039_v36 }
  0x6d   : > { %1953 = vmatmul.bf16.gmra.mxu1 %v3063_v31  ;;  %2033 = vmatmul.bf16.gmra.mxu3 %v3079_v37 }
  0x7c   : > { %942 = vmatmul.bf16.gmra.mxu0 %v3024_v34  ;;  %1022 = vmatmul.bf16.gmra.mxu2 %v3040_v40 }
  0x7d   : > { %1958 = vmatmul.bf16.gmra.mxu1 %v3064_v35  ;;  %2038 = vmatmul.bf16.gmra.mxu3 %v3080_v41 }
  0x8c   : > { %947 = vmatmul.bf16.gmra.mxu0 %v3025_v38  ;;  %1027 = vmatmul.bf16.gmra.mxu2 %v3041_v44  ;;  %v3044_v38 = vld [vmem:[%s3670_s16 + $0xc8] sm:$0xff] }
  0x8d   : > { %1963 = vmatmul.bf16.gmra.mxu1 %v3065_v39  ;;  %2043 = vmatmul.bf16.gmra.mxu3 %v3081_v45  ;;  %v3084_v39 = vld [vmem:[%s3676_s18 + $0xc8] sm:$0xff] }
  0x9c   : > { %952 = vmatmul.bf16.gmra.mxu0 %v3026_v42  ;;  %1032 = vmatmul.bf16.gmra.mxu2 %v3042_v50 }
  0x9d   : > { %1968 = vmatmul.bf16.gmra.mxu1 %v3066_v43  ;;  %2048 = vmatmul.bf16.gmra.mxu3 %v3082_v51 }
  0xa9   : > { %v918_v48 = vpop.f32.mrf.mxu0 }
  0xaa   : > { %v1934_v49 = vpop.f32.mrf.mxu1  ;;  %v1471_v52 = vmul.f32 %v918_v48, %v918_v48 }
  0xab   : > { %v2292_v53 = vmul.f32 %v1934_v49, %v1934_v49 }
  0xac   : > { %957 = vmatmul.bf16.gmra.mxu0 %v3027_v46  ;;  %1037 = vmatmul.bf16.gmra.mxu2 %v3043_v10 }
  0xad   : > { %1973 = vmatmul.bf16.gmra.mxu1 %v3067_v47  ;;  %2053 = vmatmul.bf16.gmra.mxu3 %v3083_v11 }
  0xaf   : > { %v3730_v18 = vpop.f32.mrf.mxu2 }
  0xb0   : > { %v3732_v19 = vpop.f32.mrf.mxu3 }
  0xb1   : > { %v920_v54 = vpop.f32.mrf.mxu0 }
  0xb2   : > { %v1936_v55 = vpop.f32.mrf.mxu1  ;;  %v3102_v56 = vpack.c.bf16 %v920_v54, %v918_v48  ;;  %v1472_v57 = vmul.f32 %v920_v54, %v920_v54  ;;  %v1401_v60 = vadd.f32 %v920_v54, %v918_v48 }
  0xb3   : > { %v3262_v58 = vpack.c.bf16 %v1936_v55, %v1934_v49  ;;  %v2293_v59 = vmul.f32 %v1936_v55, %v1936_v55  ;;  %v2222_v61 = vadd.f32 %v1936_v55, %v1934_v49 }
  0xb4   : > { %3103 = vst [vmem:[%s3716_s21] sm:$0xff] %v3102_v56   ;;  %v1535_v62 = vadd.f32 %v1472_v57, %v1471_v52  ;;  %v3030_v52 = vld [vmem:[%s3670_s16 + $0x58] sm:$0xff] }
  0xb5   : > { %v2356_v63 = vadd.f32 %v2293_v59, %v2292_v53  ;;  %3263 = vst [vmem:[%s3722_s24] sm:$0xff] %v3262_v58   ;;  %v3070_v53 = vld [vmem:[%s3676_s18 + $0x58] sm:$0xff] }
  0xb7   : > { %v3738_v32 = vpop.f32.mrf.mxu2 }
  0xb8   : > { %v3740_v33 = vpop.f32.mrf.mxu3  ;;  %v3182_v34 = vpack.c.bf16 %v3738_v32, %v3730_v18 }
  0xb9   : > { %v923_v2 = vpop.f32.mrf.mxu0  ;;  %v3342_v35 = vpack.c.bf16 %v3740_v33, %v3732_v19 }
  0xba   : > { %v1939_v3 = vpop.f32.mrf.mxu1  ;;  %v1402_v4 = vadd.f32 %v1401_v60, %v923_v2  ;;  %v1473_v5 = vmul.f32 %v923_v2, %v923_v2  ;;  %3434 = vst [vmem:[%s3716_s21 + $0x80] sm:$0xff] %v3182_v34   ;;  %v3046_v34 = vld [vmem:[%s3670_s16 + $0xd8] sm:$0xff] }
  0xbb   : > { %v2223_v6 = vadd.f32 %v2222_v61, %v1939_v3  ;;  %v2294_v7 = vmul.f32 %v1939_v3, %v1939_v3  ;;  %3465 = vst [vmem:[%s3722_s24 + $0x80] sm:$0xff] %v3342_v35   ;;  %v3086_v35 = vld [vmem:[%s3676_s18 + $0xd8] sm:$0xff] }
  0xbc   : > { %v1536_v8 = vadd.f32 %v1535_v62, %v1473_v5  ;;  %962 = vmatmul.bf16.gmra.mxu0 %v3028_v0  ;;  %1042 = vmatmul.bf16.gmra.mxu2 %v3044_v38 }
  0xbd   : > { %v2357_v9 = vadd.f32 %v2356_v63, %v2294_v7  ;;  %1978 = vmatmul.bf16.gmra.mxu1 %v3068_v1  ;;  %2058 = vmatmul.bf16.gmra.mxu3 %v3084_v39 }
  0xbf   : > { %v3750_v46 = vpop.f32.mrf.mxu2 }
  0xc0   : > { %v3752_v47 = vpop.f32.mrf.mxu3 }
  0xc1   : > { %v925_v12 = vpop.f32.mrf.mxu0 }
  0xc2   : > { %v1941_v13 = vpop.f32.mrf.mxu1  ;;  %v3107_v14 = vpack.c.bf16 %v925_v12, %v923_v2  ;;  %v1474_v15 = vmul.f32 %v925_v12, %v925_v12  ;;  %v1403_v20 = vadd.f32 %v1402_v4, %v925_v12  ;;  %v3045_v2 = vld [vmem:[%s3670_s16 + $0xd0] sm:$0xff] }
  0xc3   : > { %v3267_v16 = vpack.c.bf16 %v1941_v13, %v1939_v3  ;;  %v2295_v17 = vmul.f32 %v1941_v13, %v1941_v13  ;;  %v2224_v21 = vadd.f32 %v2223_v6, %v1941_v13  ;;  %v3085_v3 = vld [vmem:[%s3676_s18 + $0xd0] sm:$0xff] }
  0xc4   : > { %3419 = vst [vmem:[%s3716_s21 + $0x8] sm:$0xff] %v3107_v14   ;;  %v1537_v22 = vadd.f32 %v1536_v8, %v1474_v15 }
  0xc5   : > { %v2358_v23 = vadd.f32 %v2357_v9, %v2295_v17  ;;  %3450 = vst [vmem:[%s3722_s24 + $0x8] sm:$0xff] %v3267_v16   ;;  %v3031_v16 = vld [vmem:[%s3670_s16 + $0x60] sm:$0xff] }
  0xc6   : > { %v3071_v17 = vld [vmem:[%s3676_s18 + $0x60] sm:$0xff] }
  0xc7   : > { %v3758_v60 = vpop.f32.mrf.mxu2 }
  0xc8   : > { %v3760_v61 = vpop.f32.mrf.mxu3  ;;  %v3187_v62 = vpack.c.bf16 %v3758_v60, %v3750_v46 }
  0xc9   : > { %v928_v26 = vpop.f32.mrf.mxu0  ;;  %v3347_v63 = vpack.c.bf16 %v3760_v61, %v3752_v47 }
  0xca   : > { %v1944_v27 = vpop.f32.mrf.mxu1  ;;  %v1404_v28 = vadd.f32 %v1403_v20, %v928_v26  ;;  %v1475_v29 = vmul.f32 %v928_v26, %v928_v26  ;;  %3435 = vst [vmem:[%s3716_s21 + $0x88] sm:$0xff] %v3187_v62  }
  0xcb   : > { %v2225_v30 = vadd.f32 %v2224_v21, %v1944_v27  ;;  %v2296_v31 = vmul.f32 %v1944_v27, %v1944_v27  ;;  %3466 = vst [vmem:[%s3722_s24 + $0x88] sm:$0xff] %v3347_v63  }
  0xcc   : > { %v1538_v36 = vadd.f32 %v1537_v22, %v1475_v29  ;;  %967 = vmatmul.bf16.gmra.mxu0 %v3029_v24  ;;  %1047 = vmatmul.bf16.gmra.mxu2 %v3045_v2  ;;  %v3047_v2 = vld [vmem:[%s3670_s16 + $0xe0] sm:$0xff] }
  0xcd   : > { %v2359_v37 = vadd.f32 %v2358_v23, %v2296_v31  ;;  %1983 = vmatmul.bf16.gmra.mxu1 %v3069_v25  ;;  %2063 = vmatmul.bf16.gmra.mxu3 %v3085_v3  ;;  %v3087_v3 = vld [vmem:[%s3676_s18 + $0xe0] sm:$0xff] }
  0xcf   : > { %v3770_v10 = vpop.f32.mrf.mxu2 }
  0xd0   : > { %v3772_v11 = vpop.f32.mrf.mxu3 }
  0xd1   : > { %v930_v40 = vpop.f32.mrf.mxu0 }
  0xd2   : > { %v1946_v41 = vpop.f32.mrf.mxu1  ;;  %v3112_v42 = vpack.c.bf16 %v930_v40, %v928_v26  ;;  %v1476_v43 = vmul.f32 %v930_v40, %v930_v40  ;;  %v1405_v48 = vadd.f32 %v1404_v28, %v930_v40 }
  0xd3   : > { %v3272_v44 = vpack.c.bf16 %v1946_v41, %v1944_v27  ;;  %v2297_v45 = vmul.f32 %v1946_v41, %v1946_v41  ;;  %v2226_v49 = vadd.f32 %v2225_v30, %v1946_v41 }
  0xd4   : > { %3420 = vst [vmem:[%s3716_s21 + $0x10] sm:$0xff] %v3112_v42   ;;  %v1539_v50 = vadd.f32 %v1538_v36, %v1476_v43 }
  0xd5   : > { %v2360_v51 = vadd.f32 %v2359_v37, %v2297_v45  ;;  %3451 = vst [vmem:[%s3722_s24 + $0x10] sm:$0xff] %v3272_v44  }
  0xd7   : > { %v3778_v26 = vpop.f32.mrf.mxu2 }
  0xd8   : > { %v3780_v27 = vpop.f32.mrf.mxu3  ;;  %v3192_v28 = vpack.c.bf16 %v3778_v26, %v3770_v10 }
  0xd9   : > { %v933_v54 = vpop.f32.mrf.mxu0  ;;  %v3352_v29 = vpack.c.bf16 %v3780_v27, %v3772_v11 }
  0xda   : > { %v1949_v55 = vpop.f32.mrf.mxu1  ;;  %v1406_v56 = vadd.f32 %v1405_v48, %v933_v54  ;;  %v1477_v57 = vmul.f32 %v933_v54, %v933_v54  ;;  %3436 = vst [vmem:[%s3716_s21 + $0x90] sm:$0xff] %v3192_v28  }
  0xdb   : > { %v2227_v58 = vadd.f32 %v2226_v49, %v1949_v55  ;;  %v2298_v59 = vmul.f32 %v1949_v55, %v1949_v55  ;;  %3467 = vst [vmem:[%s3722_s24 + $0x90] sm:$0xff] %v3352_v29  }
  0xdc   : > { %v1540_v0 = vadd.f32 %v1539_v50, %v1477_v57  ;;  %972 = vmatmul.bf16.gmra.mxu0 %v3030_v52  ;;  %1052 = vmatmul.bf16.gmra.mxu2 %v3046_v34  ;;  %v3032_v50 = vld [vmem:[%s3670_s16 + $0x68] sm:$0xff] }
  0xdd   : > { %v2361_v1 = vadd.f32 %v2360_v51, %v2298_v59  ;;  %1988 = vmatmul.bf16.gmra.mxu1 %v3070_v53  ;;  %2068 = vmatmul.bf16.gmra.mxu3 %v3086_v35  ;;  %v3072_v51 = vld [vmem:[%s3676_s18 + $0x68] sm:$0xff] }
  0xdf   : > { %v3790_v42 = vpop.f32.mrf.mxu2 }
  0xe0   : > { %v3792_v43 = vpop.f32.mrf.mxu3 }
  0xe1   : > { %v935_v4 = vpop.f32.mrf.mxu0 }
  0xe2   : > { %v1951_v5 = vpop.f32.mrf.mxu1  ;;  %v3117_v6 = vpack.c.bf16 %v935_v4, %v933_v54  ;;  %v1478_v7 = vmul.f32 %v935_v4, %v935_v4  ;;  %v1407_v12 = vadd.f32 %v1406_v56, %v935_v4 }
  0xe3   : > { %v3277_v8 = vpack.c.bf16 %v1951_v5, %v1949_v55  ;;  %v2299_v9 = vmul.f32 %v1951_v5, %v1951_v5  ;;  %v2228_v13 = vadd.f32 %v2227_v58, %v1951_v5 }
  0xe4   : > { %3421 = vst [vmem:[%s3716_s21 + $0x18] sm:$0xff] %v3117_v6   ;;  %v1541_v14 = vadd.f32 %v1540_v0, %v1478_v7 }
  0xe5   : > { %v2362_v15 = vadd.f32 %v2361_v1, %v2299_v9  ;;  %3452 = vst [vmem:[%s3722_s24 + $0x18] sm:$0xff] %v3277_v8  }
  0xe7   : > { %v3798_v58 = vpop.f32.mrf.mxu2 }
  0xe8   : > { %v3800_v59 = vpop.f32.mrf.mxu3  ;;  %v3197_v62 = vpack.c.bf16 %v3798_v58, %v3790_v42 }
  0xe9   : > { %v938_v20 = vpop.f32.mrf.mxu0  ;;  %v3357_v63 = vpack.c.bf16 %v3800_v59, %v3792_v43 }
  0xea   : > { %v1954_v21 = vpop.f32.mrf.mxu1  ;;  %v1408_v22 = vadd.f32 %v1407_v12, %v938_v20  ;;  %v1479_v23 = vmul.f32 %v938_v20, %v938_v20  ;;  %3437 = vst [vmem:[%s3716_s21 + $0x98] sm:$0xff] %v3197_v62  }
  0xeb   : > { %v2229_v24 = vadd.f32 %v2228_v13, %v1954_v21  ;;  %v2300_v25 = vmul.f32 %v1954_v21, %v1954_v21  ;;  %3468 = vst [vmem:[%s3722_s24 + $0x98] sm:$0xff] %v3357_v63  }
  0xec   : > { %v1542_v30 = vadd.f32 %v1541_v14, %v1479_v23  ;;  %977 = vmatmul.bf16.gmra.mxu0 %v3031_v16  ;;  %1057 = vmatmul.bf16.gmra.mxu2 %v3047_v2 }
  0xed   : > { %v2363_v31 = vadd.f32 %v2362_v15, %v2300_v25  ;;  %1993 = vmatmul.bf16.gmra.mxu1 %v3071_v17  ;;  %2073 = vmatmul.bf16.gmra.mxu3 %v3087_v3 }
  0xef   : > { %v3810_v12 = vpop.f32.mrf.mxu2 }
  0xf0   : > { %v3812_v13 = vpop.f32.mrf.mxu3 }
  0xf1   : > { %v940_v36 = vpop.f32.mrf.mxu0 }
  0xf2   : > { %v1956_v37 = vpop.f32.mrf.mxu1  ;;  %v3122_v38 = vpack.c.bf16 %v940_v36, %v938_v20  ;;  %v1409_v39 = vadd.f32 %v1408_v22, %v940_v36  ;;  %v1480_v40 = vmul.f32 %v940_v36, %v940_v36  ;;  %v3033_v20 = vld [vmem:[%s3670_s16 + $0x70] sm:$0xff] }
  0xf3   : > { %v3282_v41 = vpack.c.bf16 %v1956_v37, %v1954_v21  ;;  %v2230_v44 = vadd.f32 %v2229_v24, %v1956_v37  ;;  %v2301_v45 = vmul.f32 %v1956_v37, %v1956_v37  ;;  %v3073_v21 = vld [vmem:[%s3676_s18 + $0x70] sm:$0xff] }
  0xf4   : > { %3422 = vst [vmem:[%s3716_s21 + $0x20] sm:$0xff] %v3122_v38   ;;  %v1543_v48 = vadd.f32 %v1542_v30, %v1480_v40  ;;  %v3048_v38 = vld [vmem:[%s3670_s16 + $0xe8] sm:$0xff] }
  0xf5   : > { %3453 = vst [vmem:[%s3722_s24 + $0x20] sm:$0xff] %v3282_v41   ;;  %v2364_v49 = vadd.f32 %v2363_v31, %v2301_v45 }
  0xf7   : > { %v3818_v30 = vpop.f32.mrf.mxu2 }
  0xf8   : > { %v3820_v31 = vpop.f32.mrf.mxu3  ;;  %v3202_v34 = vpack.c.bf16 %v3818_v30, %v3810_v12 }
  0xf9   : > { %v943_v52 = vpop.f32.mrf.mxu0  ;;  %v3362_v35 = vpack.c.bf16 %v3820_v31, %v3812_v13 }
  0xfa   : > { %v1959_v53 = vpop.f32.mrf.mxu1  ;;  %v1410_v54 = vadd.f32 %v1409_v39, %v943_v52  ;;  %v1481_v55 = vmul.f32 %v943_v52, %v943_v52  ;;  %v3088_v39 = vld [vmem:[%s3676_s18 + $0xe8] sm:$0xff]  ;;  %3438 = vst [vmem:[%s3716_s21 + $0xa0] sm:$0xff] %v3202_v34  }
  0xfb   : > { %v2231_v56 = vadd.f32 %v2230_v44, %v1959_v53  ;;  %v2302_v57 = vmul.f32 %v1959_v53, %v1959_v53  ;;  %3469 = vst [vmem:[%s3722_s24 + $0xa0] sm:$0xff] %v3362_v35  }
  0xfc   : > { %v1544_v0 = vadd.f32 %v1543_v48, %v1481_v55  ;;  %982 = vmatmul.bf16.gmra.mxu0 %v3032_v50  ;;  %1062 = vmatmul.bf16.gmra.mxu2 %v3048_v38 }
  0xfd   : > { %v2365_v1 = vadd.f32 %v2364_v49, %v2302_v57  ;;  %1998 = vmatmul.bf16.gmra.mxu1 %v3072_v51  ;;  %2078 = vmatmul.bf16.gmra.mxu3 %v3088_v39  ;;  %v3074_v57 = vld [vmem:[%s3676_s18 + $0x78] sm:$0xff] }
  0xff   : > { %v3830_v50 = vpop.f32.mrf.mxu2 }
 0x100   : > { %v3832_v51 = vpop.f32.mrf.mxu3 }
 0x101   : > { %v945_v4 = vpop.f32.mrf.mxu0 }
 0x102   : > { %v1961_v5 = vpop.f32.mrf.mxu1  ;;  %v3127_v6 = vpack.c.bf16 %v945_v4, %v943_v52  ;;  %v1411_v7 = vadd.f32 %v1410_v54, %v945_v4  ;;  %v1482_v8 = vmul.f32 %v945_v4, %v945_v4 }
 0x103   : > { %v3287_v9 = vpack.c.bf16 %v1961_v5, %v1959_v53  ;;  %v2232_v14 = vadd.f32 %v2231_v56, %v1961_v5  ;;  %v2303_v15 = vmul.f32 %v1961_v5, %v1961_v5  ;;  %v3034_v56 = vld [vmem:[%s3670_s16 + $0x78] sm:$0xff] }
 0x104   : > { %3423 = vst [vmem:[%s3716_s21 + $0x28] sm:$0xff] %v3127_v6   ;;  %v1545_v16 = vadd.f32 %v1544_v0, %v1482_v8 }
 0x105   : > { %3454 = vst [vmem:[%s3722_s24 + $0x28] sm:$0xff] %v3287_v9   ;;  %v2366_v17 = vadd.f32 %v2365_v1, %v2303_v15  ;;  %v3089_v15 = vld [vmem:[%s3676_s18 + $0xf0] sm:$0xff] }
 0x107   : > { %v3838_v4 = vpop.f32.mrf.mxu2 }
 0x108   : > { %v3840_v5 = vpop.f32.mrf.mxu3  ;;  %v3207_v6 = vpack.c.bf16 %v3838_v4, %v3830_v50 }
 0x109   : > { %v948_v22 = vpop.f32.mrf.mxu0 }
 0x10a   : > { %v1964_v23 = vpop.f32.mrf.mxu1  ;;  %v1412_v24 = vadd.f32 %v1411_v7, %v948_v22  ;;  %v1483_v25 = vmul.f32 %v948_v22, %v948_v22  ;;  %v3367_v7 = vpack.c.bf16 %v3840_v5, %v3832_v51  ;;  %3439 = vst [vmem:[%s3716_s21 + $0xa8] sm:$0xff] %v3207_v6  }
 0x10b   : > { %v2233_v28 = vadd.f32 %v2232_v14, %v1964_v23  ;;  %v2304_v29 = vmul.f32 %v1964_v23, %v1964_v23  ;;  %v3049_v14 = vld [vmem:[%s3670_s16 + $0xf0] sm:$0xff] }
 0x10c   : > { %v1546_v36 = vadd.f32 %v1545_v16, %v1483_v25  ;;  %987 = vmatmul.bf16.gmra.mxu0 %v3033_v20  ;;  %3470 = vst [vmem:[%s3722_s24 + $0xa8] sm:$0xff] %v3367_v7   ;;  %1067 = vmatmul.bf16.gmra.mxu2 %v3049_v14 }
 0x10d   : > { %v2367_v37 = vadd.f32 %v2366_v17, %v2304_v29  ;;  %2003 = vmatmul.bf16.gmra.mxu1 %v3073_v21  ;;  %2083 = vmatmul.bf16.gmra.mxu3 %v3089_v15 }
 0x110   : > { %v3852_v25 = vpop.f32.mrf.mxu3 }
 0x111   : > { %v950_v40 = vpop.f32.mrf.mxu0 }
 0x112   : > { %v1966_v41 = vpop.f32.mrf.mxu1  ;;  %v3132_v44 = vpack.c.bf16 %v950_v40, %v948_v22  ;;  %v1413_v45 = vadd.f32 %v1412_v24, %v950_v40  ;;  %v1484_v48 = vmul.f32 %v950_v40, %v950_v40  ;;  %v3850_v24 = vpop.f32.mrf.mxu2 }
 0x113   : > { %v3292_v49 = vpack.c.bf16 %v1966_v41, %v1964_v23  ;;  %v2234_v52 = vadd.f32 %v2233_v28, %v1966_v41  ;;  %v2305_v53 = vmul.f32 %v1966_v41, %v1966_v41 }
 0x114   : > { %3424 = vst [vmem:[%s3716_s21 + $0x30] sm:$0xff] %v3132_v44   ;;  %v1547_v54 = vadd.f32 %v1546_v36, %v1484_v48 }
 0x115   : > { %3455 = vst [vmem:[%s3722_s24 + $0x30] sm:$0xff] %v3292_v49   ;;  %v2368_v55 = vadd.f32 %v2367_v37, %v2305_v53 }
 0x119   : > { %v953_v62 = vpop.f32.mrf.mxu0 }
 0x11a   : > { %v1969_v63 = vpop.f32.mrf.mxu1  ;;  %v1414_v0 = vadd.f32 %v1413_v45, %v953_v62  ;;  %v1485_v1 = vmul.f32 %v953_v62, %v953_v62  ;;  %v3856_v44 = vpop.f32.mrf.mxu2 }
 0x11b   : > { %v2235_v2 = vadd.f32 %v2234_v52, %v1969_v63  ;;  %v2306_v3 = vmul.f32 %v1969_v63, %v1969_v63  ;;  %v3858_v45 = vpop.f32.mrf.mxu3  ;;  %v3212_v48 = vpack.c.bf16 %v3856_v44, %v3850_v24 }
 0x11c   : > { %v1548_v8 = vadd.f32 %v1547_v54, %v1485_v1  ;;  %992 = vmatmul.bf16.gmra.mxu0 %v3034_v56  ;;  %v3372_v49 = vpack.c.bf16 %v3858_v45, %v3852_v25  ;;  %v3050_v54 = vld [vmem:[%s3670_s16 + $0xf8] sm:$0xff] }
 0x11d   : > { %v2369_v9 = vadd.f32 %v2368_v55, %v2306_v3  ;;  %2008 = vmatmul.bf16.gmra.mxu1 %v3074_v57  ;;  %v3090_v55 = vld [vmem:[%s3676_s18 + $0xf8] sm:$0xff]  ;;  %3440 = vst [vmem:[%s3716_s21 + $0xb0] sm:$0xff] %v3212_v48   ;;  %1072 = vmatmul.bf16.gmra.mxu2 %v3050_v54 }
 0x11e   : > { %3471 = vst [vmem:[%s3722_s24 + $0xb0] sm:$0xff] %v3372_v49   ;;  %2088 = vmatmul.bf16.gmra.mxu3 %v3090_v55 }
 0x121   : > { %v955_v16 = vpop.f32.mrf.mxu0 }
 0x122   : > { %v1971_v17 = vpop.f32.mrf.mxu1  ;;  %v3137_v20 = vpack.c.bf16 %v955_v16, %v953_v62  ;;  %v1415_v21 = vadd.f32 %v1414_v0, %v955_v16  ;;  %v1486_v22 = vmul.f32 %v955_v16, %v955_v16 }
 0x123   : > { %v3297_v23 = vpack.c.bf16 %v1971_v17, %v1969_v63  ;;  %v2236_v28 = vadd.f32 %v2235_v2, %v1971_v17  ;;  %v2307_v29 = vmul.f32 %v1971_v17, %v1971_v17  ;;  %v3868_v2 = vpop.f32.mrf.mxu2  ;;  %v3870_v3 = vpop.f32.mrf.mxu3 }
 0x124   : > { %3425 = vst [vmem:[%s3716_s21 + $0x38] sm:$0xff] %v3137_v20   ;;  %v1549_v34 = vadd.f32 %v1548_v8, %v1486_v22 }
 0x125   : > { %3456 = vst [vmem:[%s3722_s24 + $0x38] sm:$0xff] %v3297_v23   ;;  %v2370_v35 = vadd.f32 %v2369_v9, %v2307_v29 }
 0x126   : > { %4383 = vst [vmem:[#allocation3_spill] sm:$0xff] %v3870_v3 }
 0x129   : > { %v958_v36 = vpop.f32.mrf.mxu0 }
 0x12a   : > { %v1974_v37 = vpop.f32.mrf.mxu1  ;;  %v1416_v38 = vadd.f32 %v1415_v21, %v958_v36  ;;  %v1487_v39 = vmul.f32 %v958_v36, %v958_v36 }
 0x12b   : > { %v2237_v40 = vadd.f32 %v2236_v28, %v1974_v37  ;;  %v2308_v41 = vmul.f32 %v1974_v37, %v1974_v37  ;;  %v3874_v22 = vpop.f32.mrf.mxu2  ;;  %v3876_v23 = vpop.f32.mrf.mxu3 }
 0x12c   : > { %v1550_v52 = vadd.f32 %v1549_v34, %v1487_v39  ;;  %4384 = vst [vmem:[#allocation4_spill] sm:$0xff] %v3874_v22  ;;  %v3217_v28 = vpack.c.bf16 %v3874_v22, %v3868_v2  ;;  %v3377_v29 = vpack.c.bf16 %v3876_v23, %v3870_v3 }
 0x12d   : > { %v2371_v53 = vadd.f32 %v2370_v35, %v2308_v41  ;;  %4385 = vst [vmem:[#allocation5_spill] sm:$0xff] %v3876_v23 }
 0x12e   : > { %3441 = vst [vmem:[%s3716_s21 + $0xb8] sm:$0xff] %v3217_v28  }
 0x12f   : > { %3472 = vst [vmem:[%s3722_s24 + $0xb8] sm:$0xff] %v3377_v29  }
 0x131   : > { %v960_v56 = vpop.f32.mrf.mxu0 }
 0x132   : > { %v1976_v57 = vpop.f32.mrf.mxu1  ;;  %v3142_v62 = vpack.c.bf16 %v960_v56, %v958_v36  ;;  %v1417_v63 = vadd.f32 %v1416_v38, %v960_v56  ;;  %v1488_v0 = vmul.f32 %v960_v56, %v960_v56 }
 0x133   : > { %v3302_v1 = vpack.c.bf16 %v1976_v57, %v1974_v37  ;;  %v2238_v6 = vadd.f32 %v2237_v40, %v1976_v57  ;;  %v2309_v7 = vmul.f32 %v1976_v57, %v1976_v57  ;;  %v3884_v48 = vpop.f32.mrf.mxu2  ;;  %v3886_v49 = vpop.f32.mrf.mxu3 }
 0x134   : > { %3426 = vst [vmem:[%s3716_s21 + $0x40] sm:$0xff] %v3142_v62   ;;  %v1551_v8 = vadd.f32 %v1550_v52, %v1488_v0 }
 0x135   : > { %3457 = vst [vmem:[%s3722_s24 + $0x40] sm:$0xff] %v3302_v1   ;;  %v2372_v9 = vadd.f32 %v2371_v53, %v2309_v7 }
 0x136   : > { %4386 = vst [vmem:[#allocation6_spill] sm:$0xff] %v3884_v48 }
 0x137   : > { %4387 = vst [vmem:[#allocation7_spill] sm:$0xff] %v3886_v49 }
 0x139   : > { %v963_v14 = vpop.f32.mrf.mxu0 }
 0x13a   : > { %v1979_v15 = vpop.f32.mrf.mxu1  ;;  %v1418_v16 = vadd.f32 %v1417_v63, %v963_v14  ;;  %v1489_v17 = vmul.f32 %v963_v14, %v963_v14 }
 0x13b   : > { %v2239_v20 = vadd.f32 %v2238_v6, %v1979_v15  ;;  %v2310_v21 = vmul.f32 %v1979_v15, %v1979_v15  ;;  %v3894_v6 = vpop.f32.mrf.mxu2  ;;  %v3896_v7 = vpop.f32.mrf.mxu3 }
 0x13c   : > { %v1552_v34 = vadd.f32 %v1551_v8, %v1489_v17  ;;  %4388 = vst [vmem:[#allocation8_spill] sm:$0xff] %v3894_v6  ;;  %v3222_v8 = vpack.c.bf16 %v3894_v6, %v3884_v48 }
 0x13d   : > { %v2373_v35 = vadd.f32 %v2372_v9, %v2310_v21  ;;  %4389 = vst [vmem:[#allocation9_spill] sm:$0xff] %v3896_v7  ;;  %v3382_v9 = vpack.c.bf16 %v3896_v7, %v3886_v49 }
 0x13e   : > { %3442 = vst [vmem:[%s3716_s21 + $0xc0] sm:$0xff] %v3222_v8  }
 0x13f   : > { %3473 = vst [vmem:[%s3722_s24 + $0xc0] sm:$0xff] %v3382_v9  }
 0x141   : > { %v965_v36 = vpop.f32.mrf.mxu0 }
 0x142   : > { %v1981_v37 = vpop.f32.mrf.mxu1  ;;  %v3147_v38 = vpack.c.bf16 %v965_v36, %v963_v14  ;;  %v1419_v39 = vadd.f32 %v1418_v16, %v965_v36  ;;  %v1490_v40 = vmul.f32 %v965_v36, %v965_v36 }
 0x143   : > { %v3307_v41 = vpack.c.bf16 %v1981_v37, %v1979_v15  ;;  %v2240_v52 = vadd.f32 %v2239_v20, %v1981_v37  ;;  %v2311_v53 = vmul.f32 %v1981_v37, %v1981_v37  ;;  %v3914_v28 = vpop.f32.mrf.mxu2  ;;  %v3916_v29 = vpop.f32.mrf.mxu3 }
 0x144   : > { %3427 = vst [vmem:[%s3716_s21 + $0x48] sm:$0xff] %v3147_v38   ;;  %v1553_v54 = vadd.f32 %v1552_v34, %v1490_v40 }
 0x145   : > { %3458 = vst [vmem:[%s3722_s24 + $0x48] sm:$0xff] %v3307_v41   ;;  %v2374_v55 = vadd.f32 %v2373_v35, %v2311_v53 }
 0x146   : > { %4390 = vst [vmem:[#allocation10_spill] sm:$0xff] %v3914_v28 }
 0x147   : > { %4391 = vst [vmem:[#allocation11_spill] sm:$0xff] %v3916_v29 }
 0x149   : > { %v968_v56 = vpop.f32.mrf.mxu0 }
 0x14a   : > { %v1984_v57 = vpop.f32.mrf.mxu1  ;;  %v3890_v62 = vadd.f32 %v1419_v39, %v968_v56  ;;  %v1491_v63 = vmul.f32 %v968_v56, %v968_v56 }
 0x14b   : > { %v3892_v0 = vadd.f32 %v2240_v52, %v1984_v57  ;;  %v2312_v1 = vmul.f32 %v1984_v57, %v1984_v57  ;;  %v3924_v36 = vpop.f32.mrf.mxu2  ;;  %v3926_v37 = vpop.f32.mrf.mxu3 }
 0x14c   : > { %v3902_v14 = vadd.f32 %v1553_v54, %v1491_v63  ;;  %4392 = vst [vmem:[#allocation12_spill] sm:$0xff] %v3924_v36  ;;  %v3227_v38 = vpack.c.bf16 %v3924_v36, %v3914_v28  ;;  %v3387_v39 = vpack.c.bf16 %v3926_v37, %v3916_v29 }
 0x14d   : > { %v3904_v15 = vadd.f32 %v2374_v55, %v2312_v1  ;;  %4393 = vst [vmem:[#allocation13_spill] sm:$0xff] %v3926_v37 }
 0x14e   : > { %3443 = vst [vmem:[%s3716_s21 + $0xc8] sm:$0xff] %v3227_v38  }
 0x14f   : > { %3474 = vst [vmem:[%s3722_s24 + $0xc8] sm:$0xff] %v3387_v39  }
 0x151   : > { %v3908_v16 = vpop.f32.mrf.mxu0 }
 0x152   : > { %v3910_v17 = vpop.f32.mrf.mxu1  ;;  %v3152_v20 = vpack.c.bf16 %v3908_v16, %v968_v56 }
 0x153   : > { %v3312_v21 = vpack.c.bf16 %v3910_v17, %v1984_v57  ;;  %v3939_v54 = vpop.f32.mrf.mxu2  ;;  %v3941_v55 = vpop.f32.mrf.mxu3  ;;  %v2242_v48 = vadd.f32 %v3892_v0, %v3910_v17 }
 0x154   : > { %3428 = vst [vmem:[%s3716_s21 + $0x50] sm:$0xff] %v3152_v20  }
 0x155   : > { %3459 = vst [vmem:[%s3722_s24 + $0x50] sm:$0xff] %v3312_v21  }
 0x156   : > { %4394 = vst [vmem:[#allocation14_spill] sm:$0xff] %v3939_v54 }
 0x157   : > { %4395 = vst [vmem:[#allocation15_spill] sm:$0xff] %v3941_v55 }
 0x159   : > { %v3920_v34 = vpop.f32.mrf.mxu0 }
 0x15a   : > { %v3922_v35 = vpop.f32.mrf.mxu1  ;;  %v1493_v6 = vmul.f32 %v3920_v34, %v3920_v34 }
 0x15b   : > { %v3949_v63 = vpop.f32.mrf.mxu2  ;;  %v3951_v1 = vpop.f32.mrf.mxu3  ;;  %v2314_v49 = vmul.f32 %v3922_v35, %v3922_v35 }
 0x15c   : > { %4396 = vst [vmem:[#allocation16_spill] sm:$0xff] %v3949_v63  ;;  %v3232_v8 = vpack.c.bf16 %v3949_v63, %v3939_v54  ;;  %v3392_v9 = vpack.c.bf16 %v3951_v1, %v3941_v55 }
 0x15d   : > { %4397 = vst [vmem:[#allocation17_spill] sm:$0xff] %v3951_v1 }
 0x15e   : > { %3444 = vst [vmem:[%s3716_s21 + $0xd0] sm:$0xff] %v3232_v8  }
 0x15f   : > { %3475 = vst [vmem:[%s3722_s24 + $0xd0] sm:$0xff] %v3392_v9  }
 0x161   : > { %v975_v40 = vpop.f32.mrf.mxu0 }
 0x162   : > { %v3934_v41 = vpop.f32.mrf.mxu1  ;;  %v3157_v52 = vpack.c.bf16 %v975_v40, %v3920_v34 }
 0x163   : > { %v3317_v53 = vpack.c.bf16 %v3934_v41, %v3922_v35 }
 0x164   : > { %3429 = vst [vmem:[%s3716_s21 + $0x58] sm:$0xff] %v3157_v52   ;;  %v3967_v52 = vpop.f32.mrf.mxu2 }
 0x165   : > { %3460 = vst [vmem:[%s3722_s24 + $0x58] sm:$0xff] %v3317_v53   ;;  %v3969_v53 = vpop.f32.mrf.mxu3 }
 0x166   : > { %4398 = vst [vmem:[#allocation18_spill] sm:$0xff] %v3967_v52 }
 0x167   : > { %4399 = vst [vmem:[#allocation19_spill] sm:$0xff] %v3969_v53 }
 0x169   : > { %v3945_v56 = vpop.f32.mrf.mxu0 }
 0x16a   : > { %v3947_v57 = vpop.f32.mrf.mxu1  ;;  %v1495_v0 = vmul.f32 %v3945_v56, %v3945_v56 }
 0x16c   : > { %v3977_v1 = vpop.f32.mrf.mxu2 }
 0x16d   : > { %4400 = vst [vmem:[#allocation20_spill] sm:$0xff] %v3977_v1  ;;  %v3979_v63 = vpop.f32.mrf.mxu3  ;;  %v3237_v55 = vpack.c.bf16 %v3977_v1, %v3967_v52  ;;  %v2313_v52 = vmul.f32 %v3910_v17, %v3910_v17 }
 0x16e   : > { %4401 = vst [vmem:[#allocation21_spill] sm:$0xff] %v3979_v63  ;;  %v3397_v54 = vpack.c.bf16 %v3979_v63, %v3969_v53  ;;  %v1492_v53 = vmul.f32 %v3908_v16, %v3908_v16 }
 0x16f   : > { %3445 = vst [vmem:[%s3716_s21 + $0xd8] sm:$0xff] %v3237_v55  }
 0x170   : > { %3476 = vst [vmem:[%s3722_s24 + $0xd8] sm:$0xff] %v3397_v54   ;;  %v1555_v23 = vadd.f32 %v3902_v14, %v1492_v53 }
 0x171   : > { %v3959_v20 = vpop.f32.mrf.mxu0 }
 0x172   : > { %v3961_v21 = vpop.f32.mrf.mxu1  ;;  %v3162_v38 = vpack.c.bf16 %v3959_v20, %v3945_v56 }
 0x173   : > { %v3322_v39 = vpack.c.bf16 %v3961_v21, %v3947_v57 }
 0x174   : > { %3430 = vst [vmem:[%s3716_s21 + $0x60] sm:$0xff] %v3162_v38   ;;  %v3995_v29 = vpop.f32.mrf.mxu2 }
 0x175   : > { %3461 = vst [vmem:[%s3722_s24 + $0x60] sm:$0xff] %v3322_v39   ;;  %v3997_v28 = vpop.f32.mrf.mxu3 }
 0x176   : > { %4402 = vst [vmem:[#allocation22_spill] sm:$0xff] %v3995_v29 }
 0x177   : > { %4403 = vst [vmem:[#allocation23_spill] sm:$0xff] %v3997_v28 }
 0x179   : > { %v3973_v8 = vpop.f32.mrf.mxu0 }
 0x17a   : > { %v3975_v9 = vpop.f32.mrf.mxu1  ;;  %v1497_v53 = vmul.f32 %v3973_v8, %v3973_v8 }
 0x17c   : > { %v4005_v63 = vpop.f32.mrf.mxu2 }
 0x17d   : > { %4404 = vst [vmem:[#allocation24_spill] sm:$0xff] %v4005_v63  ;;  %v4007_v1 = vpop.f32.mrf.mxu3  ;;  %v3242_v7 = vpack.c.bf16 %v4005_v63, %v3995_v29  ;;  %v2376_v63 = vadd.f32 %v3904_v15, %v2313_v52  ;;  %v1556_v29 = vadd.f32 %v1555_v23, %v1493_v6  ;;  %v2316_v15 = vmul.f32 %v3947_v57, %v3947_v57 }
 0x17e   : > { %4405 = vst [vmem:[#allocation25_spill] sm:$0xff] %v4007_v1  ;;  %v1496_v6 = vmul.f32 %v3959_v20, %v3959_v20 }
 0x17f   : > { %3446 = vst [vmem:[%s3716_s21 + $0xe0] sm:$0xff] %v3242_v7   ;;  %v2377_v22 = vadd.f32 %v2376_v63, %v2314_v49 }
 0x181   : > { %v3987_v38 = vpop.f32.mrf.mxu0 }
 0x182   : > { %v3989_v39 = vpop.f32.mrf.mxu1  ;;  %v3167_v37 = vpack.c.bf16 %v3987_v38, %v3973_v8 }
 0x183   : > { %v3327_v36 = vpack.c.bf16 %v3989_v39, %v3975_v9 }
 0x184   : > { %3431 = vst [vmem:[%s3716_s21 + $0x68] sm:$0xff] %v3167_v37   ;;  %v1421_v37 = vadd.f32 %v3890_v62, %v3908_v16  ;;  %v2243_v62 = vadd.f32 %v2242_v48, %v3922_v35  ;;  %v2315_v16 = vmul.f32 %v3934_v41, %v3934_v41  ;;  %v4040_v35 = vpop.f32.mrf.mxu2 }
 0x185   : > { %3462 = vst [vmem:[%s3722_s24 + $0x68] sm:$0xff] %v3327_v36   ;;  %v3402_v36 = vpack.c.bf16 %v4007_v1, %v3997_v28  ;;  %v1494_v28 = vmul.f32 %v975_v40, %v975_v40  ;;  %v4042_v23 = vpop.f32.mrf.mxu3 }
 0x186   : > { %v1422_v1 = vadd.f32 %v1421_v37, %v3920_v34  ;;  %v2244_v14 = vadd.f32 %v2243_v62, %v3934_v41 }
 0x187   : > { %3477 = vst [vmem:[%s3722_s24 + $0xe0] sm:$0xff] %v3402_v36   ;;  %v1557_v49 = vadd.f32 %v1556_v29, %v1494_v28 }
 0x188   : > { %v1423_v3 = vadd.f32 %v1422_v1, %v975_v40  ;;  %v2378_v40 = vadd.f32 %v2377_v22, %v2315_v16  ;;  %v2245_v41 = vadd.f32 %v2244_v14, %v3947_v57  ;;  %v2317_v1 = vmul.f32 %v3961_v21, %v3961_v21 }
 0x189   : > { %v4001_v55 = vpop.f32.mrf.mxu0  ;;  %v1558_v52 = vadd.f32 %v1557_v49, %v1495_v0  ;;  %v2318_v22 = vmul.f32 %v3975_v9, %v3975_v9  ;;  %v2319_v16 = vmul.f32 %v3989_v39, %v3989_v39 }
 0x18a   : > { %v4003_v54 = vpop.f32.mrf.mxu1  ;;  %v1424_v63 = vadd.f32 %v1423_v3, %v3945_v56  ;;  %v2379_v36 = vadd.f32 %v2378_v40, %v2316_v15  ;;  %v2246_v29 = vadd.f32 %v2245_v41, %v3961_v21  ;;  %v1498_v56 = vmul.f32 %v3987_v38, %v3987_v38 }
 0x18b   : > { %v1559_v3 = vadd.f32 %v1558_v52, %v1496_v6  ;;  %v2320_v6 = vmul.f32 %v4003_v54, %v4003_v54 }
 0x18c   : > { %v1425_v28 = vadd.f32 %v1424_v63, %v3959_v20  ;;  %v2380_v57 = vadd.f32 %v2379_v36, %v2317_v1  ;;  %v2247_v62 = vadd.f32 %v2246_v29, %v3975_v9  ;;  %v1499_v20 = vmul.f32 %v4001_v55, %v4001_v55  ;;  %v4068_v49 = vpop.f32.mrf.mxu2 }
 0x18d   : > { %v1560_v0 = vadd.f32 %v1559_v3, %v1497_v53  ;;  %v3247_v63 = vpack.c.bf16 %v4068_v49, %v4040_v35 }
 0x18e   : > { %v1426_v37 = vadd.f32 %v1425_v28, %v3973_v8  ;;  %v2381_v15 = vadd.f32 %v2380_v57, %v2318_v22  ;;  %v4070_v8 = vpop.f32.mrf.mxu3 }
 0x18f   : > { %v1561_v9 = vadd.f32 %v1560_v0, %v1498_v56  ;;  %3447 = vst [vmem:[%s3716_s21 + $0xe8] sm:$0xff] %v3247_v63  }
 0x190   : > { %v2382_v41 = vadd.f32 %v2381_v15, %v2319_v16 }
 0x191   : > { %v990_v7 = vpop.f32.mrf.mxu0 }
 0x192   : > { %v2006_v17 = vpop.f32.mrf.mxu1  ;;  %v3172_v48 = vpack.c.bf16 %v990_v7, %v4001_v55  ;;  %v1500_v40 = vmul.f32 %v990_v7, %v990_v7  ;;  %v2383_v29 = vadd.f32 %v2382_v41, %v2320_v6 }
 0x193   : > { %v3332_v34 = vpack.c.bf16 %v2006_v17, %v4003_v54  ;;  %v2321_v53 = vmul.f32 %v2006_v17, %v2006_v17 }
 0x194   : > { %3432 = vst [vmem:[%s3716_s21 + $0x70] sm:$0xff] %v3172_v48   ;;  %v1427_v48 = vadd.f32 %v1426_v37, %v3987_v38  ;;  %v3407_v38 = vpack.c.bf16 %v4070_v8, %v4042_v23 }
 0x195   : > { %3463 = vst [vmem:[%s3722_s24 + $0x70] sm:$0xff] %v3332_v34   ;;  %v2248_v34 = vadd.f32 %v2247_v62, %v3989_v39  ;;  %v1562_v39 = vadd.f32 %v1561_v9, %v1499_v20  ;;  %v2384_v37 = vadd.f32 %v2383_v29, %v2321_v53  ;;  %v2325_v53 = vmul.f32 %v3740_v33, %v3740_v33 }
 0x196   : > { %v1428_v1 = vadd.f32 %v1427_v48, %v4001_v55  ;;  %3478 = vst [vmem:[%s3722_s24 + $0xe8] sm:$0xff] %v3407_v38   ;;  %v1504_v38 = vmul.f32 %v3738_v32, %v3738_v32 }
 0x197   : > { %v2249_v52 = vadd.f32 %v2248_v34, %v4003_v54  ;;  %v1563_v22 = vadd.f32 %v1562_v39, %v1500_v40  ;;  %v4082_v34 = vpop.f32.mrf.mxu2  ;;  %v1503_v40 = vmul.f32 %v3730_v18, %v3730_v18 }
 0x198   : > { %v1429_v28 = vadd.f32 %v1428_v1, %v990_v7  ;;  %v4084_v7 = vpop.f32.mrf.mxu3 }
 0x199   : > { %v993_v21 = vpop.f32.mrf.mxu0  ;;  %v2250_v3 = vadd.f32 %v2249_v52, %v2006_v17 }
 0x19a   : > { %v2009_v14 = vpop.f32.mrf.mxu1  ;;  %v1501_v36 = vmul.f32 %v993_v21, %v993_v21  ;;  %v1430_v57 = vadd.f32 %v1429_v28, %v993_v21  ;;  %v1505_v28 = vmul.f32 %v3750_v46, %v3750_v46 }
 0x19b   : > { %v2322_v56 = vmul.f32 %v2009_v14, %v2009_v14  ;;  %v2251_v55 = vadd.f32 %v2250_v3, %v2009_v14 }
 0x19c   : > { %v1564_v62 = vadd.f32 %v1563_v22, %v1501_v36 }
 0x19d   : > { %v2385_v9 = vadd.f32 %v2384_v37, %v2322_v56 }
 0x1a1   : > { %v995_v16 = vpop.f32.mrf.mxu0 }
 0x1a2   : > { %v2011_v0 = vpop.f32.mrf.mxu1  ;;  %v3177_v20 = vpack.c.bf16 %v995_v16, %v993_v21  ;;  %v1431_v15 = vadd.f32 %v1430_v57, %v995_v16  ;;  %v1502_v54 = vmul.f32 %v995_v16, %v995_v16  ;;  %v2324_v21 = vmul.f32 %v3732_v19, %v3732_v19 }
 0x1a3   : > { %v3337_v48 = vpack.c.bf16 %v2011_v0, %v2009_v14  ;;  %v2252_v6 = vadd.f32 %v2251_v55, %v2011_v0  ;;  %v2323_v17 = vmul.f32 %v2011_v0, %v2011_v0 }
 0x1a4   : > { %3433 = vst [vmem:[%s3716_s21 + $0x78] sm:$0xff] %v3177_v20   ;;  %v1432_v63 = vadd.f32 %v1431_v15, %v3730_v18  ;;  %v1565_v41 = vadd.f32 %v1564_v62, %v1502_v54  ;;  %v4111_v62 = vpop.f32.mrf.mxu3  ;;  %v2328_v15 = vmul.f32 %v3772_v11, %v3772_v11 }
 0x1a5   : > { %3464 = vst [vmem:[%s3722_s24 + $0x78] sm:$0xff] %v3337_v48   ;;  %v2253_v14 = vadd.f32 %v2252_v6, %v3732_v19  ;;  %v2386_v1 = vadd.f32 %v2385_v9, %v2323_v17  ;;  %v2326_v19 = vmul.f32 %v3752_v47, %v3752_v47  ;;  %v1508_v9 = vmul.f32 %v3778_v26, %v3778_v26 }
 0x1a6   : > { %v1433_v39 = vadd.f32 %v1432_v63, %v3738_v32  ;;  %v1566_v52 = vadd.f32 %v1565_v41, %v1503_v40  ;;  %v1506_v32 = vmul.f32 %v3758_v60, %v3758_v60 }
 0x1a7   : > { %v2254_v36 = vadd.f32 %v2253_v14, %v3740_v33  ;;  %v2387_v18 = vadd.f32 %v2386_v1, %v2324_v21  ;;  %v4109_v33 = vpop.f32.mrf.mxu2  ;;  %v2330_v14 = vmul.f32 %v3792_v43, %v3792_v43 }
 0x1a8   : > { %v1434_v29 = vadd.f32 %v1433_v39, %v3750_v46  ;;  %v1567_v22 = vadd.f32 %v1566_v52, %v1504_v38  ;;  %v2327_v46 = vmul.f32 %v3760_v61, %v3760_v61  ;;  %v1510_v38 = vmul.f32 %v3798_v58, %v3798_v58 }
 0x1a9   : > { %v2255_v3 = vadd.f32 %v2254_v36, %v3752_v47  ;;  %v2388_v56 = vadd.f32 %v2387_v18, %v2325_v53  ;;  %v1507_v47 = vmul.f32 %v3770_v10, %v3770_v10 }
 0x1aa   : > { %v1435_v57 = vadd.f32 %v1434_v29, %v3758_v60  ;;  %v1568_v37 = vadd.f32 %v1567_v22, %v1505_v28  ;;  %v3252_v60 = vpack.c.bf16 %v4109_v33, %v4082_v34 }
 0x1ab   : > { %v2256_v55 = vadd.f32 %v2255_v3, %v3760_v61  ;;  %v2389_v16 = vadd.f32 %v2388_v56, %v2326_v19  ;;  %v3412_v61 = vpack.c.bf16 %v4111_v62, %v4084_v7  ;;  %v1512_v3 = vmul.f32 %v3818_v30, %v3818_v30 }
 0x1ac   : > { %v1436_v0 = vadd.f32 %v1435_v57, %v3770_v10  ;;  %v1569_v20 = vadd.f32 %v1568_v37, %v1506_v32  ;;  %3448 = vst [vmem:[%s3716_s21 + $0xf0] sm:$0xff] %v3252_v60   ;;  %v2329_v10 = vmul.f32 %v3780_v27, %v3780_v27  ;;  %v4145_v53 = vpop.f32.mrf.mxu3 }
 0x1ad   : > { %v2257_v54 = vadd.f32 %v2256_v55, %v3772_v11  ;;  %v2390_v48 = vadd.f32 %v2389_v16, %v2327_v46  ;;  %3479 = vst [vmem:[%s3722_s24 + $0xf0] sm:$0xff] %v3412_v61   ;;  %v1509_v11 = vmul.f32 %v3790_v42, %v3790_v42 }
 0x1ae   : > { %v1437_v6 = vadd.f32 %v1436_v0, %v3778_v26  ;;  %v1570_v17 = vadd.f32 %v1569_v20, %v1507_v47 }
 0x1af   : > { %v2258_v40 = vadd.f32 %v2257_v54, %v3780_v27  ;;  %v2391_v63 = vadd.f32 %v2390_v48, %v2328_v15  ;;  %v4143_v52 = vpop.f32.mrf.mxu2 }
 0x1b0   : > { %v1438_v41 = vadd.f32 %v1437_v6, %v3790_v42  ;;  %v1571_v21 = vadd.f32 %v1570_v17, %v1508_v9  ;;  %v2331_v42 = vmul.f32 %v3800_v59, %v3800_v59  ;;  %v2336_v9 = vmul.f32 %v3852_v25, %v3852_v25 }
 0x1b1   : > { %v2259_v26 = vadd.f32 %v2258_v40, %v3792_v43  ;;  %v2392_v1 = vadd.f32 %v2391_v63, %v2329_v10  ;;  %v1511_v43 = vmul.f32 %v3810_v12, %v3810_v12  ;;  %v1516_v10 = vmul.f32 %v3856_v44, %v3856_v44 }
 0x1b2   : > { %v1439_v39 = vadd.f32 %v1438_v41, %v3798_v58  ;;  %v1572_v27 = vadd.f32 %v1571_v21, %v1509_v11  ;;  %v2332_v58 = vmul.f32 %v3812_v13, %v3812_v13 }
 0x1b3   : > { %v2260_v36 = vadd.f32 %v2259_v26, %v3800_v59  ;;  %v2393_v18 = vadd.f32 %v2392_v1, %v2330_v14  ;;  %v2333_v59 = vmul.f32 %v3820_v31, %v3820_v31  ;;  %v4406_v26 = vld [vmem:[#allocation3_spill] sm:$0xff] }
 0x1b4   : > { %v1440_v28 = vadd.f32 %v1439_v39, %v3810_v12  ;;  %v1573_v29 = vadd.f32 %v1572_v27, %v1510_v38  ;;  %v1513_v12 = vmul.f32 %v3830_v50, %v3830_v50  ;;  %v4173_v60 = vpop.f32.mrf.mxu3  ;;  %v2338_v1 = vmul.f32 %v4406_v26, %v4406_v26  ;;  %v4407_v39 = vld [vmem:[#allocation4_spill] sm:$0xff] }
 0x1b5   : > { %v2261_v22 = vadd.f32 %v2260_v36, %v3812_v13  ;;  %v2394_v19 = vadd.f32 %v2393_v18, %v2331_v42  ;;  %v2334_v13 = vmul.f32 %v3832_v51, %v3832_v51  ;;  %v1518_v27 = vmul.f32 %v4407_v39, %v4407_v39  ;;  %v4408_v36 = vld [vmem:[#allocation5_spill] sm:$0xff] }
 0x1b6   : > { %v1441_v56 = vadd.f32 %v1440_v28, %v3818_v30  ;;  %v1574_v32 = vadd.f32 %v1573_v29, %v1511_v43  ;;  %v1514_v30 = vmul.f32 %v3838_v4, %v3838_v4  ;;  %v2339_v18 = vmul.f32 %v4408_v36, %v4408_v36 }
 0x1b7   : > { %v2262_v57 = vadd.f32 %v2261_v22, %v3820_v31  ;;  %v2395_v37 = vadd.f32 %v2394_v19, %v2332_v58  ;;  %v4171_v31 = vpop.f32.mrf.mxu2  ;;  %v4410_v19 = vld [vmem:[#allocation7_spill] sm:$0xff] }
 0x1b8   : > { %v1442_v46 = vadd.f32 %v1441_v56, %v3830_v50  ;;  %v1575_v55 = vadd.f32 %v1574_v32, %v1512_v3  ;;  %v2335_v50 = vmul.f32 %v3840_v5, %v3840_v5  ;;  %v2340_v3 = vmul.f32 %v4410_v19, %v4410_v19 }
 0x1b9   : > { %v2263_v16 = vadd.f32 %v2262_v57, %v3832_v51  ;;  %v2396_v47 = vadd.f32 %v2395_v37, %v2333_v59  ;;  %v1515_v51 = vmul.f32 %v3850_v24, %v3850_v24  ;;  %v4411_v59 = vld [vmem:[#allocation8_spill] sm:$0xff] }
 0x1ba   : > { %v1443_v0 = vadd.f32 %v1442_v46, %v3838_v4  ;;  %v1576_v20 = vadd.f32 %v1575_v55, %v1513_v12  ;;  %v3257_v4 = vpack.c.bf16 %v4171_v31, %v4143_v52  ;;  %v1520_v57 = vmul.f32 %v4411_v59, %v4411_v59  ;;  %v4412_v46 = vld [vmem:[#allocation9_spill] sm:$0xff] }
 0x1bb   : > { %v2264_v15 = vadd.f32 %v2263_v16, %v3840_v5  ;;  %v2397_v54 = vadd.f32 %v2396_v47, %v2334_v13  ;;  %v3417_v5 = vpack.c.bf16 %v4173_v60, %v4145_v53  ;;  %v2341_v55 = vmul.f32 %v4412_v46, %v4412_v46  ;;  %v4413_v47 = vld [vmem:[#allocation10_spill] sm:$0xff] }
 0x1bc   : > { %v1577_v48 = vadd.f32 %v1576_v20, %v1514_v30  ;;  %v1444_v61 = vadd.f32 %v1443_v0, %v3850_v24  ;;  %3449 = vst [vmem:[%s3716_s21 + $0xf8] sm:$0xff] %v3257_v4   ;;  %v2337_v24 = vmul.f32 %v3858_v45, %v3858_v45  ;;  %v1521_v30 = vmul.f32 %v4413_v47, %v4413_v47 }
 0x1bd   : > { %v2398_v6 = vadd.f32 %v2397_v54, %v2335_v50  ;;  %v2265_v17 = vadd.f32 %v2264_v15, %v3852_v25  ;;  %3480 = vst [vmem:[%s3722_s24 + $0xf8] sm:$0xff] %v3417_v5   ;;  %v1517_v25 = vmul.f32 %v3868_v2, %v3868_v2  ;;  %v4414_v50 = vld [vmem:[#allocation11_spill] sm:$0xff] }
 0x1be   : > { %v1445_v40 = vadd.f32 %v1444_v61, %v3856_v44  ;;  %v1578_v63 = vadd.f32 %v1577_v48, %v1515_v51  ;;  %v2342_v15 = vmul.f32 %v4414_v50, %v4414_v50  ;;  %v4415_v48 = vld [vmem:[#allocation12_spill] sm:$0xff] }
 0x1bf   : > { %v2266_v11 = vadd.f32 %v2265_v17, %v3858_v45  ;;  %v2399_v41 = vadd.f32 %v2398_v6, %v2336_v9  ;;  %v1522_v61 = vmul.f32 %v4415_v48, %v4415_v48  ;;  %v4416_v6 = vld [vmem:[#allocation13_spill] sm:$0xff] }
 0x1c0   : > { %v1446_v21 = vadd.f32 %v1445_v40, %v3868_v2  ;;  %v1579_v14 = vadd.f32 %v1578_v63, %v1516_v10  ;;  %v4409_v2 = vld [vmem:[#allocation6_spill] sm:$0xff]  ;;  %v2343_v17 = vmul.f32 %v4416_v6, %v4416_v6 }
 0x1c1   : > { %v2267_v44 = vadd.f32 %v2266_v11, %v4406_v26  ;;  %v2400_v38 = vadd.f32 %v2399_v41, %v2337_v24  ;;  %v1519_v29 = vmul.f32 %v4409_v2, %v4409_v2  ;;  %v4417_v40 = vld [vmem:[#allocation14_spill] sm:$0xff]  ;;  %v4418_v41 = vld [vmem:[#allocation15_spill] sm:$0xff]  ;;  %v4419_v26 = vld [vmem:[#allocation16_spill] sm:$0xff] }
 0x1c2   : > { %v1447_v42 = vadd.f32 %v1446_v21, %v4407_v39  ;;  %v1580_v45 = vadd.f32 %v1579_v14, %v1517_v25  ;;  %v1523_v63 = vmul.f32 %v4417_v40, %v4417_v40  ;;  %v2344_v25 = vmul.f32 %v4418_v41, %v4418_v41  ;;  %v4420_v39 = vld [vmem:[#allocation17_spill] sm:$0xff] }
 0x1c3   : > { %v2268_v43 = vadd.f32 %v2267_v44, %v4408_v36  ;;  %v2401_v28 = vadd.f32 %v2400_v38, %v2338_v1  ;;  %v1524_v1 = vmul.f32 %v4419_v26, %v4419_v26  ;;  %v4421_v36 = vld [vmem:[#allocation18_spill] sm:$0xff] }
 0x1c4   : > { %v1448_v58 = vadd.f32 %v1447_v42, %v4409_v2  ;;  %v1581_v22 = vadd.f32 %v1580_v45, %v1518_v27  ;;  %v2345_v27 = vmul.f32 %v4420_v39, %v4420_v39  ;;  %v4422_v2 = vld [vmem:[#allocation19_spill] sm:$0xff] }
 0x1c5   : > { %v2269_v56 = vadd.f32 %v2268_v43, %v4410_v19  ;;  %v2402_v32 = vadd.f32 %v2401_v28, %v2339_v18  ;;  %v1525_v18 = vmul.f32 %v4421_v36, %v4421_v36  ;;  %v4423_v19 = vld [vmem:[#allocation20_spill] sm:$0xff] }
 0x1c6   : > { %v1449_v37 = vadd.f32 %v1448_v58, %v4411_v59  ;;  %v1582_v12 = vadd.f32 %v1581_v22, %v1519_v29  ;;  %v2346_v29 = vmul.f32 %v4422_v2, %v4422_v2  ;;  %v4424_v59 = vld [vmem:[#allocation21_spill] sm:$0xff] }
 0x1c7   : > { %v2270_v13 = vadd.f32 %v2269_v56, %v4412_v46  ;;  %v2403_v16 = vadd.f32 %v2402_v32, %v2340_v3  ;;  %v1526_v3 = vmul.f32 %v4423_v19, %v4423_v19  ;;  %v4425_v46 = vld [vmem:[#allocation22_spill] sm:$0xff] }
 0x1c8   : > { %v1450_v0 = vadd.f32 %v1449_v37, %v4413_v47  ;;  %v1583_v20 = vadd.f32 %v1582_v12, %v1520_v57  ;;  %v2347_v57 = vmul.f32 %v4424_v59, %v4424_v59  ;;  %v4426_v47 = vld [vmem:[#allocation23_spill] sm:$0xff] }
 0x1c9   : > { %v2271_v54 = vadd.f32 %v2270_v13, %v4414_v50  ;;  %v2404_v51 = vadd.f32 %v2403_v16, %v2341_v55  ;;  %v1527_v13 = vmul.f32 %v4425_v46, %v4425_v46 }
 0x1ca   : > { %v1451_v4 = vadd.f32 %v1450_v0, %v4415_v48  ;;  %v1584_v9 = vadd.f32 %v1583_v20, %v1521_v30  ;;  %v2348_v0 = vmul.f32 %v4426_v47, %v4426_v47 }
 0x1cb   : > { %v2272_v5 = vadd.f32 %v2271_v54, %v4416_v6  ;;  %v2405_v10 = vadd.f32 %v2404_v51, %v2342_v15  ;;  %v4427_v15 = vld [vmem:[#allocation24_spill] sm:$0xff] }
 0x1cc   : > { %v1452_v24 = vadd.f32 %v1451_v4, %v4417_v40  ;;  %v1585_v11 = vadd.f32 %v1584_v9, %v1522_v61  ;;  %v1528_v51 = vmul.f32 %v4427_v15, %v4427_v15  ;;  %v4428_v61 = vld [vmem:[#allocation25_spill] sm:$0xff] }
 0x1cd   : > { %v2273_v21 = vadd.f32 %v2272_v5, %v4418_v41  ;;  %v2406_v14 = vadd.f32 %v2405_v10, %v2343_v17  ;;  %v2349_v9 = vmul.f32 %v4428_v61, %v4428_v61  ;;  %v1529_v5 = vmul.f32 %v4040_v35, %v4040_v35 }
 0x1ce   : > { %v1453_v44 = vadd.f32 %v1452_v24, %v4419_v26  ;;  %v1586_v38 = vadd.f32 %v1585_v11, %v1523_v63  ;;  %v2350_v63 = vmul.f32 %v4042_v23, %v4042_v23  ;;  %v1530_v41 = vmul.f32 %v4068_v49, %v4068_v49 }
 0x1cf   : > { %v2274_v42 = vadd.f32 %v2273_v21, %v4420_v39  ;;  %v2407_v45 = vadd.f32 %v2406_v14, %v2344_v25  ;;  %v2351_v14 = vmul.f32 %v4070_v8, %v4070_v8 }
 0x1d0   : > { %v1454_v43 = vadd.f32 %v1453_v44, %v4421_v36  ;;  %v1587_v28 = vadd.f32 %v1586_v38, %v1524_v1  ;;  %v1531_v1 = vmul.f32 %v4082_v34, %v4082_v34  ;;  %v2352_v38 = vmul.f32 %v4084_v7, %v4084_v7 }
 0x1d1   : > { %v2275_v58 = vadd.f32 %v2274_v42, %v4422_v2  ;;  %v2408_v22 = vadd.f32 %v2407_v45, %v2345_v27  ;;  %v1532_v27 = vmul.f32 %v4109_v33, %v4109_v33  ;;  %v2353_v45 = vmul.f32 %v4111_v62, %v4111_v62 }
 0x1d2   : > { %v1455_v56 = vadd.f32 %v1454_v43, %v4423_v19  ;;  %v1588_v32 = vadd.f32 %v1587_v28, %v1525_v18  ;;  %v1533_v18 = vmul.f32 %v4143_v52, %v4143_v52  ;;  %v2354_v28 = vmul.f32 %v4145_v53, %v4145_v53 }
 0x1d3   : > { %v2276_v37 = vadd.f32 %v2275_v58, %v4424_v59  ;;  %v2409_v12 = vadd.f32 %v2408_v22, %v2346_v29  ;;  %v2355_v22 = vmul.f32 %v4173_v60, %v4173_v60 }
 0x1d4   : > { %v1456_v55 = vadd.f32 %v1455_v56, %v4425_v46  ;;  %v1589_v16 = vadd.f32 %v1588_v32, %v1526_v3 }
 0x1d5   : > { %v2277_v30 = vadd.f32 %v2276_v37, %v4426_v47  ;;  %v2410_v20 = vadd.f32 %v2409_v12, %v2347_v57 }
 0x1d6   : > { %v1590_v50 = vadd.f32 %v1589_v16, %v1527_v13  ;;  %v1457_v54 = vadd.f32 %v1456_v55, %v4427_v15 }
 0x1d7   : > { %v2411_v48 = vadd.f32 %v2410_v20, %v2348_v0  ;;  %v2278_v4 = vadd.f32 %v2277_v30, %v4428_v61 }
 0x1d8   : > { %v1591_v6 = vadd.f32 %v1590_v50, %v1528_v51  ;;  %v1458_v17 = vadd.f32 %v1457_v54, %v4040_v35 }
 0x1d9   : > { %v2412_v10 = vadd.f32 %v2411_v48, %v2349_v9  ;;  %v2279_v40 = vadd.f32 %v2278_v4, %v4042_v23 }
 0x1da   : > { %v1592_v24 = vadd.f32 %v1591_v6, %v1529_v5  ;;  %v1459_v11 = vadd.f32 %v1458_v17, %v4068_v49 }
 0x1db   : > { %v2413_v25 = vadd.f32 %v2412_v10, %v2350_v63  ;;  %v2280_v21 = vadd.f32 %v2279_v40, %v4070_v8 }
 0x1dc   : > { %v1593_v26 = vadd.f32 %v1592_v24, %v1530_v41  ;;  %v1460_v35 = vadd.f32 %v1459_v11, %v4082_v34 }
 0x1dd   : > { %v2414_v44 = vadd.f32 %v2413_v25, %v2351_v14  ;;  %v2281_v23 = vadd.f32 %v2280_v21, %v4084_v7 }
 0x1de   : > { %v1594_v49 = vadd.f32 %v1593_v26, %v1531_v1  ;;  %v1461_v39 = vadd.f32 %v1460_v35, %v4109_v33 }
 0x1df   : > { %v2415_v8 = vadd.f32 %v2414_v44, %v2352_v38  ;;  %v2282_v42 = vadd.f32 %v2281_v23, %v4111_v62  ;;  %v1534_v62 = vmul.f32 %v4171_v31, %v4171_v31 }
 0x1e0   : > { %v1595_v34 = vadd.f32 %v1594_v49, %v1532_v27  ;;  %v1462_v36 = vadd.f32 %v1461_v39, %v4143_v52 }
 0x1e1   : > { %v2416_v7 = vadd.f32 %v2415_v8, %v2353_v45  ;;  %v2283_v43 = vadd.f32 %v2282_v42, %v4145_v53 }
 0x1e2   : > { %v1596_v33 = vadd.f32 %v1595_v34, %v1533_v18  ;;  %v1463_v2 = vadd.f32 %v1462_v36, %v4171_v31 }
 0x1e3   : > { %v2417_v29 = vadd.f32 %v2416_v7, %v2354_v28  ;;  %v2284_v58 = vadd.f32 %v2283_v43, %v4173_v60 }
 0x1e4   : > { %v1464_v52 = vrot.slane %v1463_v2, 4  ;;  %v1597_v19 = vadd.f32 %v1596_v33, %v1534_v62 }
 0x1e5   : > { %v2285_v3 = vrot.slane %v2284_v58, 4  ;;  %v2418_v56 = vadd.f32 %v2417_v29, %v2355_v22 }
 0x1e6   : > { %v1465_v32 = vadd.f32 %v1464_v52, %v1463_v2  ;;  %v1598_v53 = vrot.slane %v1597_v19, 4 }
 0x1e7   : > { %v2286_v59 = vadd.f32 %v2285_v3, %v2284_v58  ;;  %v2419_v57 = vrot.slane %v2418_v56, 4 }
 0x1e8   : > { %v1466_v37 = vrot.slane %v1465_v32, 2  ;;  %v1599_v12 = vadd.f32 %v1598_v53, %v1597_v19 }
 0x1e9   : > { %v2287_v46 = vrot.slane %v2286_v59, 2  ;;  %v2420_v55 = vadd.f32 %v2419_v57, %v2418_v56 }
 0x1ea   : > { %v1467_v31 = vadd.f32 %v1466_v37, %v1465_v32  ;;  %v1600_v13 = vrot.slane %v1599_v12, 2 }
 0x1eb   : > { %v2288_v16 = vadd.f32 %v2287_v46, %v2286_v59  ;;  %v2421_v47 = vrot.slane %v2420_v55, 2 }
 0x1ec   : > { %v1468_v30 = vrot.slane %v1467_v31, 1  ;;  %v1601_v60 = vadd.f32 %v1600_v13, %v1599_v12 }
 0x1ed   : > { %v2289_v0 = vrot.slane %v2288_v16, 1  ;;  %v2422_v20 = vadd.f32 %v2421_v47, %v2420_v55 }
 0x1ee   : > { %v1469_v50 = vadd.f32 %v1468_v30, %v1467_v31  ;;  %v1602_v15 = vrot.slane %v1601_v60, 1 }
 0x1ef   : > { %v2290_v54 = vadd.f32 %v2289_v0, %v2288_v16  ;;  %v2423_v51 = vrot.slane %v2422_v20, 1 }
 0x1f0   : > { %1470 = vst [vmem:[%s444_s28] sm:$0xff] %v1469_v50  ;;  %v1603_v48 = vadd.f32 %v1602_v15, %v1601_v60 }
 0x1f1   : > { %2291 = vst [vmem:[%s452_s15] sm:$0xff] %v2290_v54  ;;  %v2424_v61 = vadd.f32 %v2423_v51, %v2422_v20 }
 0x1f2   : > { %1604 = vst [vmem:[%s448_s29] sm:$0xff] %v1603_v48 }
 0x1f3   : > { %2425 = vst [vmem:[%s456_s19] sm:$0xff] %v2424_v61 }
 0x1f4 PF: > { %s20_s11 = sadd.s32 1, %s3543_s11   ;;  %s4429_s30 = smov %s3539_s10 }
 0x1f5   : > { %p17_p6 = scmp.ge.s32.totalorder %s20_s11, 4   ;;  %s4430_s10 = smov %s4432_s12 }
 0x1f7   :  { %19 = sbr.rel (!%p17_p6) target bundleno = 2 (0x2), region = 140 }

// kernel: basic_block_3d.6
= control target key start
LH: loop header
LB: loop body
LE: loop exit
PB: predicated region body
PF: predicated region fallthrough
CT: control target
= control target key end

     0   :  { %s2628_s15 = smov 0   ;;  %s2630_s16 = smov 0   ;;  %s3098_s0 = inlined_call_operand.vmem [shape: bf16[1024,256], index: 0, kind: input, shape index: {}]   ;;  %s3099_s1 = inlined_call_operand.vmem [shape: bf16[256,128], index: 1, kind: input, shape index: {}]   ;;  %s3100_s2 = inlined_call_operand.vmem [shape: bf16[1024,128], index: 2, kind: output, shape index: {0}]   ;;  %s3101_s3 = inlined_call_operand.vmem [shape: f32[16,128], index: 3, kind: output, shape index: {1}]   ;;  %s3102_s4 = inlined_call_operand.vmem [shape: f32[16,128], index: 4, kind: output, shape index: {2}]  }
   0x1   :  { %s2632_s17 = smov 0  }
   0x2 LB: > { %s27_s18 = sadd.s32 1, %s2597_s16  ;;  %p1937_p0 = scmp.ge.s32.totalorder %s2601_s17, 1  ;;  %s2601_s17 = sphi %s2632_s17, %s15_s17   ;;  %s2597_s16 = sphi %s2630_s16, %s3104_s16   ;;  %s2593_s15 = sphi %s2628_s15, %s3103_s15  }
   0x3   : > { %p29_p1 = scmp.ge.s32.totalorder %s27_s18, 2  ;;  %p199_p2 = scmp.lt.s32.totalorder %s2601_s17, 3 }
   0x5   : > { %s3106_s18 = smov (%p29_p1, %s27_s18), 0  ;;  %p200_p3 = pnand %p1937_p0, %p199_p2 }
   0x6   : > { %s1938_s5 = sshll.u32 (!%p200_p3), %s2593_s15, 6  ;;  %p267_p5 = scmp.lt.s32.totalorder (!%p200_p3), %s2593_s15, 1 }
   0x7   : > { %203 = sbr.rel (%p200_p3) target bundleno = 502 (0x1f6), region = 28  ;;  %p245_p4 = scmp.lt.s32.totalorder (!%p200_p3), %s1938_s5, 127 }
   0xc   : > { %v2339_v0 = vld [vmem:[%s3099_s1 + $0x38] sm:$0xff]  ;;  %v2338_v2 = vld [vmem:[%s3099_s1 + $0x30] sm:$0xff]  ;;  %v2337_v4 = vld [vmem:[%s3099_s1 + $0x28] sm:$0xff]  ;;  %s3108_s5 = smov (!%p245_p4, %s1938_s5), 127  ;;  %s3110_s15 = smov (!%p267_p5, %s2593_s15), 1 }
   0xd   : > { %v2347_v1 = vld [vmem:[%s3099_s1 + $0x78] sm:$0xff]  ;;  %919 = vmatpush.bf16.msra.mxu0 %v2339_v0  ;;  %v2346_v3 = vld [vmem:[%s3099_s1 + $0x70] sm:$0xff]  ;;  %2539 = vmatpush.bf16.msra.mxu2 %v2339_v0  ;;  %v2345_v5 = vld [vmem:[%s3099_s1 + $0x68] sm:$0xff]  ;;  %s2267_s22 = sshll.u32 %s3108_s5, 3  ;;  %s1942_s9 = sshll.u32 %s3108_s5, 2 }
   0xe   : > { %1088 = vmatpush.bf16.msra.mxu1 %v2347_v1  ;;  %2547 = vmatpush.bf16.msra.mxu3 %v2347_v1  ;;  %v2336_v6 = vld [vmem:[%s3099_s1 + $0x20] sm:$0xff]  ;;  %v2335_v8 = vld [vmem:[%s3099_s1 + $0x18] sm:$0xff]  ;;  %v2334_v10 = vld [vmem:[%s3099_s1 + $0x10] sm:$0xff]  ;;  %s2697_s29 = scalar_lea.vmem %s3098_s0, %s2267_s22  ;;  %s2777_s12 = scalar_lea.vmem %s3100_s2, %s1942_s9 }
   0xf   : > { %v2344_v7 = vld [vmem:[%s3099_s1 + $0x60] sm:$0xff]  ;;  %v2343_v9 = vld [vmem:[%s3099_s1 + $0x58] sm:$0xff]  ;;  %v2342_v11 = vld [vmem:[%s3099_s1 + $0x50] sm:$0xff]  ;;  %s1943_s5 = sshll.u32 %s3110_s15, 3 }
  0x10   : > { %v2333_v12 = vld [vmem:[%s3099_s1 + $0x8] sm:$0xff]  ;;  %v2332_v14 = vld [vmem:[%s3099_s1] sm:$0xff]  ;;  %v1955_v22 = vld [vmem:[%s2697_s29 + $0x10] sm:$0xf]  ;;  %s270_s19 = scalar_lea.vmem %s3101_s3, %s1943_s5  ;;  %s274_s22 = scalar_lea.vmem %s3102_s4, %s1943_s5 }
  0x11   : > { %920 = vmatpush.bf16.msra.mxu0 %v2338_v2  ;;  %2540 = vmatpush.bf16.msra.mxu2 %v2338_v2  ;;  %v2341_v13 = vld [vmem:[%s3099_s1 + $0x48] sm:$0xff]  ;;  %v2340_v15 = vld [vmem:[%s3099_s1 + $0x40] sm:$0xff]  ;;  %v2271_v23 = vld [vmem:[%s2697_s29 + $0x14] sm:$0xf0] }
  0x12   : > { %1089 = vmatpush.bf16.msra.mxu1 %v2346_v3  ;;  %2548 = vmatpush.bf16.msra.mxu3 %v2346_v3  ;;  %v1947_v16 = vld [vmem:[%s2697_s29] sm:$0xf]  ;;  %v2269_v17 = vld [vmem:[%s2697_s29 + $0x4] sm:$0xf0]  ;;  %v2268_v18 = vld [vmem:[%s2697_s29 + $0x4] sm:$0xf]  ;;  %v1956_v26 = vor.u32 %v2271_v23, %v1955_v22 }
  0x13   : > { %v1949_v19 = vld [vmem:[%s2697_s29 + $0x8] sm:$0xf0]  ;;  %v1948_v20 = vor.u32 %v2269_v17, %v1947_v16  ;;  %v2270_v24 = vld [vmem:[%s2697_s29 + $0x14] sm:$0xf]  ;;  %v1957_v25 = vld [vmem:[%s2697_s29 + $0x18] sm:$0xf0] }
  0x14   : > { %v1952_v21 = vor.u32 %v2268_v18, %v1949_v19  ;;  %v1960_v27 = vor.u32 %v2270_v24, %v1957_v25  ;;  %v2075_v28 = vld [vmem:[%s2697_s29 + $0x100] sm:$0xf]  ;;  %v2301_v29 = vld [vmem:[%s2697_s29 + $0x104] sm:$0xf0]  ;;  %v2300_v30 = vld [vmem:[%s2697_s29 + $0x104] sm:$0xf] }
  0x15   : > { %921 = vmatpush.bf16.msra.mxu0 %v2337_v4  ;;  %2541 = vmatpush.bf16.msra.mxu2 %v2337_v4  ;;  %v2076_v31 = vor.u32 %v2301_v29, %v2075_v28  ;;  %v2077_v32 = vld [vmem:[%s2697_s29 + $0x108] sm:$0xf0]  ;;  %v1963_v34 = vld [vmem:[%s2697_s29 + $0x20] sm:$0xf]  ;;  %v2273_v35 = vld [vmem:[%s2697_s29 + $0x24] sm:$0xf0] }
  0x16   : > { %1090 = vmatpush.bf16.msra.mxu1 %v2345_v5  ;;  %2549 = vmatpush.bf16.msra.mxu3 %v2345_v5  ;;  %v2080_v33 = vor.u32 %v2300_v30, %v2077_v32  ;;  %v2272_v36 = vld [vmem:[%s2697_s29 + $0x24] sm:$0xf]  ;;  %v1965_v37 = vld [vmem:[%s2697_s29 + $0x28] sm:$0xf0]  ;;  %v1964_v38 = vor.u32 %v2273_v35, %v1963_v34  ;;  %v2083_v40 = vld [vmem:[%s2697_s29 + $0x110] sm:$0xf] }
  0x17   : > { %v1968_v39 = vor.u32 %v2272_v36, %v1965_v37  ;;  %v2303_v41 = vld [vmem:[%s2697_s29 + $0x114] sm:$0xf0]  ;;  %v2302_v42 = vld [vmem:[%s2697_s29 + $0x114] sm:$0xf]  ;;  %v2085_v44 = vld [vmem:[%s2697_s29 + $0x118] sm:$0xf0] }
  0x18   : > { %v2084_v43 = vor.u32 %v2303_v41, %v2083_v40  ;;  %v2088_v45 = vor.u32 %v2302_v42, %v2085_v44  ;;  %v1971_v46 = vld [vmem:[%s2697_s29 + $0x30] sm:$0xf]  ;;  %v2275_v47 = vld [vmem:[%s2697_s29 + $0x34] sm:$0xf0]  ;;  %v2274_v48 = vld [vmem:[%s2697_s29 + $0x34] sm:$0xf] }
  0x19   : > { %922 = vmatpush.bf16.msra.mxu0 %v2336_v6  ;;  %2542 = vmatpush.bf16.msra.mxu2 %v2336_v6  ;;  %v1973_v49 = vld [vmem:[%s2697_s29 + $0x38] sm:$0xf0]  ;;  %v1972_v50 = vor.u32 %v2275_v47, %v1971_v46  ;;  %v2091_v52 = vld [vmem:[%s2697_s29 + $0x120] sm:$0xf]  ;;  %v2305_v53 = vld [vmem:[%s2697_s29 + $0x124] sm:$0xf0] }
  0x1a   : > { %1091 = vmatpush.bf16.msra.mxu1 %v2344_v7  ;;  %2550 = vmatpush.bf16.msra.mxu3 %v2344_v7  ;;  %v1976_v51 = vor.u32 %v2274_v48, %v1973_v49  ;;  %v2304_v54 = vld [vmem:[%s2697_s29 + $0x124] sm:$0xf]  ;;  %v2092_v55 = vor.u32 %v2305_v53, %v2091_v52  ;;  %v2093_v56 = vld [vmem:[%s2697_s29 + $0x128] sm:$0xf0]  ;;  %v1979_v58 = vld [vmem:[%s2697_s29 + $0x40] sm:$0xf] }
  0x1b   : > { %v2096_v57 = vor.u32 %v2304_v54, %v2093_v56  ;;  %v2277_v59 = vld [vmem:[%s2697_s29 + $0x44] sm:$0xf0]  ;;  %v2276_v60 = vld [vmem:[%s2697_s29 + $0x44] sm:$0xf]  ;;  %v1981_v61 = vld [vmem:[%s2697_s29 + $0x48] sm:$0xf0] }
  0x1c   : > { %v1980_v62 = vor.u32 %v2277_v59, %v1979_v58  ;;  %v1984_v63 = vor.u32 %v2276_v60, %v1981_v61  ;;  %v2099_v0 = vld [vmem:[%s2697_s29 + $0x130] sm:$0xf]  ;;  %v2307_v1 = vld [vmem:[%s2697_s29 + $0x134] sm:$0xf0]  ;;  %v2306_v2 = vld [vmem:[%s2697_s29 + $0x134] sm:$0xf] }
  0x1d   : > { %923 = vmatpush.bf16.msra.mxu0 %v2335_v8  ;;  %2543 = vmatpush.bf16.msra.mxu2 %v2335_v8  ;;  %v2100_v3 = vor.u32 %v2307_v1, %v2099_v0  ;;  %v2101_v4 = vld [vmem:[%s2697_s29 + $0x138] sm:$0xf0]  ;;  %v1987_v6 = vld [vmem:[%s2697_s29 + $0x50] sm:$0xf]  ;;  %v2279_v7 = vld [vmem:[%s2697_s29 + $0x54] sm:$0xf0] }
  0x1e   : > { %1092 = vmatpush.bf16.msra.mxu1 %v2343_v9  ;;  %2551 = vmatpush.bf16.msra.mxu3 %v2343_v9  ;;  %v2104_v5 = vor.u32 %v2306_v2, %v2101_v4  ;;  %v2278_v8 = vld [vmem:[%s2697_s29 + $0x54] sm:$0xf]  ;;  %v1989_v9 = vld [vmem:[%s2697_s29 + $0x58] sm:$0xf0]  ;;  %v2109_v16 = vld [vmem:[%s2697_s29 + $0x148] sm:$0xf0] }
  0x1f   : > { %v1995_v18 = vld [vmem:[%s2697_s29 + $0x60] sm:$0xf]  ;;  %v2281_v19 = vld [vmem:[%s2697_s29 + $0x64] sm:$0xf0]  ;;  %v2115_v24 = vld [vmem:[%s2697_s29 + $0x150] sm:$0xf] }
  0x20   : > { %v1996_v22 = vor.u32 %v2281_v19, %v1995_v18  ;;  %v2311_v25 = vld [vmem:[%s2697_s29 + $0x154] sm:$0xf0]  ;;  %v2117_v28 = vld [vmem:[%s2697_s29 + $0x158] sm:$0xf0]  ;;  %v2003_v30 = vld [vmem:[%s2697_s29 + $0x70] sm:$0xf] }
  0x21   : > { %924 = vmatpush.bf16.msra.mxu0 %v2334_v10  ;;  %2544 = vmatpush.bf16.msra.mxu2 %v2334_v10  ;;  %v1988_v10 = vor.u32 %v2279_v7, %v1987_v6  ;;  %v2282_v32 = vld [vmem:[%s2697_s29 + $0x74] sm:$0xf]  ;;  %v2123_v36 = vld [vmem:[%s2697_s29 + $0x160] sm:$0xf]  ;;  %v2313_v37 = vld [vmem:[%s2697_s29 + $0x164] sm:$0xf0] }
  0x22   : > { %1093 = vmatpush.bf16.msra.mxu1 %v2342_v11  ;;  %2552 = vmatpush.bf16.msra.mxu3 %v2342_v11  ;;  %v1992_v11 = vor.u32 %v2278_v8, %v1989_v9  ;;  %v2125_v40 = vld [vmem:[%s2697_s29 + $0x168] sm:$0xf0]  ;;  %v2011_v42 = vld [vmem:[%s2697_s29 + $0x80] sm:$0xf]  ;;  %v2284_v44 = vld [vmem:[%s2697_s29 + $0x84] sm:$0xf] }
  0x23   : > { %v2314_v52 = vld [vmem:[%s2697_s29 + $0x174] sm:$0xf]  ;;  %v2133_v54 = vld [vmem:[%s2697_s29 + $0x178] sm:$0xf0]  ;;  %v2019_v0 = vld [vmem:[%s2697_s29 + $0x90] sm:$0xf] }
  0x24   : > { %v2287_v1 = vld [vmem:[%s2697_s29 + $0x94] sm:$0xf0]  ;;  %v2286_v2 = vld [vmem:[%s2697_s29 + $0x94] sm:$0xf] }
  0x25   : > { %925 = vmatpush.bf16.msra.mxu0 %v2333_v12  ;;  %2545 = vmatpush.bf16.msra.mxu2 %v2333_v12  ;;  %v2107_v12 = vld [vmem:[%s2697_s29 + $0x140] sm:$0xf] }
  0x26   : > { %1094 = vmatpush.bf16.msra.mxu1 %v2341_v13  ;;  %2553 = vmatpush.bf16.msra.mxu3 %v2341_v13  ;;  %v2309_v13 = vld [vmem:[%s2697_s29 + $0x144] sm:$0xf0] }
  0x29   : > { %926 = vmatpush.bf16.msra.mxu0 %v2332_v14  ;;  %2546 = vmatpush.bf16.msra.mxu2 %v2332_v14  ;;  %v2308_v14 = vld [vmem:[%s2697_s29 + $0x144] sm:$0xf] }
  0x2a   : > { %1095 = vmatpush.bf16.msra.mxu1 %v2340_v15  ;;  %2554 = vmatpush.bf16.msra.mxu3 %v2340_v15  ;;  %v2108_v15 = vor.u32 %v2309_v13, %v2107_v12  ;;  %v2112_v17 = vor.u32 %v2308_v14, %v2109_v16  ;;  %v2316_v12 = vld [vmem:[%s2697_s29 + $0x184] sm:$0xf]  ;;  %v2141_v16 = vld [vmem:[%s2697_s29 + $0x188] sm:$0xf0] }
  0x2c   : > { %927 = vmatmul.bf16.vlgmr.msra.gmra.mxu0 %v1948_v20  ;;  %1007 = vmatmul.bf16.vlgmr.msra.gmra.mxu2 %v2076_v31  ;;  %v2280_v20 = vld [vmem:[%s2697_s29 + $0x64] sm:$0xf]  ;;  %v2283_v31 = vld [vmem:[%s2697_s29 + $0x74] sm:$0xf0] }
  0x2d   : > { %1096 = vmatmul.bf16.vlgmr.msra.gmra.mxu1 %v1952_v21  ;;  %1176 = vmatmul.bf16.vlgmr.msra.gmra.mxu3 %v2080_v33  ;;  %v1997_v21 = vld [vmem:[%s2697_s29 + $0x68] sm:$0xf0]  ;;  %v2005_v33 = vld [vmem:[%s2697_s29 + $0x78] sm:$0xf0]  ;;  %v2004_v34 = vor.u32 %v2283_v31, %v2003_v30 }
  0x2e   : > { %v2000_v23 = vor.u32 %v2280_v20, %v1997_v21  ;;  %v2008_v35 = vor.u32 %v2282_v32, %v2005_v33  ;;  %v2029_v30 = vld [vmem:[%s2697_s29 + $0xa8] sm:$0xf0] }
  0x3c   : > { %932 = vmatmul.bf16.gmra.mxu0 %v1956_v26  ;;  %1012 = vmatmul.bf16.gmra.mxu2 %v2084_v43  ;;  %v2310_v26 = vld [vmem:[%s2697_s29 + $0x154] sm:$0xf]  ;;  %v2285_v43 = vld [vmem:[%s2697_s29 + $0x84] sm:$0xf0] }
  0x3d   : > { %1101 = vmatmul.bf16.gmra.mxu1 %v1960_v27  ;;  %1181 = vmatmul.bf16.gmra.mxu3 %v2088_v45  ;;  %v2116_v27 = vor.u32 %v2311_v25, %v2115_v24  ;;  %v2120_v29 = vor.u32 %v2310_v26, %v2117_v28  ;;  %v2013_v45 = vld [vmem:[%s2697_s29 + $0x88] sm:$0xf0]  ;;  %v2012_v46 = vor.u32 %v2285_v43, %v2011_v42  ;;  %v2289_v28 = vld [vmem:[%s2697_s29 + $0xa4] sm:$0xf0]  ;;  %v2319_v42 = vld [vmem:[%s2697_s29 + $0x194] sm:$0xf0] }
  0x3e   : > { %v2016_v47 = vor.u32 %v2284_v44, %v2013_v45  ;;  %v2318_v43 = vld [vmem:[%s2697_s29 + $0x194] sm:$0xf] }
  0x4c   : > { %937 = vmatmul.bf16.gmra.mxu0 %v1964_v38  ;;  %1017 = vmatmul.bf16.gmra.mxu2 %v2092_v55  ;;  %v2312_v38 = vld [vmem:[%s2697_s29 + $0x164] sm:$0xf]  ;;  %v2136_v55 = vor.u32 %v2314_v52, %v2133_v54 }
  0x4d   : > { %1106 = vmatmul.bf16.gmra.mxu1 %v1968_v39  ;;  %1186 = vmatmul.bf16.gmra.mxu3 %v2096_v57  ;;  %v2124_v39 = vor.u32 %v2313_v37, %v2123_v36  ;;  %v2128_v41 = vor.u32 %v2312_v38, %v2125_v40 }
  0x5c   : > { %942 = vmatmul.bf16.gmra.mxu0 %v1972_v50  ;;  %1022 = vmatmul.bf16.gmra.mxu2 %v2100_v3  ;;  %v2131_v50 = vld [vmem:[%s2697_s29 + $0x170] sm:$0xf]  ;;  %v2021_v3 = vld [vmem:[%s2697_s29 + $0x98] sm:$0xf0] }
  0x5d   : > { %1111 = vmatmul.bf16.gmra.mxu1 %v1976_v51  ;;  %1191 = vmatmul.bf16.gmra.mxu3 %v2104_v5  ;;  %v2315_v51 = vld [vmem:[%s2697_s29 + $0x174] sm:$0xf0]  ;;  %v2020_v5 = vor.u32 %v2287_v1, %v2019_v0  ;;  %v2024_v6 = vor.u32 %v2286_v2, %v2021_v3 }
  0x5e   : > { %v2132_v53 = vor.u32 %v2315_v51, %v2131_v50 }
  0x6c   : > { %947 = vmatmul.bf16.gmra.mxu0 %v1980_v62  ;;  %1027 = vmatmul.bf16.gmra.mxu2 %v2108_v15 }
  0x6d   : > { %1116 = vmatmul.bf16.gmra.mxu1 %v1984_v63  ;;  %1196 = vmatmul.bf16.gmra.mxu3 %v2112_v17  ;;  %v2144_v17 = vor.u32 %v2316_v12, %v2141_v16 }
  0x7c   : > { %952 = vmatmul.bf16.gmra.mxu0 %v1988_v10  ;;  %1032 = vmatmul.bf16.gmra.mxu2 %v2116_v27  ;;  %v2139_v10 = vld [vmem:[%s2697_s29 + $0x180] sm:$0xf] }
  0x7d   : > { %1121 = vmatmul.bf16.gmra.mxu1 %v1992_v11  ;;  %1201 = vmatmul.bf16.gmra.mxu3 %v2120_v29  ;;  %v2317_v11 = vld [vmem:[%s2697_s29 + $0x184] sm:$0xf0]  ;;  %v2027_v27 = vld [vmem:[%s2697_s29 + $0xa0] sm:$0xf]  ;;  %v2288_v29 = vld [vmem:[%s2697_s29 + $0xa4] sm:$0xf] }
  0x7e   : > { %v2140_v15 = vor.u32 %v2317_v11, %v2139_v10  ;;  %v2028_v32 = vor.u32 %v2289_v28, %v2027_v27  ;;  %v2032_v33 = vor.u32 %v2288_v29, %v2029_v30  ;;  %v2321_v10 = vld [vmem:[%s2697_s29 + $0x1a4] sm:$0xf0]  ;;  %v2320_v11 = vld [vmem:[%s2697_s29 + $0x1a4] sm:$0xf]  ;;  %v2043_v27 = vld [vmem:[%s2697_s29 + $0xc0] sm:$0xf] }
  0x7f   : > { %v2293_v28 = vld [vmem:[%s2697_s29 + $0xc4] sm:$0xf0]  ;;  %v2292_v29 = vld [vmem:[%s2697_s29 + $0xc4] sm:$0xf]  ;;  %v2045_v30 = vld [vmem:[%s2697_s29 + $0xc8] sm:$0xf0] }
  0x8c   : > { %957 = vmatmul.bf16.gmra.mxu0 %v1996_v22  ;;  %1037 = vmatmul.bf16.gmra.mxu2 %v2124_v39 }
  0x8d   : > { %1126 = vmatmul.bf16.gmra.mxu1 %v2000_v23  ;;  %1206 = vmatmul.bf16.gmra.mxu3 %v2128_v41  ;;  %v2147_v41 = vld [vmem:[%s2697_s29 + $0x190] sm:$0xf] }
  0x9c   : > { %962 = vmatmul.bf16.gmra.mxu0 %v2004_v34  ;;  %1042 = vmatmul.bf16.gmra.mxu2 %v2132_v53 }
  0x9d   : > { %1131 = vmatmul.bf16.gmra.mxu1 %v2008_v35  ;;  %1211 = vmatmul.bf16.gmra.mxu3 %v2136_v55 }
  0xa9   : > { %v928_v48 = vpop.f32.mrf.mxu0 }
  0xaa   : > { %v1097_v49 = vpop.f32.mrf.mxu1 }
  0xab   : > { %v1098_v56 = vadd.f32 %v1097_v49, %v928_v48 }
  0xac   : > { %967 = vmatmul.bf16.gmra.mxu0 %v2012_v46  ;;  %1047 = vmatmul.bf16.gmra.mxu2 %v2140_v15  ;;  %v2148_v46 = vor.u32 %v2319_v42, %v2147_v41  ;;  %v2157_v15 = vld [vmem:[%s2697_s29 + $0x1a8] sm:$0xf0] }
  0xad   : > { %1136 = vmatmul.bf16.gmra.mxu1 %v2016_v47  ;;  %v1650_v60 = vmul.f32 %v1098_v56, %v1098_v56  ;;  %1216 = vmatmul.bf16.gmra.mxu3 %v2144_v17  ;;  %v2149_v47 = vld [vmem:[%s2697_s29 + $0x198] sm:$0xf0]  ;;  %v2160_v17 = vor.u32 %v2320_v11, %v2157_v15  ;;  %v2324_v15 = vld [vmem:[%s2697_s29 + $0x1c4] sm:$0xf] }
  0xae   : > { %v2152_v49 = vor.u32 %v2318_v43, %v2149_v47  ;;  %v2163_v43 = vld [vmem:[%s2697_s29 + $0x1b0] sm:$0xf] }
  0xaf   : > { %v1008_v22 = vpop.f32.mrf.mxu2 }
  0xb0   : > { %v1177_v23 = vpop.f32.mrf.mxu3 }
  0xb1   : > { %v930_v57 = vpop.f32.mrf.mxu0  ;;  %v2793_v36 = vadd.f32 %v1177_v23, %v1008_v22 }
  0xb2   : > { %v1099_v58 = vpop.f32.mrf.mxu1 }
  0xb3   : > { %v1100_v59 = vadd.f32 %v1099_v58, %v930_v57 }
  0xb5   : > { %v2351_v61 = vpack.c.bf16 %v1100_v59, %v1098_v56  ;;  %v1580_v62 = vadd.f32 %v1100_v59, %v1098_v56  ;;  %v1651_v63 = vmul.f32 %v1100_v59, %v1100_v59  ;;  %v2035_v59 = vld [vmem:[%s2697_s29 + $0xb0] sm:$0xf] }
  0xb7   : > { %2352 = vst [vmem:[%s2777_s12] sm:$0xff] %v2351_v61   ;;  %v1714_v4 = vadd.f32 %v1651_v63, %v1650_v60  ;;  %v1010_v38 = vpop.f32.mrf.mxu2  ;;  %v2291_v60 = vld [vmem:[%s2697_s29 + $0xb4] sm:$0xf0]  ;;  %v2290_v61 = vld [vmem:[%s2697_s29 + $0xb4] sm:$0xf] }
  0xb8   : > { %v1179_v39 = vpop.f32.mrf.mxu3  ;;  %v2036_v0 = vor.u32 %v2291_v60, %v2035_v59 }
  0xb9   : > { %v933_v7 = vpop.f32.mrf.mxu0  ;;  %v2795_v40 = vadd.f32 %v1179_v39, %v1010_v38 }
  0xba   : > { %v1102_v8 = vpop.f32.mrf.mxu1 }
  0xbb   : > { %v1103_v9 = vadd.f32 %v1102_v8, %v933_v7  ;;  %v2431_v48 = vpack.c.bf16 %v2795_v40, %v2793_v36 }
  0xbc   : > { %972 = vmatmul.bf16.gmra.mxu0 %v2020_v5  ;;  %1052 = vmatmul.bf16.gmra.mxu2 %v2148_v46 }
  0xbd   : > { %v1581_v13 = vadd.f32 %v1580_v62, %v1103_v9  ;;  %v1652_v14 = vmul.f32 %v1103_v9, %v1103_v9  ;;  %1141 = vmatmul.bf16.gmra.mxu1 %v2024_v6  ;;  %2523 = vst [vmem:[%s2777_s12 + $0x80] sm:$0xff] %v2431_v48   ;;  %1221 = vmatmul.bf16.gmra.mxu3 %v2152_v49  ;;  %v2037_v62 = vld [vmem:[%s2697_s29 + $0xb8] sm:$0xf0] }
  0xbe   : > { %v2040_v1 = vor.u32 %v2290_v61, %v2037_v62  ;;  %v2165_v49 = vld [vmem:[%s2697_s29 + $0x1b8] sm:$0xf0]  ;;  %v2051_v61 = vld [vmem:[%s2697_s29 + $0xd0] sm:$0xf]  ;;  %v2295_v62 = vld [vmem:[%s2697_s29 + $0xd4] sm:$0xf0] }
  0xbf   : > { %v1715_v18 = vadd.f32 %v1714_v4, %v1652_v14  ;;  %v1013_v54 = vpop.f32.mrf.mxu2 }
  0xc0   : > { %v1182_v55 = vpop.f32.mrf.mxu3 }
  0xc1   : > { %v935_v19 = vpop.f32.mrf.mxu0  ;;  %v2809_v4 = vadd.f32 %v1182_v55, %v1013_v54 }
  0xc2   : > { %v1104_v20 = vpop.f32.mrf.mxu1 }
  0xc3   : > { %v1105_v21 = vadd.f32 %v1104_v20, %v935_v19 }
  0xc5   : > { %v2356_v24 = vpack.c.bf16 %v1105_v21, %v1103_v9  ;;  %v1582_v25 = vadd.f32 %v1581_v13, %v1105_v21  ;;  %v1653_v26 = vmul.f32 %v1105_v21, %v1105_v21  ;;  %v2155_v9 = vld [vmem:[%s2697_s29 + $0x1a0] sm:$0xf] }
  0xc6   : > { %v2156_v14 = vor.u32 %v2321_v10, %v2155_v9 }
  0xc7   : > { %2508 = vst [vmem:[%s2777_s12 + $0x8] sm:$0xff] %v2356_v24   ;;  %v1716_v31 = vadd.f32 %v1715_v18, %v1653_v26  ;;  %v1015_v6 = vpop.f32.mrf.mxu2 }
  0xc8   : > { %v1184_v7 = vpop.f32.mrf.mxu3 }
  0xc9   : > { %v938_v34 = vpop.f32.mrf.mxu0  ;;  %v2811_v8 = vadd.f32 %v1184_v7, %v1015_v6 }
  0xca   : > { %v1107_v35 = vpop.f32.mrf.mxu1 }
  0xcb   : > { %v1108_v37 = vadd.f32 %v1107_v35, %v938_v34  ;;  %v2436_v16 = vpack.c.bf16 %v2811_v8, %v2809_v4 }
  0xcc   : > { %977 = vmatmul.bf16.gmra.mxu0 %v2028_v32  ;;  %1057 = vmatmul.bf16.gmra.mxu2 %v2156_v14  ;;  %v2044_v32 = vor.u32 %v2293_v28, %v2043_v27  ;;  %v2325_v14 = vld [vmem:[%s2697_s29 + $0x1c4] sm:$0xf0] }
  0xcd   : > { %v1583_v44 = vadd.f32 %v1582_v25, %v1108_v37  ;;  %v1654_v45 = vmul.f32 %v1108_v37, %v1108_v37  ;;  %1146 = vmatmul.bf16.gmra.mxu1 %v2032_v33  ;;  %2524 = vst [vmem:[%s2777_s12 + $0x88] sm:$0xff] %v2436_v16   ;;  %1226 = vmatmul.bf16.gmra.mxu3 %v2160_v17 }
  0xce   : > { %v2048_v33 = vor.u32 %v2292_v29, %v2045_v30 }
  0xcf   : > { %v1717_v50 = vadd.f32 %v1716_v31, %v1654_v45  ;;  %v1018_v22 = vpop.f32.mrf.mxu2  ;;  %v2322_v45 = vld [vmem:[%s2697_s29 + $0x1b4] sm:$0xf] }
  0xd0   : > { %v1187_v23 = vpop.f32.mrf.mxu3 }
  0xd1   : > { %v940_v51 = vpop.f32.mrf.mxu0 }
  0xd2   : > { %v1109_v52 = vpop.f32.mrf.mxu1 }
  0xd3   : > { %v1110_v53 = vadd.f32 %v1109_v52, %v940_v51  ;;  %v2168_v51 = vor.u32 %v2322_v45, %v2165_v49  ;;  %v2179_v49 = vld [vmem:[%s2697_s29 + $0x1d0] sm:$0xf] }
  0xd5   : > { %v2361_v56 = vpack.c.bf16 %v1110_v53, %v1108_v37  ;;  %v1584_v57 = vadd.f32 %v1583_v44, %v1110_v53  ;;  %v1655_v58 = vmul.f32 %v1110_v53, %v1110_v53  ;;  %v2825_v37 = vadd.f32 %v1187_v23, %v1018_v22  ;;  %v2323_v44 = vld [vmem:[%s2697_s29 + $0x1b4] sm:$0xf0] }
  0xd6   : > { %v2164_v48 = vor.u32 %v2323_v44, %v2163_v43 }
  0xd7   : > { %2509 = vst [vmem:[%s2777_s12 + $0x10] sm:$0xff] %v2361_v56   ;;  %v1718_v63 = vadd.f32 %v1717_v50, %v1655_v58  ;;  %v1020_v39 = vpop.f32.mrf.mxu2 }
  0xd8   : > { %v1189_v41 = vpop.f32.mrf.mxu3 }
  0xd9   : > { %v943_v2 = vpop.f32.mrf.mxu0  ;;  %v2827_v42 = vadd.f32 %v1189_v41, %v1020_v39 }
  0xda   : > { %v1112_v3 = vpop.f32.mrf.mxu1 }
  0xdb   : > { %v1113_v5 = vadd.f32 %v1112_v3, %v943_v2  ;;  %v2441_v50 = vpack.c.bf16 %v2827_v42, %v2825_v37  ;;  %v2052_v2 = vor.u32 %v2295_v62, %v2051_v61 }
  0xdc   : > { %982 = vmatmul.bf16.gmra.mxu0 %v2036_v0  ;;  %1062 = vmatmul.bf16.gmra.mxu2 %v2164_v48  ;;  %v2053_v0 = vld [vmem:[%s2697_s29 + $0xd8] sm:$0xf0] }
  0xdd   : > { %v1585_v12 = vadd.f32 %v1584_v57, %v1113_v5  ;;  %v1656_v13 = vmul.f32 %v1113_v5, %v1113_v5  ;;  %1151 = vmatmul.bf16.gmra.mxu1 %v2040_v1  ;;  %2525 = vst [vmem:[%s2777_s12 + $0x90] sm:$0xff] %v2441_v50   ;;  %1231 = vmatmul.bf16.gmra.mxu3 %v2168_v51  ;;  %v2327_v50 = vld [vmem:[%s2697_s29 + $0x1d4] sm:$0xf0]  ;;  %v2326_v51 = vld [vmem:[%s2697_s29 + $0x1d4] sm:$0xf] }
  0xdf   : > { %v1719_v18 = vadd.f32 %v1718_v63, %v1656_v13  ;;  %v1023_v56 = vpop.f32.mrf.mxu2  ;;  %v2294_v63 = vld [vmem:[%s2697_s29 + $0xd4] sm:$0xf]  ;;  %v2171_v13 = vld [vmem:[%s2697_s29 + $0x1c0] sm:$0xf] }
  0xe0   : > { %v1192_v57 = vpop.f32.mrf.mxu3  ;;  %v2056_v3 = vor.u32 %v2294_v63, %v2053_v0 }
  0xe1   : > { %v945_v19 = vpop.f32.mrf.mxu0  ;;  %v2841_v7 = vadd.f32 %v1192_v57, %v1023_v56 }
  0xe2   : > { %v1114_v20 = vpop.f32.mrf.mxu1 }
  0xe3   : > { %v1115_v21 = vadd.f32 %v1114_v20, %v945_v19  ;;  %v2173_v19 = vld [vmem:[%s2697_s29 + $0x1c8] sm:$0xf0] }
  0xe5   : > { %v2366_v24 = vpack.c.bf16 %v1115_v21, %v1113_v5  ;;  %v1586_v25 = vadd.f32 %v1585_v12, %v1115_v21  ;;  %v1657_v26 = vmul.f32 %v1115_v21, %v1115_v21  ;;  %v2176_v21 = vor.u32 %v2324_v15, %v2173_v19 }
  0xe7   : > { %2510 = vst [vmem:[%s2777_s12 + $0x18] sm:$0xff] %v2366_v24   ;;  %v1720_v31 = vadd.f32 %v1719_v18, %v1657_v26  ;;  %v1025_v10 = vpop.f32.mrf.mxu2  ;;  %v2172_v18 = vor.u32 %v2325_v14, %v2171_v13 }
  0xe8   : > { %v1194_v11 = vpop.f32.mrf.mxu3 }
  0xe9   : > { %v948_v34 = vpop.f32.mrf.mxu0  ;;  %v2843_v12 = vadd.f32 %v1194_v11, %v1025_v10 }
  0xea   : > { %v1117_v35 = vpop.f32.mrf.mxu1 }
  0xeb   : > { %v1118_v38 = vadd.f32 %v1117_v35, %v948_v34  ;;  %v2446_v20 = vpack.c.bf16 %v2843_v12, %v2841_v7  ;;  %v2061_v34 = vld [vmem:[%s2697_s29 + $0xe8] sm:$0xf0] }
  0xec   : > { %987 = vmatmul.bf16.gmra.mxu0 %v2044_v32  ;;  %1067 = vmatmul.bf16.gmra.mxu2 %v2172_v18  ;;  %v2297_v32 = vld [vmem:[%s2697_s29 + $0xe4] sm:$0xf0] }
  0xed   : > { %v1587_v46 = vadd.f32 %v1586_v25, %v1118_v38  ;;  %v1658_v47 = vmul.f32 %v1118_v38, %v1118_v38  ;;  %1156 = vmatmul.bf16.gmra.mxu1 %v2048_v33  ;;  %2526 = vst [vmem:[%s2777_s12 + $0x98] sm:$0xff] %v2446_v20   ;;  %1236 = vmatmul.bf16.gmra.mxu3 %v2176_v21  ;;  %v2296_v33 = vld [vmem:[%s2697_s29 + $0xe4] sm:$0xf]  ;;  %v2187_v21 = vld [vmem:[%s2697_s29 + $0x1e0] sm:$0xf] }
  0xee   : > { %v2064_v39 = vor.u32 %v2296_v33, %v2061_v34 }
  0xef   : > { %v1721_v52 = vadd.f32 %v1720_v31, %v1658_v47  ;;  %v1028_v26 = vpop.f32.mrf.mxu2  ;;  %v2059_v31 = vld [vmem:[%s2697_s29 + $0xe0] sm:$0xf] }
  0xf0   : > { %v1197_v27 = vpop.f32.mrf.mxu3 }
  0xf1   : > { %v950_v53 = vpop.f32.mrf.mxu0  ;;  %v2857_v44 = vadd.f32 %v1197_v27, %v1028_v26  ;;  %v2189_v27 = vld [vmem:[%s2697_s29 + $0x1e8] sm:$0xf0] }
  0xf2   : > { %v1119_v54 = vpop.f32.mrf.mxu1 }
  0xf3   : > { %v1120_v55 = vadd.f32 %v1119_v54, %v950_v53  ;;  %v2180_v54 = vor.u32 %v2327_v50, %v2179_v49 }
  0xf5   : > { %v2371_v58 = vpack.c.bf16 %v1120_v55, %v1118_v38  ;;  %v1588_v59 = vadd.f32 %v1587_v46, %v1120_v55  ;;  %v1659_v60 = vmul.f32 %v1120_v55, %v1120_v55  ;;  %v2060_v38 = vor.u32 %v2297_v32, %v2059_v31  ;;  %v2181_v55 = vld [vmem:[%s2697_s29 + $0x1d8] sm:$0xf0] }
  0xf6   : > { %v2184_v57 = vor.u32 %v2326_v51, %v2181_v55  ;;  %v2330_v55 = vld [vmem:[%s2697_s29 + $0x1f4] sm:$0xf] }
  0xf7   : > { %2511 = vst [vmem:[%s2777_s12 + $0x20] sm:$0xff] %v2371_v58   ;;  %v1722_v1 = vadd.f32 %v1721_v52, %v1659_v60  ;;  %v1030_v46 = vpop.f32.mrf.mxu2 }
  0xf8   : > { %v1199_v47 = vpop.f32.mrf.mxu3 }
  0xf9   : > { %v953_v5 = vpop.f32.mrf.mxu0  ;;  %v2859_v48 = vadd.f32 %v1199_v47, %v1030_v46 }
  0xfa   : > { %v1122_v6 = vpop.f32.mrf.mxu1 }
  0xfb   : > { %v1123_v9 = vadd.f32 %v1122_v6, %v953_v5  ;;  %v2451_v56 = vpack.c.bf16 %v2859_v48, %v2857_v44  ;;  %v2299_v5 = vld [vmem:[%s2697_s29 + $0xf4] sm:$0xf0]  ;;  %v2298_v6 = vld [vmem:[%s2697_s29 + $0xf4] sm:$0xf] }
  0xfc   : > { %992 = vmatmul.bf16.gmra.mxu0 %v2052_v2  ;;  %1072 = vmatmul.bf16.gmra.mxu2 %v2180_v54  ;;  %v2331_v54 = vld [vmem:[%s2697_s29 + $0x1f4] sm:$0xf0] }
  0xfd   : > { %v1589_v16 = vadd.f32 %v1588_v59, %v1123_v9  ;;  %v1660_v17 = vmul.f32 %v1123_v9, %v1123_v9  ;;  %1161 = vmatmul.bf16.gmra.mxu1 %v2056_v3  ;;  %2527 = vst [vmem:[%s2777_s12 + $0xa0] sm:$0xff] %v2451_v56   ;;  %1241 = vmatmul.bf16.gmra.mxu3 %v2184_v57  ;;  %v2067_v3 = vld [vmem:[%s2697_s29 + $0xf0] sm:$0xf] }
  0xfe   : > { %v2068_v11 = vor.u32 %v2299_v5, %v2067_v3 }
  0xff   : > { %v1723_v22 = vadd.f32 %v1722_v1, %v1660_v17  ;;  %v1033_v62 = vpop.f32.mrf.mxu2 }
 0x100   : > { %v1202_v63 = vpop.f32.mrf.mxu3 }
 0x101   : > { %v955_v23 = vpop.f32.mrf.mxu0 }
 0x102   : > { %v1124_v24 = vpop.f32.mrf.mxu1 }
 0x103   : > { %v1125_v25 = vadd.f32 %v1124_v24, %v955_v23  ;;  %v2328_v23 = vld [vmem:[%s2697_s29 + $0x1e4] sm:$0xf] }
 0x105   : > { %v2376_v28 = vpack.c.bf16 %v1125_v25, %v1123_v9  ;;  %v1590_v29 = vadd.f32 %v1589_v16, %v1125_v25  ;;  %v1661_v30 = vmul.f32 %v1125_v25, %v1125_v25  ;;  %v2069_v9 = vld [vmem:[%s2697_s29 + $0xf8] sm:$0xf0]  ;;  %v2873_v16 = vadd.f32 %v1202_v63, %v1033_v62 }
 0x106   : > { %v2072_v13 = vor.u32 %v2298_v6, %v2069_v9 }
 0x107   : > { %2512 = vst [vmem:[%s2777_s12 + $0x28] sm:$0xff] %v2376_v28   ;;  %v1724_v35 = vadd.f32 %v1723_v22, %v1661_v30  ;;  %v1035_v18 = vpop.f32.mrf.mxu2  ;;  %v2329_v22 = vld [vmem:[%s2697_s29 + $0x1e4] sm:$0xf0] }
 0x108   : > { %v1204_v19 = vpop.f32.mrf.mxu3  ;;  %v2188_v26 = vor.u32 %v2329_v22, %v2187_v21 }
 0x109   : > { %v958_v41 = vpop.f32.mrf.mxu0  ;;  %v2875_v20 = vadd.f32 %v1204_v19, %v1035_v18 }
 0x10a   : > { %v1127_v43 = vpop.f32.mrf.mxu1 }
 0x10b   : > { %v1128_v45 = vadd.f32 %v1127_v43, %v958_v41  ;;  %v2456_v28 = vpack.c.bf16 %v2875_v20, %v2873_v16 }
 0x10c   : > { %997 = vmatmul.bf16.gmra.mxu0 %v2060_v38  ;;  %1077 = vmatmul.bf16.gmra.mxu2 %v2188_v26 }
 0x10d   : > { %v1591_v52 = vadd.f32 %v1590_v29, %v1128_v45  ;;  %v1662_v53 = vmul.f32 %v1128_v45, %v1128_v45  ;;  %1166 = vmatmul.bf16.gmra.mxu1 %v2064_v39  ;;  %v2192_v29 = vor.u32 %v2328_v23, %v2189_v27  ;;  %2528 = vst [vmem:[%s2777_s12 + $0xa8] sm:$0xff] %v2456_v28  }
 0x10f   : > { %v1725_v58 = vadd.f32 %v1724_v35, %v1662_v53  ;;  %1246 = vmatmul.bf16.gmra.mxu3 %v2192_v29  ;;  %v1038_v34 = vpop.f32.mrf.mxu2  ;;  %v2195_v53 = vld [vmem:[%s2697_s29 + $0x1f0] sm:$0xf] }
 0x110   : > { %v1207_v35 = vpop.f32.mrf.mxu3 }
 0x111   : > { %v960_v59 = vpop.f32.mrf.mxu0  ;;  %v2885_v47 = vadd.f32 %v1207_v35, %v1038_v34 }
 0x112   : > { %v1129_v60 = vpop.f32.mrf.mxu1 }
 0x113   : > { %v1130_v61 = vadd.f32 %v1129_v60, %v960_v59  ;;  %v2197_v59 = vld [vmem:[%s2697_s29 + $0x1f8] sm:$0xf0] }
 0x115   : > { %v2381_v0 = vpack.c.bf16 %v1130_v61, %v1128_v45  ;;  %v1592_v1 = vadd.f32 %v1591_v52, %v1130_v61  ;;  %v1663_v2 = vmul.f32 %v1130_v61, %v1130_v61  ;;  %v2200_v61 = vor.u32 %v2330_v55, %v2197_v59 }
 0x117   : > { %2513 = vst [vmem:[%s2777_s12 + $0x30] sm:$0xff] %v2381_v0   ;;  %v1726_v10 = vadd.f32 %v1725_v58, %v1663_v2  ;;  %v1040_v50 = vpop.f32.mrf.mxu2  ;;  %v2196_v58 = vor.u32 %v2331_v54, %v2195_v53 }
 0x118   : > { %v1209_v51 = vpop.f32.mrf.mxu3 }
 0x119   : > { %v963_v14 = vpop.f32.mrf.mxu0  ;;  %v2887_v52 = vadd.f32 %v1209_v51, %v1040_v50 }
 0x11a   : > { %v1132_v15 = vpop.f32.mrf.mxu1 }
 0x11b   : > { %v1133_v17 = vadd.f32 %v1132_v15, %v963_v14  ;;  %v2461_v60 = vpack.c.bf16 %v2887_v52, %v2885_v47 }
 0x11c   : > { %1002 = vmatmul.bf16.gmra.mxu0 %v2068_v11  ;;  %1082 = vmatmul.bf16.gmra.mxu2 %v2196_v58 }
 0x11d   : > { %v1593_v24 = vadd.f32 %v1592_v1, %v1133_v17  ;;  %v1664_v25 = vmul.f32 %v1133_v17, %v1133_v17  ;;  %1171 = vmatmul.bf16.gmra.mxu1 %v2072_v13  ;;  %2529 = vst [vmem:[%s2777_s12 + $0xb0] sm:$0xff] %v2461_v60  }
 0x11f   : > { %v1727_v30 = vadd.f32 %v1726_v10, %v1664_v25  ;;  %1251 = vmatmul.bf16.gmra.mxu3 %v2200_v61  ;;  %v1043_v2 = vpop.f32.mrf.mxu2 }
 0x120   : > { %v1212_v3 = vpop.f32.mrf.mxu3 }
 0x121   : > { %v965_v31 = vpop.f32.mrf.mxu0  ;;  %v2897_v14 = vadd.f32 %v1212_v3, %v1043_v2 }
 0x122   : > { %v1134_v32 = vpop.f32.mrf.mxu1 }
 0x123   : > { %v1135_v33 = vadd.f32 %v1134_v32, %v965_v31 }
 0x125   : > { %v2386_v38 = vpack.c.bf16 %v1135_v33, %v1133_v17  ;;  %v1594_v39 = vadd.f32 %v1593_v24, %v1135_v33  ;;  %v1665_v41 = vmul.f32 %v1135_v33, %v1135_v33 }
 0x127   : > { %2514 = vst [vmem:[%s2777_s12 + $0x38] sm:$0xff] %v2386_v38   ;;  %v1728_v43 = vadd.f32 %v1727_v30, %v1665_v41  ;;  %v1045_v17 = vpop.f32.mrf.mxu2 }
 0x128   : > { %v1214_v18 = vpop.f32.mrf.mxu3 }
 0x129   : > { %v968_v45 = vpop.f32.mrf.mxu0  ;;  %v2899_v19 = vadd.f32 %v1214_v18, %v1045_v17 }
 0x12a   : > { %v1137_v46 = vpop.f32.mrf.mxu1 }
 0x12b   : > { %v1138_v49 = vadd.f32 %v1137_v46, %v968_v45  ;;  %v2466_v23 = vpack.c.bf16 %v2899_v19, %v2897_v14 }
 0x12d   : > { %v1595_v56 = vadd.f32 %v1594_v39, %v1138_v49  ;;  %v1666_v57 = vmul.f32 %v1138_v49, %v1138_v49  ;;  %2530 = vst [vmem:[%s2777_s12 + $0xb8] sm:$0xff] %v2466_v23  }
 0x12f   : > { %v1729_v62 = vadd.f32 %v1728_v43, %v1666_v57  ;;  %v1048_v28 = vpop.f32.mrf.mxu2 }
 0x130   : > { %v1217_v29 = vpop.f32.mrf.mxu3 }
 0x131   : > { %v970_v63 = vpop.f32.mrf.mxu0  ;;  %v2909_v38 = vadd.f32 %v1217_v29, %v1048_v28 }
 0x132   : > { %v1139_v0 = vpop.f32.mrf.mxu1 }
 0x133   : > { %v1140_v1 = vadd.f32 %v1139_v0, %v970_v63 }
 0x135   : > { %v2391_v5 = vpack.c.bf16 %v1140_v1, %v1138_v49  ;;  %v1596_v6 = vadd.f32 %v1595_v56, %v1140_v1  ;;  %v1667_v9 = vmul.f32 %v1140_v1, %v1140_v1 }
 0x137   : > { %2515 = vst [vmem:[%s2777_s12 + $0x40] sm:$0xff] %v2391_v5   ;;  %v1730_v10 = vadd.f32 %v1729_v62, %v1667_v9  ;;  %v1050_v39 = vpop.f32.mrf.mxu2 }
 0x138   : > { %v1219_v41 = vpop.f32.mrf.mxu3 }
 0x139   : > { %v973_v11 = vpop.f32.mrf.mxu0  ;;  %v2911_v43 = vadd.f32 %v1219_v41, %v1050_v39 }
 0x13a   : > { %v1142_v13 = vpop.f32.mrf.mxu1 }
 0x13b   : > { %v1143_v15 = vadd.f32 %v1142_v13, %v973_v11  ;;  %v2471_v45 = vpack.c.bf16 %v2911_v43, %v2909_v38 }
 0x13d   : > { %v1597_v21 = vadd.f32 %v1596_v6, %v1143_v15  ;;  %v1668_v22 = vmul.f32 %v1143_v15, %v1143_v15  ;;  %2531 = vst [vmem:[%s2777_s12 + $0xc0] sm:$0xff] %v2471_v45  }
 0x13f   : > { %v1731_v24 = vadd.f32 %v1730_v10, %v1668_v22  ;;  %v1053_v53 = vpop.f32.mrf.mxu2 }
 0x140   : > { %v1222_v54 = vpop.f32.mrf.mxu3 }
 0x141   : > { %v975_v25 = vpop.f32.mrf.mxu0  ;;  %v2923_v58 = vadd.f32 %v1222_v54, %v1053_v53 }
 0x142   : > { %v1144_v26 = vpop.f32.mrf.mxu1 }
 0x143   : > { %v1145_v27 = vadd.f32 %v1144_v26, %v975_v25 }
 0x145   : > { %v2396_v30 = vpack.c.bf16 %v1145_v27, %v1143_v15  ;;  %v2904_v31 = vadd.f32 %v1597_v21, %v1145_v27  ;;  %v1669_v32 = vmul.f32 %v1145_v27, %v1145_v27 }
 0x147   : > { %2516 = vst [vmem:[%s2777_s12 + $0x48] sm:$0xff] %v2396_v30   ;;  %v2907_v33 = vadd.f32 %v1731_v24, %v1669_v32  ;;  %v1055_v59 = vpop.f32.mrf.mxu2 }
 0x148   : > { %v1224_v60 = vpop.f32.mrf.mxu3 }
 0x149   : > { %v978_v34 = vpop.f32.mrf.mxu0  ;;  %v2925_v61 = vadd.f32 %v1224_v60, %v1055_v59 }
 0x14a   : > { %v1147_v35 = vpop.f32.mrf.mxu1 }
 0x14b   : > { %v2916_v50 = vadd.f32 %v1147_v35, %v978_v34  ;;  %v2476_v62 = vpack.c.bf16 %v2925_v61, %v2923_v58 }
 0x14d   : > { %2532 = vst [vmem:[%s2777_s12 + $0xc8] sm:$0xff] %v2476_v62  }
 0x14f   : > { %v1058_v3 = vpop.f32.mrf.mxu2 }
 0x150   : > { %v1227_v5 = vpop.f32.mrf.mxu3 }
 0x151   : > { %v980_v46 = vpop.f32.mrf.mxu0  ;;  %v2931_v11 = vadd.f32 %v1227_v5, %v1058_v3 }
 0x152   : > { %v1149_v49 = vpop.f32.mrf.mxu1 }
 0x153   : > { %v2918_v51 = vadd.f32 %v1149_v49, %v980_v46 }
 0x155   : > { %v2401_v55 = vpack.c.bf16 %v2918_v51, %v2916_v50  ;;  %v1671_v3 = vmul.f32 %v2918_v51, %v2918_v51 }
 0x157   : > { %2517 = vst [vmem:[%s2777_s12 + $0x50] sm:$0xff] %v2401_v55   ;;  %v1060_v13 = vpop.f32.mrf.mxu2 }
 0x158   : > { %v1229_v15 = vpop.f32.mrf.mxu3 }
 0x159   : > { %v983_v56 = vpop.f32.mrf.mxu0  ;;  %v2933_v17 = vadd.f32 %v1229_v15, %v1060_v13 }
 0x15a   : > { %v1152_v57 = vpop.f32.mrf.mxu1 }
 0x15b   : > { %v1153_v1 = vadd.f32 %v1152_v57, %v983_v56  ;;  %v2481_v18 = vpack.c.bf16 %v2933_v17, %v2931_v11 }
 0x15d   : > { %2533 = vst [vmem:[%s2777_s12 + $0xd0] sm:$0xff] %v2481_v18   ;;  %v1672_v13 = vmul.f32 %v1153_v1, %v1153_v1 }
 0x15f   : > { %v1063_v25 = vpop.f32.mrf.mxu2 }
 0x160   : > { %v1232_v26 = vpop.f32.mrf.mxu3 }
 0x161   : > { %v985_v63 = vpop.f32.mrf.mxu0  ;;  %v2939_v30 = vadd.f32 %v1232_v26, %v1063_v25 }
 0x162   : > { %v1154_v0 = vpop.f32.mrf.mxu1 }
 0x163   : > { %v1155_v2 = vadd.f32 %v1154_v0, %v985_v63  ;;  %v1670_v63 = vmul.f32 %v2916_v50, %v2916_v50 }
 0x165   : > { %v2406_v6 = vpack.c.bf16 %v1155_v2, %v1153_v1  ;;  %v1673_v25 = vmul.f32 %v1155_v2, %v1155_v2 }
 0x167   : > { %2518 = vst [vmem:[%s2777_s12 + $0x58] sm:$0xff] %v2406_v6   ;;  %v1065_v32 = vpop.f32.mrf.mxu2  ;;  %v1599_v6 = vadd.f32 %v2904_v31, %v2916_v50 }
 0x168   : > { %v1234_v34 = vpop.f32.mrf.mxu3 }
 0x169   : > { %v988_v9 = vpop.f32.mrf.mxu0  ;;  %v2941_v35 = vadd.f32 %v1234_v34, %v1065_v32 }
 0x16a   : > { %v1157_v10 = vpop.f32.mrf.mxu1 }
 0x16b   : > { %v1158_v23 = vadd.f32 %v1157_v10, %v988_v9  ;;  %v2486_v39 = vpack.c.bf16 %v2941_v35, %v2939_v30  ;;  %v1733_v9 = vadd.f32 %v2907_v33, %v1670_v63  ;;  %v1600_v10 = vadd.f32 %v1599_v6, %v2918_v51 }
 0x16d   : > { %2534 = vst [vmem:[%s2777_s12 + $0xd8] sm:$0xff] %v2486_v39   ;;  %v1734_v15 = vadd.f32 %v1733_v9, %v1671_v3  ;;  %v1674_v39 = vmul.f32 %v1158_v23, %v1158_v23 }
 0x16f   : > { %v1068_v53 = vpop.f32.mrf.mxu2  ;;  %v1735_v32 = vadd.f32 %v1734_v15, %v1672_v13 }
 0x170   : > { %v1237_v54 = vpop.f32.mrf.mxu3 }
 0x171   : > { %v990_v21 = vpop.f32.mrf.mxu0  ;;  %v2947_v59 = vadd.f32 %v1237_v54, %v1068_v53  ;;  %v1736_v50 = vadd.f32 %v1735_v32, %v1673_v25 }
 0x172   : > { %v1159_v22 = vpop.f32.mrf.mxu1 }
 0x173   : > { %v1160_v24 = vadd.f32 %v1159_v22, %v990_v21  ;;  %v1601_v22 = vadd.f32 %v1600_v10, %v1153_v1  ;;  %v1737_v51 = vadd.f32 %v1736_v50, %v1674_v39 }
 0x175   : > { %v2411_v27 = vpack.c.bf16 %v1160_v24, %v1158_v23  ;;  %v1602_v34 = vadd.f32 %v1601_v22, %v1155_v2 }
 0x177   : > { %2519 = vst [vmem:[%s2777_s12 + $0x60] sm:$0xff] %v2411_v27   ;;  %v1070_v60 = vpop.f32.mrf.mxu2  ;;  %v1603_v33 = vadd.f32 %v1602_v34, %v1158_v23 }
 0x178   : > { %v1239_v62 = vpop.f32.mrf.mxu3 }
 0x179   : > { %v993_v28 = vpop.f32.mrf.mxu0  ;;  %v2951_v0 = vadd.f32 %v1239_v62, %v1070_v60 }
 0x17a   : > { %v1162_v29 = vpop.f32.mrf.mxu1 }
 0x17b   : > { %v1163_v46 = vadd.f32 %v1162_v29, %v993_v28  ;;  %v2491_v5 = vpack.c.bf16 %v2951_v0, %v2947_v59 }
 0x17d   : > { %2535 = vst [vmem:[%s2777_s12 + $0xe0] sm:$0xff] %v2491_v5   ;;  %v1676_v53 = vmul.f32 %v1163_v46, %v1163_v46 }
 0x17f   : > { %v1073_v28 = vpop.f32.mrf.mxu2 }
 0x180   : > { %v1242_v29 = vpop.f32.mrf.mxu3 }
 0x181   : > { %v995_v41 = vpop.f32.mrf.mxu0 }
 0x182   : > { %v1164_v45 = vpop.f32.mrf.mxu1 }
 0x183   : > { %v1165_v49 = vadd.f32 %v1164_v45, %v995_v41  ;;  %v1675_v41 = vmul.f32 %v1160_v24, %v1160_v24  ;;  %v1604_v45 = vadd.f32 %v1603_v33, %v1160_v24 }
 0x185   : > { %v2416_v55 = vpack.c.bf16 %v1165_v49, %v1163_v46  ;;  %v1738_v1 = vadd.f32 %v1737_v51, %v1675_v41  ;;  %v1605_v60 = vadd.f32 %v1604_v45, %v1163_v46 }
 0x187   : > { %2520 = vst [vmem:[%s2777_s12 + $0x68] sm:$0xff] %v2416_v55   ;;  %v1075_v62 = vpop.f32.mrf.mxu2  ;;  %v1739_v3 = vadd.f32 %v1738_v1, %v1676_v53  ;;  %v1606_v5 = vadd.f32 %v1605_v60, %v1165_v49  ;;  %v1684_v53 = vmul.f32 %v2809_v4, %v2809_v4 }
 0x188   : > { %v1244_v63 = vpop.f32.mrf.mxu3 }
 0x189   : > { %v998_v56 = vpop.f32.mrf.mxu0  ;;  %v2965_v2 = vadd.f32 %v1244_v63, %v1075_v62 }
 0x18a   : > { %v1167_v57 = vpop.f32.mrf.mxu1 }
 0x18b   : > { %v1168_v26 = vadd.f32 %v1167_v57, %v998_v56  ;;  %v1677_v56 = vmul.f32 %v1165_v49, %v1165_v49  ;;  %v2963_v57 = vadd.f32 %v1242_v29, %v1073_v28 }
 0x18d   : > { %v1678_v23 = vmul.f32 %v1168_v26, %v1168_v26  ;;  %v2496_v24 = vpack.c.bf16 %v2965_v2, %v2963_v57  ;;  %v1740_v9 = vadd.f32 %v1739_v3, %v1677_v56  ;;  %v1607_v10 = vadd.f32 %v1606_v5, %v1168_v26 }
 0x18e   : > { %v1686_v5 = vmul.f32 %v2825_v37, %v2825_v37 }
 0x18f   : > { %2536 = vst [vmem:[%s2777_s12 + $0xe8] sm:$0xff] %v2496_v24   ;;  %v1741_v46 = vadd.f32 %v1740_v9, %v1678_v23  ;;  %v1078_v32 = vpop.f32.mrf.mxu2 }
 0x191   : > { %v1000_v18 = vpop.f32.mrf.mxu0 }
 0x192   : > { %v1169_v21 = vpop.f32.mrf.mxu1  ;;  %v1247_v49 = vpop.f32.mrf.mxu3 }
 0x193   : > { %v1170_v27 = vadd.f32 %v1169_v21, %v1000_v18  ;;  %v2980_v1 = vadd.f32 %v1247_v49, %v1078_v32  ;;  %v1692_v32 = vmul.f32 %v2873_v16, %v2873_v16 }
 0x195   : > { %v2421_v31 = vpack.c.bf16 %v1170_v27, %v1168_v26  ;;  %v1679_v13 = vmul.f32 %v1170_v27, %v1170_v27  ;;  %v1608_v15 = vadd.f32 %v1607_v10, %v1170_v27  ;;  %v1682_v26 = vmul.f32 %v2793_v36, %v2793_v36 }
 0x196   : > { %v1683_v27 = vmul.f32 %v2795_v40, %v2795_v40 }
 0x197   : > { %2521 = vst [vmem:[%s2777_s12 + $0x70] sm:$0xff] %v2421_v31   ;;  %v1742_v25 = vadd.f32 %v1741_v46, %v1679_v13  ;;  %v1080_v60 = vpop.f32.mrf.mxu2 }
 0x199   : > { %v1003_v54 = vpop.f32.mrf.mxu0 }
 0x19a   : > { %v1172_v55 = vpop.f32.mrf.mxu1  ;;  %v1249_v56 = vpop.f32.mrf.mxu3 }
 0x19b   : > { %v1173_v6 = vadd.f32 %v1172_v55, %v1003_v54  ;;  %v2982_v62 = vadd.f32 %v1249_v56, %v1080_v60  ;;  %v1697_v60 = vmul.f32 %v2899_v19, %v2899_v19 }
 0x19d   : > { %v1680_v18 = vmul.f32 %v1173_v6, %v1173_v6  ;;  %v1609_v28 = vadd.f32 %v1608_v15, %v1173_v6  ;;  %v2501_v3 = vpack.c.bf16 %v2982_v62, %v2980_v1 }
 0x19f   : > { %v1743_v34 = vadd.f32 %v1742_v25, %v1680_v18  ;;  %2537 = vst [vmem:[%s2777_s12 + $0xf0] sm:$0xff] %v2501_v3   ;;  %v1083_v46 = vpop.f32.mrf.mxu2  ;;  %v1689_v18 = vmul.f32 %v2843_v12, %v2843_v12 }
 0x1a1   : > { %v1005_v21 = vpop.f32.mrf.mxu0 }
 0x1a2   : > { %v1174_v22 = vpop.f32.mrf.mxu1  ;;  %v1252_v15 = vpop.f32.mrf.mxu3 }
 0x1a3   : > { %v1175_v29 = vadd.f32 %v1174_v22, %v1005_v21  ;;  %v1690_v22 = vmul.f32 %v2857_v44, %v2857_v44 }
 0x1a5   : > { %v2426_v39 = vpack.c.bf16 %v1175_v29, %v1173_v6  ;;  %v1610_v31 = vadd.f32 %v1609_v28, %v1175_v29  ;;  %v1681_v50 = vmul.f32 %v1175_v29, %v1175_v29  ;;  %v1687_v6 = vmul.f32 %v2827_v42, %v2827_v42 }
 0x1a6   : > { %v1691_v28 = vmul.f32 %v2859_v48, %v2859_v48 }
 0x1a7   : > { %2522 = vst [vmem:[%s2777_s12 + $0x78] sm:$0xff] %v2426_v39   ;;  %v1611_v33 = vadd.f32 %v1610_v31, %v2793_v36  ;;  %v1744_v41 = vadd.f32 %v1743_v34, %v1681_v50  ;;  %v1685_v36 = vmul.f32 %v2811_v8, %v2811_v8  ;;  %v3011_v34 = vadd.f32 %v1252_v15, %v1083_v46  ;;  %v1085_v39 = vpop.f32.mrf.mxu2 }
 0x1a9   : > { %v1612_v51 = vadd.f32 %v1611_v33, %v2795_v40  ;;  %v1745_v45 = vadd.f32 %v1744_v41, %v1682_v26  ;;  %v1694_v41 = vmul.f32 %v2885_v47, %v2885_v47 }
 0x1aa   : > { %v1254_v31 = vpop.f32.mrf.mxu3 }
 0x1ab   : > { %v1613_v54 = vadd.f32 %v1612_v51, %v2809_v4  ;;  %v1746_v55 = vadd.f32 %v1745_v45, %v1683_v27  ;;  %v3013_v50 = vadd.f32 %v1254_v31, %v1085_v39  ;;  %v1695_v51 = vmul.f32 %v2887_v52, %v2887_v52 }
 0x1ac   : > { %v1711_v31 = vmul.f32 %v2982_v62, %v2982_v62 }
 0x1ad   : > { %v1614_v63 = vadd.f32 %v1613_v54, %v2811_v8  ;;  %v1747_v40 = vadd.f32 %v1746_v55, %v1684_v53  ;;  %v1688_v8 = vmul.f32 %v2841_v7, %v2841_v7  ;;  %v2506_v33 = vpack.c.bf16 %v3013_v50, %v3011_v34 }
 0x1af   : > { %v1615_v4 = vadd.f32 %v1614_v63, %v2825_v37  ;;  %v1748_v23 = vadd.f32 %v1747_v40, %v1685_v36  ;;  %2538 = vst [vmem:[%s2777_s12 + $0xf8] sm:$0xff] %v2506_v33   ;;  %v1713_v33 = vmul.f32 %v3013_v50, %v3013_v50 }
 0x1b1   : > { %v1616_v24 = vadd.f32 %v1615_v4, %v2827_v42  ;;  %v1749_v9 = vadd.f32 %v1748_v23, %v1686_v5 }
 0x1b3   : > { %v1617_v10 = vadd.f32 %v1616_v24, %v2841_v7  ;;  %v1750_v13 = vadd.f32 %v1749_v9, %v1687_v6 }
 0x1b5   : > { %v1618_v37 = vadd.f32 %v1617_v10, %v2843_v12  ;;  %v1751_v21 = vadd.f32 %v1750_v13, %v1688_v8 }
 0x1b7   : > { %v1619_v42 = vadd.f32 %v1618_v37, %v2857_v44  ;;  %v1752_v25 = vadd.f32 %v1751_v21, %v1689_v18  ;;  %v1693_v44 = vmul.f32 %v2875_v20, %v2875_v20  ;;  %v1706_v21 = vmul.f32 %v2947_v59, %v2947_v59 }
 0x1b9   : > { %v1620_v7 = vadd.f32 %v1619_v42, %v2859_v48  ;;  %v1753_v29 = vadd.f32 %v1752_v25, %v1690_v22  ;;  %v1707_v25 = vmul.f32 %v2951_v0, %v2951_v0 }
 0x1bb   : > { %v1621_v49 = vadd.f32 %v1620_v7, %v2873_v16  ;;  %v1754_v12 = vadd.f32 %v1753_v29, %v1691_v28 }
 0x1bd   : > { %v1622_v26 = vadd.f32 %v1621_v49, %v2875_v20  ;;  %v1755_v48 = vadd.f32 %v1754_v12, %v1692_v32  ;;  %v1696_v20 = vmul.f32 %v2897_v14, %v2897_v14 }
 0x1bf   : > { %v1756_v16 = vadd.f32 %v1755_v48, %v1693_v44  ;;  %v1623_v27 = vadd.f32 %v1622_v26, %v2885_v47  ;;  %v1698_v47 = vmul.f32 %v2909_v38, %v2909_v38  ;;  %v1712_v26 = vmul.f32 %v3011_v34, %v3011_v34 }
 0x1c1   : > { %v1624_v45 = vadd.f32 %v1623_v27, %v2887_v52  ;;  %v1757_v53 = vadd.f32 %v1756_v16, %v1694_v41  ;;  %v1699_v52 = vmul.f32 %v2911_v43, %v2911_v43 }
 0x1c3   : > { %v1625_v54 = vadd.f32 %v1624_v45, %v2897_v14  ;;  %v1758_v55 = vadd.f32 %v1757_v53, %v1695_v51  ;;  %v1700_v14 = vmul.f32 %v2923_v58, %v2923_v58 }
 0x1c5   : > { %v1626_v56 = vadd.f32 %v1625_v54, %v2899_v19  ;;  %v1759_v36 = vadd.f32 %v1758_v55, %v1696_v20  ;;  %v1701_v19 = vmul.f32 %v2925_v61, %v2925_v61 }
 0x1c7   : > { %v1627_v63 = vadd.f32 %v1626_v56, %v2909_v38  ;;  %v1760_v40 = vadd.f32 %v1759_v36, %v1697_v60  ;;  %v1702_v38 = vmul.f32 %v2931_v11, %v2931_v11 }
 0x1c9   : > { %v1628_v3 = vadd.f32 %v1627_v63, %v2911_v43  ;;  %v1761_v5 = vadd.f32 %v1760_v40, %v1698_v47  ;;  %v1703_v43 = vmul.f32 %v2933_v17, %v2933_v17 }
 0x1cb   : > { %v1629_v4 = vadd.f32 %v1628_v3, %v2923_v58  ;;  %v1762_v23 = vadd.f32 %v1761_v5, %v1699_v52  ;;  %v1704_v58 = vmul.f32 %v2939_v30, %v2939_v30 }
 0x1cd   : > { %v1630_v6 = vadd.f32 %v1629_v4, %v2925_v61  ;;  %v1763_v24 = vadd.f32 %v1762_v23, %v1700_v14  ;;  %v1705_v61 = vmul.f32 %v2941_v35, %v2941_v35 }
 0x1cf   : > { %v1631_v9 = vadd.f32 %v1630_v6, %v2931_v11  ;;  %v1764_v8 = vadd.f32 %v1763_v24, %v1701_v19 }
 0x1d1   : > { %v1632_v10 = vadd.f32 %v1631_v9, %v2933_v17  ;;  %v1765_v13 = vadd.f32 %v1764_v8, %v1702_v38 }
 0x1d3   : > { %v1633_v46 = vadd.f32 %v1632_v10, %v2939_v30  ;;  %v1766_v15 = vadd.f32 %v1765_v13, %v1703_v43 }
 0x1d5   : > { %v1634_v18 = vadd.f32 %v1633_v46, %v2941_v35  ;;  %v1767_v37 = vadd.f32 %v1766_v15, %v1704_v58  ;;  %v1708_v35 = vmul.f32 %v2963_v57, %v2963_v57 }
 0x1d7   : > { %v1635_v11 = vadd.f32 %v1634_v18, %v2947_v59  ;;  %v1768_v22 = vadd.f32 %v1767_v37, %v1705_v61  ;;  %v1709_v59 = vmul.f32 %v2965_v2, %v2965_v2 }
 0x1d9   : > { %v1769_v17 = vadd.f32 %v1768_v22, %v1706_v21  ;;  %v1636_v42 = vadd.f32 %v1635_v11, %v2951_v0  ;;  %v1710_v0 = vmul.f32 %v2980_v1, %v2980_v1 }
 0x1db   : > { %v1770_v30 = vadd.f32 %v1769_v17, %v1707_v25  ;;  %v1637_v28 = vadd.f32 %v1636_v42, %v2963_v57 }
 0x1dd   : > { %v1771_v7 = vadd.f32 %v1770_v30, %v1708_v35  ;;  %v1638_v29 = vadd.f32 %v1637_v28, %v2965_v2 }
 0x1df   : > { %v1772_v32 = vadd.f32 %v1771_v7, %v1709_v59  ;;  %v1639_v49 = vadd.f32 %v1638_v29, %v2980_v1 }
 0x1e1   : > { %v1773_v12 = vadd.f32 %v1772_v32, %v1710_v0  ;;  %v1640_v39 = vadd.f32 %v1639_v49, %v2982_v62 }
 0x1e3   : > { %v1774_v57 = vadd.f32 %v1773_v12, %v1711_v31  ;;  %v1641_v44 = vadd.f32 %v1640_v39, %v3011_v34 }
 0x1e5   : > { %v1775_v2 = vadd.f32 %v1774_v57, %v1712_v26  ;;  %v1642_v48 = vadd.f32 %v1641_v44, %v3013_v50 }
 0x1e7   : > { %v1643_v1 = vrot.slane %v1642_v48, 4  ;;  %v1776_v41 = vadd.f32 %v1775_v2, %v1713_v33 }
 0x1e9   : > { %v1644_v16 = vadd.f32 %v1643_v1, %v1642_v48  ;;  %v1777_v27 = vrot.slane %v1776_v41, 4 }
 0x1eb   : > { %v1645_v51 = vrot.slane %v1644_v16, 2  ;;  %v1778_v62 = vadd.f32 %v1777_v27, %v1776_v41 }
 0x1ed   : > { %v1646_v45 = vadd.f32 %v1645_v51, %v1644_v16  ;;  %v1779_v53 = vrot.slane %v1778_v62, 2 }
 0x1ef   : > { %v1647_v20 = vrot.slane %v1646_v45, 1  ;;  %v1780_v54 = vadd.f32 %v1779_v53, %v1778_v62 }
 0x1f1   : > { %v1648_v34 = vadd.f32 %v1647_v20, %v1646_v45  ;;  %v1781_v55 = vrot.slane %v1780_v54, 1 }
 0x1f3   : > { %1649 = vst [vmem:[%s270_s19] sm:$0xff] %v1648_v34  ;;  %v1782_v50 = vadd.f32 %v1781_v55, %v1780_v54 }
 0x1f5   : > { %1783 = vst [vmem:[%s274_s22] sm:$0xff] %v1782_v50 }
 0x1f6 PF: > { %s15_s17 = sadd.s32 1, %s2601_s17   ;;  %s3103_s15 = smov %s2597_s16 }
 0x1f7   : > { %p12_p6 = scmp.ge.s32.totalorder %s15_s17, 4   ;;  %s3104_s16 = smov %s3106_s18 }
 0x1f9   :  { %14 = sbr.rel (!%p12_p6) target bundleno = 2 (0x2), region = 93 }

// kernel: basic_block_3d.7
= control target key start
LH: loop header
LB: loop body
LE: loop exit
PB: predicated region body
PF: predicated region fallthrough
CT: control target
= control target key end

     0   :  { %s3476_s0 = inlined_call_operand.vmem [shape: bf16[1024,128], index: 0, kind: input, shape index: {}]   ;;  %s3477_s1 = inlined_call_operand.vmem [shape: f32[1,128], index: 1, kind: input, shape index: {}]   ;;  %s3478_s2 = inlined_call_operand.vmem [shape: f32[1,128], index: 2, kind: input, shape index: {}]   ;;  %s3479_s3 = inlined_call_operand.vmem [shape: bf16[1024,128], index: 3, kind: input, shape index: {}]   ;;  %s3480_s4 = inlined_call_operand.vmem [shape: f32[1,128], index: 4, kind: input, shape index: {}]   ;;  %s3481_s5 = inlined_call_operand.vmem [shape: f32[1,128], index: 5, kind: input, shape index: {}]   ;;  %s3482_s6 = inlined_call_operand.vmem [shape: f32[1024,128], index: 6, kind: output, shape index: {}]  }
   0x1   :  { %v1452_v0 = vld [vmem:[%s3476_s0] sm:$0xff]   ;;  %v1963_v12 = vld [vmem:[%s3476_s0 + $0x8] sm:$0xff]   ;;  %v1964_v18 = vld [vmem:[%s3476_s0 + $0x10] sm:$0xff]  }
   0x2   :  { %v2142_v1 = vld [vmem:[%s3477_s1] ss:$0 sm:$0xff]  ;;  %v1453_v2 = vunpack.c.l.bf16 %v1452_v0  ;;  %v1454_v5 = vunpack.c.h.bf16 %v1452_v0  ;;  %v2026_v13 = vld [vmem:[%s3479_s3 + $0x8] sm:$0xff]   ;;  %v1457_v16 = vunpack.c.l.bf16 %v1963_v12  ;;  %v2027_v19 = vld [vmem:[%s3479_s3 + $0x10] sm:$0xff]   ;;  %v1458_v22 = vunpack.c.h.bf16 %v1963_v12 }
   0x3   :  { %v2147_v3 = vld [vmem:[%s3478_s2] ss:$0 sm:$0xff]  ;;  %v1713_v17 = vunpack.c.l.bf16 %v2026_v13  ;;  %v1714_v23 = vunpack.c.h.bf16 %v2026_v13  ;;  %v1461_v30 = vunpack.c.l.bf16 %v1964_v18  ;;  %v1717_v31 = vunpack.c.l.bf16 %v2027_v19  ;;  %v1965_v40 = vld [vmem:[%s3476_s0 + $0x18] sm:$0xff]   ;;  %v1967_v12 = vld [vmem:[%s3476_s0 + $0x28] sm:$0xff]  }
   0x4   :  { %v1708_v4 = vld [vmem:[%s3479_s3] sm:$0xff]   ;;  %v283_v9 = vmul.f32 %v2142_v1, %v1453_v2  ;;  %v284_v11 = vmul.f32 %v2142_v1, %v1454_v5  ;;  %v285_v26 = vmul.f32 %v2142_v1, %v1457_v16  ;;  %v286_v28 = vmul.f32 %v2142_v1, %v1458_v22  ;;  %v2028_v41 = vld [vmem:[%s3479_s3 + $0x18] sm:$0xff]  }
   0x5   :  { %v1709_v6 = vunpack.c.l.bf16 %v1708_v4  ;;  %v2155_v7 = vld [vmem:[%s3480_s4] ss:$0 sm:$0xff]  ;;  %v1710_v8 = vunpack.c.h.bf16 %v1708_v4  ;;  %v287_v38 = vmul.f32 %v2142_v1, %v1461_v30  ;;  %v1462_v45 = vunpack.c.h.bf16 %v1964_v18  ;;  %v1968_v30 = vld [vmem:[%s3476_s0 + $0x30] sm:$0xff]  }
   0x6   :  { %v2161_v10 = vld [vmem:[%s3481_s5] ss:$0 sm:$0xff]  ;;  %v415_v20 = vadd.f32 %v2147_v3, %v283_v9  ;;  %v416_v21 = vadd.f32 %v2147_v3, %v284_v11  ;;  %v805_v27 = vmul.f32 %v2155_v7, %v1713_v17  ;;  %v806_v29 = vmul.f32 %v2155_v7, %v1714_v23 }
   0x7   :  { %v803_v14 = vmul.f32 %v2155_v7, %v1709_v6  ;;  %v804_v15 = vmul.f32 %v2155_v7, %v1710_v8  ;;  %v417_v34 = vadd.f32 %v2147_v3, %v285_v26  ;;  %v418_v36 = vadd.f32 %v2147_v3, %v286_v28  ;;  %v1966_v54 = vld [vmem:[%s3476_s0 + $0x20] sm:$0xff]  }
   0x8   :  { %v937_v35 = vadd.f32 %v2161_v10, %v805_v27  ;;  %v938_v37 = vadd.f32 %v2161_v10, %v806_v29  ;;  %v807_v39 = vmul.f32 %v2155_v7, %v1717_v31  ;;  %v419_v47 = vadd.f32 %v2147_v3, %v287_v38  ;;  %v2029_v59 = vld [vmem:[%s3479_s3 + $0x20] sm:$0xff]  }
   0x9   :  { %v935_v24 = vadd.f32 %v2161_v10, %v803_v14  ;;  %v936_v25 = vadd.f32 %v2161_v10, %v804_v15  ;;  %v1718_v49 = vunpack.c.h.bf16 %v2027_v19  ;;  %v288_v51 = vmul.f32 %v2142_v1, %v1462_v45 }
   0xa   :  { %v1065_v44 = vadd.f32 %v937_v35, %v417_v34  ;;  %v1066_v46 = vadd.f32 %v938_v37, %v418_v36  ;;  %v939_v48 = vadd.f32 %v2161_v10, %v807_v39  ;;  %v1465_v52 = vunpack.c.l.bf16 %v1965_v40  ;;  %v2031_v35 = vld [vmem:[%s3479_s3 + $0x30] sm:$0xff]  }
   0xb   :  { %v1063_v32 = vadd.f32 %v935_v24, %v415_v20  ;;  %v1064_v33 = vadd.f32 %v936_v25, %v416_v21  ;;  %v1721_v53 = vunpack.c.l.bf16 %v2028_v41  ;;  %v808_v57 = vmul.f32 %v2155_v7, %v1718_v49  ;;  %v2030_v21 = vld [vmem:[%s3479_s3 + $0x28] sm:$0xff]  }
   0xc   :  { %v1193_v50 = vmax.f32 %v1065_v44, 0.0  ;;  %v1194_v55 = vmax.f32 %v1066_v46, 0.0  ;;  %v1067_v56 = vadd.f32 %v939_v48, %v419_v47  ;;  %v1466_v58 = vunpack.c.h.bf16 %v1965_v40  ;;  %v1969_v48 = vld [vmem:[%s3476_s0 + $0x38] sm:$0xff]  }
   0xd   :  { %v1191_v42 = vmax.f32 %v1063_v32, 0.0  ;;  %v1192_v43 = vmax.f32 %v1064_v33, 0.0  ;;  %v420_v60 = vadd.f32 %v2147_v3, %v288_v51  ;;  %v289_v61 = vmul.f32 %v2142_v1, %v1465_v52 }
   0xe   :  { %1321 = vst [vmem:[%s3482_s6 + $0x10] sm:$0xff] %v1193_v50  ;;  %v809_v62 = vmul.f32 %v2155_v7, %v1721_v53  ;;  %v1722_v63 = vunpack.c.h.bf16 %v2028_v41  ;;  %v1195_v0 = vmax.f32 %v1067_v56, 0.0  ;;  %v940_v2 = vadd.f32 %v2161_v10, %v808_v57  ;;  %v2032_v53 = vld [vmem:[%s3479_s3 + $0x38] sm:$0xff]  }
   0xf   :  { %1319 = vst [vmem:[%s3482_s6] sm:$0xff] %v1191_v42  ;;  %v290_v4 = vmul.f32 %v2142_v1, %v1466_v58  ;;  %v1469_v5 = vunpack.c.l.bf16 %v1966_v54  ;;  %v421_v6 = vadd.f32 %v2147_v3, %v289_v61  ;;  %v1725_v11 = vunpack.c.l.bf16 %v2029_v59 }
  0x10   :  { %1320 = vst [vmem:[%s3482_s6 + $0x8] sm:$0xff] %v1192_v43  ;;  %v941_v8 = vadd.f32 %v2161_v10, %v809_v62  ;;  %v810_v9 = vmul.f32 %v2155_v7, %v1722_v63  ;;  %v1068_v13 = vadd.f32 %v940_v2, %v420_v60  ;;  %v1470_v16 = vunpack.c.h.bf16 %v1966_v54 }
  0x11   :  { %1322 = vst [vmem:[%s3482_s6 + $0x18] sm:$0xff] %v1194_v55  ;;  %v422_v14 = vadd.f32 %v2147_v3, %v290_v4  ;;  %v291_v15 = vmul.f32 %v2142_v1, %v1469_v5  ;;  %v811_v19 = vmul.f32 %v2155_v7, %v1725_v11  ;;  %v1726_v20 = vunpack.c.h.bf16 %v2029_v59  ;;  %v1970_v4 = vld [vmem:[%s3476_s0 + $0x40] sm:$0xff]  }
  0x12   :  { %1323 = vst [vmem:[%s3482_s6 + $0x20] sm:$0xff] %v1195_v0  ;;  %v1069_v17 = vadd.f32 %v941_v8, %v421_v6  ;;  %v942_v18 = vadd.f32 %v2161_v10, %v810_v9  ;;  %v1196_v22 = vmax.f32 %v1068_v13, 0.0  ;;  %v292_v24 = vmul.f32 %v2142_v1, %v1470_v16  ;;  %v2033_v11 = vld [vmem:[%s3479_s3 + $0x40] sm:$0xff]  }
  0x13   :  { %v423_v23 = vadd.f32 %v2147_v3, %v291_v15  ;;  %v1473_v25 = vunpack.c.l.bf16 %v1967_v12  ;;  %v943_v28 = vadd.f32 %v2161_v10, %v811_v19  ;;  %v812_v29 = vmul.f32 %v2155_v7, %v1726_v20 }
  0x14   :  { %v1197_v26 = vmax.f32 %v1069_v17, 0.0  ;;  %v1070_v27 = vadd.f32 %v942_v18, %v422_v14  ;;  %1324 = vst [vmem:[%s3482_s6 + $0x28] sm:$0xff] %v1196_v22  ;;  %v424_v31 = vadd.f32 %v2147_v3, %v292_v24  ;;  %v1729_v33 = vunpack.c.l.bf16 %v2030_v21  ;;  %v1971_v24 = vld [vmem:[%s3476_s0 + $0x48] sm:$0xff]  }
  0x15   :  { %v293_v32 = vmul.f32 %v2142_v1, %v1473_v25  ;;  %v1474_v34 = vunpack.c.h.bf16 %v1967_v12  ;;  %v1071_v37 = vadd.f32 %v943_v28, %v423_v23  ;;  %v944_v38 = vadd.f32 %v2161_v10, %v812_v29  ;;  %v2034_v29 = vld [vmem:[%s3479_s3 + $0x48] sm:$0xff]  }
  0x16   :  { %1325 = vst [vmem:[%s3482_s6 + $0x30] sm:$0xff] %v1197_v26  ;;  %v1198_v36 = vmax.f32 %v1070_v27, 0.0  ;;  %v1730_v39 = vunpack.c.h.bf16 %v2030_v21  ;;  %v813_v41 = vmul.f32 %v2155_v7, %v1729_v33  ;;  %v1477_v43 = vunpack.c.l.bf16 %v1968_v30 }
  0x17   :  { %v425_v40 = vadd.f32 %v2147_v3, %v293_v32  ;;  %v294_v42 = vmul.f32 %v2142_v1, %v1474_v34  ;;  %v1199_v44 = vmax.f32 %v1071_v37, 0.0  ;;  %v1072_v45 = vadd.f32 %v944_v38, %v424_v31 }
  0x18   :  { %1326 = vst [vmem:[%s3482_s6 + $0x38] sm:$0xff] %v1198_v36  ;;  %v814_v46 = vmul.f32 %v2155_v7, %v1730_v39  ;;  %v1733_v47 = vunpack.c.l.bf16 %v2031_v35  ;;  %v945_v49 = vadd.f32 %v2161_v10, %v813_v41  ;;  %v295_v51 = vmul.f32 %v2142_v1, %v1477_v43 }
  0x19   :  { %v426_v50 = vadd.f32 %v2147_v3, %v294_v42  ;;  %v1478_v52 = vunpack.c.h.bf16 %v1968_v30  ;;  %1327 = vst [vmem:[%s3482_s6 + $0x40] sm:$0xff] %v1199_v44  ;;  %v1200_v54 = vmax.f32 %v1072_v45, 0.0  ;;  %v1734_v57 = vunpack.c.h.bf16 %v2031_v35  ;;  %v1972_v42 = vld [vmem:[%s3476_s0 + $0x50] sm:$0xff]  }
  0x1a   :  { %v946_v55 = vadd.f32 %v2161_v10, %v814_v46  ;;  %v815_v56 = vmul.f32 %v2155_v7, %v1733_v47  ;;  %v1073_v58 = vadd.f32 %v945_v49, %v425_v40  ;;  %v427_v59 = vadd.f32 %v2147_v3, %v295_v51  ;;  %v2035_v51 = vld [vmem:[%s3479_s3 + $0x50] sm:$0xff]  }
  0x1b   :  { %v296_v60 = vmul.f32 %v2142_v1, %v1478_v52  ;;  %v1481_v61 = vunpack.c.l.bf16 %v1969_v48  ;;  %1328 = vst [vmem:[%s3482_s6 + $0x48] sm:$0xff] %v1200_v54  ;;  %v816_v0 = vmul.f32 %v2155_v7, %v1734_v57  ;;  %v1737_v2 = vunpack.c.l.bf16 %v2032_v53 }
  0x1c   :  { %v1074_v62 = vadd.f32 %v946_v55, %v426_v50  ;;  %v947_v63 = vadd.f32 %v2161_v10, %v815_v56  ;;  %v1201_v5 = vmax.f32 %v1073_v58, 0.0  ;;  %v1482_v9 = vunpack.c.h.bf16 %v1969_v48 }
  0x1d   :  { %v428_v6 = vadd.f32 %v2147_v3, %v296_v60  ;;  %v297_v8 = vmul.f32 %v2142_v1, %v1481_v61  ;;  %v948_v14 = vadd.f32 %v2161_v10, %v816_v0  ;;  %v817_v15 = vmul.f32 %v2155_v7, %v1737_v2  ;;  %v1973_v60 = vld [vmem:[%s3476_s0 + $0x58] sm:$0xff]  }
  0x1e   :  { %v1202_v12 = vmax.f32 %v1074_v62, 0.0  ;;  %v1075_v13 = vadd.f32 %v947_v63, %v427_v59  ;;  %1329 = vst [vmem:[%s3482_s6 + $0x50] sm:$0xff] %v1201_v5  ;;  %v298_v17 = vmul.f32 %v2142_v1, %v1482_v9  ;;  %v1738_v18 = vunpack.c.h.bf16 %v2032_v53  ;;  %v2036_v2 = vld [vmem:[%s3479_s3 + $0x58] sm:$0xff]  }
  0x1f   :  { %v429_v16 = vadd.f32 %v2147_v3, %v297_v8  ;;  %v1485_v19 = vunpack.c.l.bf16 %v1970_v4  ;;  %v1076_v21 = vadd.f32 %v948_v14, %v428_v6  ;;  %v949_v22 = vadd.f32 %v2161_v10, %v817_v15 }
  0x20   :  { %1330 = vst [vmem:[%s3482_s6 + $0x58] sm:$0xff] %v1202_v12  ;;  %v1203_v20 = vmax.f32 %v1075_v13, 0.0  ;;  %v1741_v23 = vunpack.c.l.bf16 %v2033_v11  ;;  %v430_v25 = vadd.f32 %v2147_v3, %v298_v17  ;;  %v818_v26 = vmul.f32 %v2155_v7, %v1738_v18  ;;  %v1974_v18 = vld [vmem:[%s3476_s0 + $0x60] sm:$0xff]  }
  0x21   :  { %v299_v27 = vmul.f32 %v2142_v1, %v1485_v19  ;;  %v1486_v28 = vunpack.c.h.bf16 %v1970_v4  ;;  %v1204_v30 = vmax.f32 %v1076_v21, 0.0  ;;  %v1077_v31 = vadd.f32 %v949_v22, %v429_v16 }
  0x22   :  { %1331 = vst [vmem:[%s3482_s6 + $0x60] sm:$0xff] %v1203_v20  ;;  %v819_v32 = vmul.f32 %v2155_v7, %v1741_v23  ;;  %v1742_v33 = vunpack.c.h.bf16 %v2033_v11  ;;  %v950_v34 = vadd.f32 %v2161_v10, %v818_v26  ;;  %v1489_v37 = vunpack.c.l.bf16 %v1971_v24  ;;  %v2037_v23 = vld [vmem:[%s3479_s3 + $0x60] sm:$0xff]  }
  0x23   :  { %v431_v35 = vadd.f32 %v2147_v3, %v299_v27  ;;  %v300_v36 = vmul.f32 %v2142_v1, %v1486_v28  ;;  %1332 = vst [vmem:[%s3482_s6 + $0x68] sm:$0xff] %v1204_v30  ;;  %v1205_v38 = vmax.f32 %v1077_v31, 0.0  ;;  %v1745_v41 = vunpack.c.l.bf16 %v2034_v29 }
  0x24   :  { %v951_v39 = vadd.f32 %v2161_v10, %v819_v32  ;;  %v820_v40 = vmul.f32 %v2155_v7, %v1742_v33  ;;  %v1078_v43 = vadd.f32 %v950_v34, %v430_v25  ;;  %v301_v45 = vmul.f32 %v2142_v1, %v1489_v37 }
  0x25   :  { %v432_v44 = vadd.f32 %v2147_v3, %v300_v36  ;;  %v1490_v46 = vunpack.c.h.bf16 %v1971_v24  ;;  %1333 = vst [vmem:[%s3482_s6 + $0x70] sm:$0xff] %v1205_v38  ;;  %v821_v49 = vmul.f32 %v2155_v7, %v1745_v41  ;;  %v1746_v50 = vunpack.c.h.bf16 %v2034_v29  ;;  %v1975_v36 = vld [vmem:[%s3476_s0 + $0x68] sm:$0xff]  }
  0x26   :  { %v1079_v47 = vadd.f32 %v951_v39, %v431_v35  ;;  %v952_v48 = vadd.f32 %v2161_v10, %v820_v40  ;;  %v1206_v52 = vmax.f32 %v1078_v43, 0.0  ;;  %v433_v53 = vadd.f32 %v2147_v3, %v301_v45  ;;  %v2038_v41 = vld [vmem:[%s3479_s3 + $0x68] sm:$0xff]  }
  0x27   :  { %v302_v54 = vmul.f32 %v2142_v1, %v1490_v46  ;;  %v1493_v55 = vunpack.c.l.bf16 %v1972_v42  ;;  %v953_v58 = vadd.f32 %v2161_v10, %v821_v49  ;;  %v822_v59 = vmul.f32 %v2155_v7, %v1746_v50 }
  0x28   :  { %v1207_v56 = vmax.f32 %v1079_v47, 0.0  ;;  %v1080_v57 = vadd.f32 %v952_v48, %v432_v44  ;;  %1334 = vst [vmem:[%s3482_s6 + $0x78] sm:$0xff] %v1206_v52  ;;  %v1749_v63 = vunpack.c.l.bf16 %v2035_v51  ;;  %v1494_v0 = vunpack.c.h.bf16 %v1972_v42 }
  0x29   :  { %v434_v61 = vadd.f32 %v2147_v3, %v302_v54  ;;  %v303_v62 = vmul.f32 %v2142_v1, %v1493_v55  ;;  %v1081_v5 = vadd.f32 %v953_v58, %v433_v53  ;;  %v954_v6 = vadd.f32 %v2161_v10, %v822_v59  ;;  %v1976_v54 = vld [vmem:[%s3476_s0 + $0x70] sm:$0xff]  }
  0x2a   :  { %1335 = vst [vmem:[%s3482_s6 + $0x80] sm:$0xff] %v1207_v56  ;;  %v1208_v4 = vmax.f32 %v1080_v57, 0.0  ;;  %v1750_v8 = vunpack.c.h.bf16 %v2035_v51  ;;  %v823_v11 = vmul.f32 %v2155_v7, %v1749_v63  ;;  %v304_v12 = vmul.f32 %v2142_v1, %v1494_v0  ;;  %v2039_v59 = vld [vmem:[%s3479_s3 + $0x70] sm:$0xff]  }
  0x2b   :  { %v435_v9 = vadd.f32 %v2147_v3, %v303_v62  ;;  %v1497_v13 = vunpack.c.l.bf16 %v1973_v60  ;;  %v1209_v14 = vmax.f32 %v1081_v5, 0.0  ;;  %v1082_v15 = vadd.f32 %v954_v6, %v434_v61 }
  0x2c   :  { %1336 = vst [vmem:[%s3482_s6 + $0x88] sm:$0xff] %v1208_v4  ;;  %v824_v16 = vmul.f32 %v2155_v7, %v1750_v8  ;;  %v1753_v17 = vunpack.c.l.bf16 %v2036_v2  ;;  %v955_v19 = vadd.f32 %v2161_v10, %v823_v11  ;;  %v436_v20 = vadd.f32 %v2147_v3, %v304_v12  ;;  %v1977_v12 = vld [vmem:[%s3476_s0 + $0x78] sm:$0xff]  }
  0x2d   :  { %v305_v21 = vmul.f32 %v2142_v1, %v1497_v13  ;;  %v1498_v22 = vunpack.c.h.bf16 %v1973_v60  ;;  %1337 = vst [vmem:[%s3482_s6 + $0x90] sm:$0xff] %v1209_v14  ;;  %v1210_v24 = vmax.f32 %v1082_v15, 0.0  ;;  %v1754_v27 = vunpack.c.h.bf16 %v2036_v2 }
  0x2e   :  { %v956_v25 = vadd.f32 %v2161_v10, %v824_v16  ;;  %v825_v26 = vmul.f32 %v2155_v7, %v1753_v17  ;;  %v1083_v28 = vadd.f32 %v955_v19, %v435_v9  ;;  %v1501_v31 = vunpack.c.l.bf16 %v1974_v18 }
  0x2f   :  { %v437_v29 = vadd.f32 %v2147_v3, %v305_v21  ;;  %v306_v30 = vmul.f32 %v2142_v1, %v1498_v22  ;;  %1338 = vst [vmem:[%s3482_s6 + $0x98] sm:$0xff] %v1210_v24  ;;  %v826_v34 = vmul.f32 %v2155_v7, %v1754_v27  ;;  %v1757_v35 = vunpack.c.l.bf16 %v2037_v23  ;;  %v2040_v21 = vld [vmem:[%s3479_s3 + $0x78] sm:$0xff]  }
  0x30   :  { %v1084_v32 = vadd.f32 %v956_v25, %v436_v20  ;;  %v957_v33 = vadd.f32 %v2161_v10, %v825_v26  ;;  %v1211_v37 = vmax.f32 %v1083_v28, 0.0  ;;  %v307_v39 = vmul.f32 %v2142_v1, %v1501_v31 }
  0x31   :  { %v438_v38 = vadd.f32 %v2147_v3, %v306_v30  ;;  %v1502_v40 = vunpack.c.h.bf16 %v1974_v18  ;;  %v958_v44 = vadd.f32 %v2161_v10, %v826_v34  ;;  %v827_v45 = vmul.f32 %v2155_v7, %v1757_v35  ;;  %v1978_v30 = vld [vmem:[%s3476_s0 + $0x80] sm:$0xff]  }
  0x32   :  { %v1212_v42 = vmax.f32 %v1084_v32, 0.0  ;;  %v1085_v43 = vadd.f32 %v957_v33, %v437_v29  ;;  %1339 = vst [vmem:[%s3482_s6 + $0xa0] sm:$0xff] %v1211_v37  ;;  %v439_v46 = vadd.f32 %v2147_v3, %v307_v39  ;;  %v1758_v48 = vunpack.c.h.bf16 %v2037_v23  ;;  %v2041_v35 = vld [vmem:[%s3479_s3 + $0x80] sm:$0xff]  }
  0x33   :  { %v308_v47 = vmul.f32 %v2142_v1, %v1502_v40  ;;  %v1505_v49 = vunpack.c.l.bf16 %v1975_v36  ;;  %v1086_v51 = vadd.f32 %v958_v44, %v438_v38  ;;  %v959_v52 = vadd.f32 %v2161_v10, %v827_v45 }
  0x34   :  { %1340 = vst [vmem:[%s3482_s6 + $0xa8] sm:$0xff] %v1212_v42  ;;  %v1213_v50 = vmax.f32 %v1085_v43, 0.0  ;;  %v1761_v53 = vunpack.c.l.bf16 %v2038_v41  ;;  %v828_v56 = vmul.f32 %v2155_v7, %v1758_v48  ;;  %v1506_v58 = vunpack.c.h.bf16 %v1975_v36  ;;  %v1979_v48 = vld [vmem:[%s3476_s0 + $0x88] sm:$0xff]  }
  0x35   :  { %v440_v55 = vadd.f32 %v2147_v3, %v308_v47  ;;  %v309_v57 = vmul.f32 %v2142_v1, %v1505_v49  ;;  %v1214_v60 = vmax.f32 %v1086_v51, 0.0  ;;  %v1087_v61 = vadd.f32 %v959_v52, %v439_v46 }
  0x36   :  { %1341 = vst [vmem:[%s3482_s6 + $0xb0] sm:$0xff] %v1213_v50  ;;  %v829_v62 = vmul.f32 %v2155_v7, %v1761_v53  ;;  %v1762_v63 = vunpack.c.h.bf16 %v2038_v41  ;;  %v960_v0 = vadd.f32 %v2161_v10, %v828_v56  ;;  %v310_v4 = vmul.f32 %v2142_v1, %v1506_v58  ;;  %v2042_v53 = vld [vmem:[%s3479_s3 + $0x88] sm:$0xff]  }
  0x37   :  { %v441_v2 = vadd.f32 %v2147_v3, %v309_v57  ;;  %v1509_v5 = vunpack.c.l.bf16 %v1976_v54  ;;  %1342 = vst [vmem:[%s3482_s6 + $0xb8] sm:$0xff] %v1214_v60  ;;  %v1215_v6 = vmax.f32 %v1087_v61, 0.0  ;;  %v1765_v11 = vunpack.c.l.bf16 %v2039_v59 }
  0x38   :  { %v961_v8 = vadd.f32 %v2161_v10, %v829_v62  ;;  %v830_v9 = vmul.f32 %v2155_v7, %v1762_v63  ;;  %v1088_v13 = vadd.f32 %v960_v0, %v440_v55  ;;  %v442_v14 = vadd.f32 %v2147_v3, %v310_v4  ;;  %v1980_v4 = vld [vmem:[%s3476_s0 + $0x90] sm:$0xff]  }
  0x39   :  { %v311_v15 = vmul.f32 %v2142_v1, %v1509_v5  ;;  %v1510_v16 = vunpack.c.h.bf16 %v1976_v54  ;;  %1343 = vst [vmem:[%s3482_s6 + $0xc0] sm:$0xff] %v1215_v6  ;;  %v831_v19 = vmul.f32 %v2155_v7, %v1765_v11  ;;  %v1766_v20 = vunpack.c.h.bf16 %v2039_v59  ;;  %v2043_v11 = vld [vmem:[%s3479_s3 + $0x90] sm:$0xff]  }
  0x3a   :  { %v1089_v17 = vadd.f32 %v961_v8, %v441_v2  ;;  %v962_v18 = vadd.f32 %v2161_v10, %v830_v9  ;;  %v1216_v22 = vmax.f32 %v1088_v13, 0.0  ;;  %v1513_v25 = vunpack.c.l.bf16 %v1977_v12 }
  0x3b   :  { %v443_v23 = vadd.f32 %v2147_v3, %v311_v15  ;;  %v312_v24 = vmul.f32 %v2142_v1, %v1510_v16  ;;  %v963_v28 = vadd.f32 %v2161_v10, %v831_v19  ;;  %v832_v29 = vmul.f32 %v2155_v7, %v1766_v20 }
  0x3c   :  { %v1217_v26 = vmax.f32 %v1089_v17, 0.0  ;;  %v1090_v27 = vadd.f32 %v962_v18, %v442_v14  ;;  %1344 = vst [vmem:[%s3482_s6 + $0xc8] sm:$0xff] %v1216_v22  ;;  %v313_v32 = vmul.f32 %v2142_v1, %v1513_v25  ;;  %v1769_v33 = vunpack.c.l.bf16 %v2040_v21 }
  0x3d   :  { %v444_v31 = vadd.f32 %v2147_v3, %v312_v24  ;;  %v1514_v34 = vunpack.c.h.bf16 %v1977_v12  ;;  %v1091_v37 = vadd.f32 %v963_v28, %v443_v23  ;;  %v964_v38 = vadd.f32 %v2161_v10, %v832_v29  ;;  %v1981_v24 = vld [vmem:[%s3476_s0 + $0x98] sm:$0xff]  }
  0x3e   :  { %1345 = vst [vmem:[%s3482_s6 + $0xd0] sm:$0xff] %v1217_v26  ;;  %v1218_v36 = vmax.f32 %v1090_v27, 0.0  ;;  %v1770_v39 = vunpack.c.h.bf16 %v2040_v21  ;;  %v445_v40 = vadd.f32 %v2147_v3, %v313_v32  ;;  %v833_v41 = vmul.f32 %v2155_v7, %v1769_v33  ;;  %v2044_v29 = vld [vmem:[%s3479_s3 + $0x98] sm:$0xff]  }
  0x3f   :  { %v314_v42 = vmul.f32 %v2142_v1, %v1514_v34  ;;  %v1517_v43 = vunpack.c.l.bf16 %v1978_v30  ;;  %v1219_v44 = vmax.f32 %v1091_v37, 0.0  ;;  %v1092_v45 = vadd.f32 %v964_v38, %v444_v31 }
  0x40   :  { %1346 = vst [vmem:[%s3482_s6 + $0xd8] sm:$0xff] %v1218_v36  ;;  %v834_v46 = vmul.f32 %v2155_v7, %v1770_v39  ;;  %v1773_v47 = vunpack.c.l.bf16 %v2041_v35  ;;  %v965_v49 = vadd.f32 %v2161_v10, %v833_v41  ;;  %v1518_v52 = vunpack.c.h.bf16 %v1978_v30 }
  0x41   :  { %v446_v50 = vadd.f32 %v2147_v3, %v314_v42  ;;  %v315_v51 = vmul.f32 %v2142_v1, %v1517_v43  ;;  %1347 = vst [vmem:[%s3482_s6 + $0xe0] sm:$0xff] %v1219_v44  ;;  %v1220_v54 = vmax.f32 %v1092_v45, 0.0  ;;  %v1774_v57 = vunpack.c.h.bf16 %v2041_v35  ;;  %v1982_v42 = vld [vmem:[%s3476_s0 + $0xa0] sm:$0xff]  }
  0x42   :  { %v966_v55 = vadd.f32 %v2161_v10, %v834_v46  ;;  %v835_v56 = vmul.f32 %v2155_v7, %v1773_v47  ;;  %v1093_v58 = vadd.f32 %v965_v49, %v445_v40  ;;  %v316_v60 = vmul.f32 %v2142_v1, %v1518_v52 }
  0x43   :  { %v447_v59 = vadd.f32 %v2147_v3, %v315_v51  ;;  %v1521_v61 = vunpack.c.l.bf16 %v1979_v48  ;;  %1348 = vst [vmem:[%s3482_s6 + $0xe8] sm:$0xff] %v1220_v54  ;;  %v836_v0 = vmul.f32 %v2155_v7, %v1774_v57  ;;  %v1777_v2 = vunpack.c.l.bf16 %v2042_v53  ;;  %v2045_v51 = vld [vmem:[%s3479_s3 + $0xa0] sm:$0xff]  }
  0x44   :  { %v1094_v62 = vadd.f32 %v966_v55, %v446_v50  ;;  %v967_v63 = vadd.f32 %v2161_v10, %v835_v56  ;;  %v1221_v5 = vmax.f32 %v1093_v58, 0.0  ;;  %v448_v6 = vadd.f32 %v2147_v3, %v316_v60  ;;  %v1983_v60 = vld [vmem:[%s3476_s0 + $0xa8] sm:$0xff]  }
  0x45   :  { %v317_v8 = vmul.f32 %v2142_v1, %v1521_v61  ;;  %v1522_v9 = vunpack.c.h.bf16 %v1979_v48  ;;  %v968_v14 = vadd.f32 %v2161_v10, %v836_v0  ;;  %v837_v15 = vmul.f32 %v2155_v7, %v1777_v2  ;;  %v2046_v2 = vld [vmem:[%s3479_s3 + $0xa8] sm:$0xff]  }
  0x46   :  { %v1222_v12 = vmax.f32 %v1094_v62, 0.0  ;;  %v1095_v13 = vadd.f32 %v967_v63, %v447_v59  ;;  %1349 = vst [vmem:[%s3482_s6 + $0xf0] sm:$0xff] %v1221_v5  ;;  %v1778_v18 = vunpack.c.h.bf16 %v2042_v53  ;;  %v1525_v19 = vunpack.c.l.bf16 %v1980_v4 }
  0x47   :  { %v449_v16 = vadd.f32 %v2147_v3, %v317_v8  ;;  %v318_v17 = vmul.f32 %v2142_v1, %v1522_v9  ;;  %v1096_v21 = vadd.f32 %v968_v14, %v448_v6  ;;  %v969_v22 = vadd.f32 %v2161_v10, %v837_v15 }
  0x48   :  { %1350 = vst [vmem:[%s3482_s6 + $0xf8] sm:$0xff] %v1222_v12  ;;  %v1223_v20 = vmax.f32 %v1095_v13, 0.0  ;;  %v1781_v23 = vunpack.c.l.bf16 %v2043_v11  ;;  %v838_v26 = vmul.f32 %v2155_v7, %v1778_v18  ;;  %v319_v27 = vmul.f32 %v2142_v1, %v1525_v19  ;;  %v1984_v18 = vld [vmem:[%s3476_s0 + $0xb0] sm:$0xff]  }
  0x49   :  { %v450_v25 = vadd.f32 %v2147_v3, %v318_v17  ;;  %v1526_v28 = vunpack.c.h.bf16 %v1980_v4  ;;  %v1224_v30 = vmax.f32 %v1096_v21, 0.0  ;;  %v1097_v31 = vadd.f32 %v969_v22, %v449_v16 }
  0x4a   :  { %1351 = vst [vmem:[%s3482_s6 + $0x100] sm:$0xff] %v1223_v20  ;;  %v839_v32 = vmul.f32 %v2155_v7, %v1781_v23  ;;  %v1782_v33 = vunpack.c.h.bf16 %v2043_v11  ;;  %v970_v34 = vadd.f32 %v2161_v10, %v838_v26  ;;  %v451_v35 = vadd.f32 %v2147_v3, %v319_v27  ;;  %v2047_v23 = vld [vmem:[%s3479_s3 + $0xb0] sm:$0xff]  }
  0x4b   :  { %v320_v36 = vmul.f32 %v2142_v1, %v1526_v28  ;;  %v1529_v37 = vunpack.c.l.bf16 %v1981_v24  ;;  %1352 = vst [vmem:[%s3482_s6 + $0x108] sm:$0xff] %v1224_v30  ;;  %v1225_v38 = vmax.f32 %v1097_v31, 0.0  ;;  %v1785_v41 = vunpack.c.l.bf16 %v2044_v29 }
  0x4c   :  { %v971_v39 = vadd.f32 %v2161_v10, %v839_v32  ;;  %v840_v40 = vmul.f32 %v2155_v7, %v1782_v33  ;;  %v1098_v43 = vadd.f32 %v970_v34, %v450_v25  ;;  %v1530_v46 = vunpack.c.h.bf16 %v1981_v24 }
  0x4d   :  { %v452_v44 = vadd.f32 %v2147_v3, %v320_v36  ;;  %v321_v45 = vmul.f32 %v2142_v1, %v1529_v37  ;;  %1353 = vst [vmem:[%s3482_s6 + $0x110] sm:$0xff] %v1225_v38  ;;  %v841_v49 = vmul.f32 %v2155_v7, %v1785_v41  ;;  %v1786_v50 = vunpack.c.h.bf16 %v2044_v29  ;;  %v1985_v36 = vld [vmem:[%s3476_s0 + $0xb8] sm:$0xff]  }
  0x4e   :  { %v1099_v47 = vadd.f32 %v971_v39, %v451_v35  ;;  %v972_v48 = vadd.f32 %v2161_v10, %v840_v40  ;;  %v1226_v52 = vmax.f32 %v1098_v43, 0.0  ;;  %v322_v54 = vmul.f32 %v2142_v1, %v1530_v46  ;;  %v2048_v41 = vld [vmem:[%s3479_s3 + $0xb8] sm:$0xff]  }
  0x4f   :  { %v453_v53 = vadd.f32 %v2147_v3, %v321_v45  ;;  %v1533_v55 = vunpack.c.l.bf16 %v1982_v42  ;;  %v973_v58 = vadd.f32 %v2161_v10, %v841_v49  ;;  %v842_v59 = vmul.f32 %v2155_v7, %v1786_v50 }
  0x50   :  { %v1227_v56 = vmax.f32 %v1099_v47, 0.0  ;;  %v1100_v57 = vadd.f32 %v972_v48, %v452_v44  ;;  %1354 = vst [vmem:[%s3482_s6 + $0x118] sm:$0xff] %v1226_v52  ;;  %v454_v61 = vadd.f32 %v2147_v3, %v322_v54  ;;  %v1789_v63 = vunpack.c.l.bf16 %v2045_v51  ;;  %v1986_v54 = vld [vmem:[%s3476_s0 + $0xc0] sm:$0xff]  }
  0x51   :  { %v323_v62 = vmul.f32 %v2142_v1, %v1533_v55  ;;  %v1534_v0 = vunpack.c.h.bf16 %v1982_v42  ;;  %v1101_v5 = vadd.f32 %v973_v58, %v453_v53  ;;  %v974_v6 = vadd.f32 %v2161_v10, %v842_v59  ;;  %v2049_v59 = vld [vmem:[%s3479_s3 + $0xc0] sm:$0xff]  }
  0x52   :  { %1355 = vst [vmem:[%s3482_s6 + $0x120] sm:$0xff] %v1227_v56  ;;  %v1228_v4 = vmax.f32 %v1100_v57, 0.0  ;;  %v1790_v8 = vunpack.c.h.bf16 %v2045_v51  ;;  %v843_v11 = vmul.f32 %v2155_v7, %v1789_v63  ;;  %v1537_v13 = vunpack.c.l.bf16 %v1983_v60 }
  0x53   :  { %v455_v9 = vadd.f32 %v2147_v3, %v323_v62  ;;  %v324_v12 = vmul.f32 %v2142_v1, %v1534_v0  ;;  %v1229_v14 = vmax.f32 %v1101_v5, 0.0  ;;  %v1102_v15 = vadd.f32 %v974_v6, %v454_v61 }
  0x54   :  { %1356 = vst [vmem:[%s3482_s6 + $0x128] sm:$0xff] %v1228_v4  ;;  %v844_v16 = vmul.f32 %v2155_v7, %v1790_v8  ;;  %v1793_v17 = vunpack.c.l.bf16 %v2046_v2  ;;  %v975_v19 = vadd.f32 %v2161_v10, %v843_v11  ;;  %v325_v21 = vmul.f32 %v2142_v1, %v1537_v13 }
  0x55   :  { %v456_v20 = vadd.f32 %v2147_v3, %v324_v12  ;;  %v1538_v22 = vunpack.c.h.bf16 %v1983_v60  ;;  %1357 = vst [vmem:[%s3482_s6 + $0x130] sm:$0xff] %v1229_v14  ;;  %v1230_v24 = vmax.f32 %v1102_v15, 0.0  ;;  %v1794_v27 = vunpack.c.h.bf16 %v2046_v2  ;;  %v1987_v12 = vld [vmem:[%s3476_s0 + $0xc8] sm:$0xff]  }
  0x56   :  { %v976_v25 = vadd.f32 %v2161_v10, %v844_v16  ;;  %v845_v26 = vmul.f32 %v2155_v7, %v1793_v17  ;;  %v1103_v28 = vadd.f32 %v975_v19, %v455_v9  ;;  %v457_v29 = vadd.f32 %v2147_v3, %v325_v21  ;;  %v2050_v21 = vld [vmem:[%s3479_s3 + $0xc8] sm:$0xff]  }
  0x57   :  { %v326_v30 = vmul.f32 %v2142_v1, %v1538_v22  ;;  %v1541_v31 = vunpack.c.l.bf16 %v1984_v18  ;;  %1358 = vst [vmem:[%s3482_s6 + $0x138] sm:$0xff] %v1230_v24  ;;  %v846_v34 = vmul.f32 %v2155_v7, %v1794_v27  ;;  %v1797_v35 = vunpack.c.l.bf16 %v2047_v23 }
  0x58   :  { %v1104_v32 = vadd.f32 %v976_v25, %v456_v20  ;;  %v977_v33 = vadd.f32 %v2161_v10, %v845_v26  ;;  %v1231_v37 = vmax.f32 %v1103_v28, 0.0  ;;  %v1542_v40 = vunpack.c.h.bf16 %v1984_v18 }
  0x59   :  { %v458_v38 = vadd.f32 %v2147_v3, %v326_v30  ;;  %v327_v39 = vmul.f32 %v2142_v1, %v1541_v31  ;;  %v978_v44 = vadd.f32 %v2161_v10, %v846_v34  ;;  %v847_v45 = vmul.f32 %v2155_v7, %v1797_v35  ;;  %v1988_v30 = vld [vmem:[%s3476_s0 + $0xd0] sm:$0xff]  }
  0x5a   :  { %v1232_v42 = vmax.f32 %v1104_v32, 0.0  ;;  %v1105_v43 = vadd.f32 %v977_v33, %v457_v29  ;;  %1359 = vst [vmem:[%s3482_s6 + $0x140] sm:$0xff] %v1231_v37  ;;  %v328_v47 = vmul.f32 %v2142_v1, %v1542_v40  ;;  %v1798_v48 = vunpack.c.h.bf16 %v2047_v23  ;;  %v2051_v35 = vld [vmem:[%s3479_s3 + $0xd0] sm:$0xff]  }
  0x5b   :  { %v459_v46 = vadd.f32 %v2147_v3, %v327_v39  ;;  %v1545_v49 = vunpack.c.l.bf16 %v1985_v36  ;;  %v1106_v51 = vadd.f32 %v978_v44, %v458_v38  ;;  %v979_v52 = vadd.f32 %v2161_v10, %v847_v45 }
  0x5c   :  { %1360 = vst [vmem:[%s3482_s6 + $0x148] sm:$0xff] %v1232_v42  ;;  %v1233_v50 = vmax.f32 %v1105_v43, 0.0  ;;  %v1801_v53 = vunpack.c.l.bf16 %v2048_v41  ;;  %v460_v55 = vadd.f32 %v2147_v3, %v328_v47  ;;  %v848_v56 = vmul.f32 %v2155_v7, %v1798_v48 }
  0x5d   :  { %v329_v57 = vmul.f32 %v2142_v1, %v1545_v49  ;;  %v1546_v58 = vunpack.c.h.bf16 %v1985_v36  ;;  %v1234_v60 = vmax.f32 %v1106_v51, 0.0  ;;  %v1107_v61 = vadd.f32 %v979_v52, %v459_v46  ;;  %v2679_v49 = vld [vmem:[%s3478_s2] ss:$0 sm:$0xff] }
  0x5e   :  { %1361 = vst [vmem:[%s3482_s6 + $0x150] sm:$0xff] %v1233_v50  ;;  %v849_v62 = vmul.f32 %v2155_v7, %v1801_v53  ;;  %v1802_v63 = vunpack.c.h.bf16 %v2048_v41  ;;  %v980_v0 = vadd.f32 %v2161_v10, %v848_v56  ;;  %v1549_v5 = vunpack.c.l.bf16 %v1986_v54 }
  0x5f   :  { %v461_v2 = vadd.f32 %v2147_v3, %v329_v57  ;;  %v330_v4 = vmul.f32 %v2142_v1, %v1546_v58  ;;  %1362 = vst [vmem:[%s3482_s6 + $0x158] sm:$0xff] %v1234_v60  ;;  %v1235_v6 = vmax.f32 %v1107_v61, 0.0  ;;  %v1805_v11 = vunpack.c.l.bf16 %v2049_v59 }
  0x60   :  { %v981_v8 = vadd.f32 %v2161_v10, %v849_v62  ;;  %v850_v9 = vmul.f32 %v2155_v7, %v1802_v63  ;;  %v1108_v13 = vadd.f32 %v980_v0, %v460_v55  ;;  %v331_v15 = vmul.f32 %v2142_v1, %v1549_v5  ;;  %v2698_v55 = vld [vmem:[%s3480_s4] ss:$0 sm:$0xff] }
  0x61   :  { %v462_v14 = vadd.f32 %v2147_v3, %v330_v4  ;;  %v1550_v16 = vunpack.c.h.bf16 %v1986_v54  ;;  %1363 = vst [vmem:[%s3482_s6 + $0x160] sm:$0xff] %v1235_v6  ;;  %v851_v19 = vmul.f32 %v2155_v7, %v1805_v11  ;;  %v1806_v20 = vunpack.c.h.bf16 %v2049_v59  ;;  %v1990_v4 = vld [vmem:[%s3476_s0 + $0xe0] sm:$0xff]  }
  0x62   :  { %v1109_v17 = vadd.f32 %v981_v8, %v461_v2  ;;  %v982_v18 = vadd.f32 %v2161_v10, %v850_v9  ;;  %v1236_v22 = vmax.f32 %v1108_v13, 0.0  ;;  %v463_v23 = vadd.f32 %v2147_v3, %v331_v15  ;;  %v2053_v11 = vld [vmem:[%s3479_s3 + $0xe0] sm:$0xff]  }
  0x63   :  { %v332_v24 = vmul.f32 %v2142_v1, %v1550_v16  ;;  %v1553_v25 = vunpack.c.l.bf16 %v1987_v12  ;;  %v983_v28 = vadd.f32 %v2161_v10, %v851_v19  ;;  %v852_v29 = vmul.f32 %v2155_v7, %v1806_v20 }
  0x64   :  { %v1237_v26 = vmax.f32 %v1109_v17, 0.0  ;;  %v1110_v27 = vadd.f32 %v982_v18, %v462_v14  ;;  %1364 = vst [vmem:[%s3482_s6 + $0x168] sm:$0xff] %v1236_v22  ;;  %v1809_v33 = vunpack.c.l.bf16 %v2050_v21  ;;  %v1554_v34 = vunpack.c.h.bf16 %v1987_v12 }
  0x65   :  { %v464_v31 = vadd.f32 %v2147_v3, %v332_v24  ;;  %v333_v32 = vmul.f32 %v2142_v1, %v1553_v25  ;;  %v1111_v37 = vadd.f32 %v983_v28, %v463_v23  ;;  %v984_v38 = vadd.f32 %v2161_v10, %v852_v29  ;;  %v2665_v1 = vld [vmem:[%s3477_s1] ss:$0 sm:$0xff]  ;;  %v1991_v24 = vld [vmem:[%s3476_s0 + $0xe8] sm:$0xff]  }
  0x66   :  { %1365 = vst [vmem:[%s3482_s6 + $0x170] sm:$0xff] %v1237_v26  ;;  %v1238_v36 = vmax.f32 %v1110_v27, 0.0  ;;  %v1810_v39 = vunpack.c.h.bf16 %v2050_v21  ;;  %v853_v41 = vmul.f32 %v2155_v7, %v1809_v33  ;;  %v334_v42 = vmul.f32 %v2665_v1, %v1554_v34  ;;  %v2054_v29 = vld [vmem:[%s3479_s3 + $0xe8] sm:$0xff]  }
  0x67   :  { %v465_v40 = vadd.f32 %v2147_v3, %v333_v32  ;;  %v1557_v43 = vunpack.c.l.bf16 %v1988_v30  ;;  %v1239_v44 = vmax.f32 %v1111_v37, 0.0  ;;  %v1112_v45 = vadd.f32 %v984_v38, %v464_v31  ;;  %v1989_v3 = vld [vmem:[%s3476_s0 + $0xd8] sm:$0xff]  }
  0x68   :  { %1366 = vst [vmem:[%s3482_s6 + $0x178] sm:$0xff] %v1238_v36  ;;  %v854_v46 = vmul.f32 %v2155_v7, %v1810_v39  ;;  %v1813_v47 = vunpack.c.l.bf16 %v2051_v35  ;;  %v985_v48 = vadd.f32 %v2161_v10, %v853_v41  ;;  %v466_v50 = vadd.f32 %v2679_v49, %v334_v42  ;;  %v2052_v7 = vld [vmem:[%s3479_s3 + $0xd8] sm:$0xff]   ;;  %v2692_v10 = vld [vmem:[%s3481_s5] ss:$0 sm:$0xff]  ;;  %v1992_v42 = vld [vmem:[%s3476_s0 + $0xf0] sm:$0xff]  }
  0x69   :  { %v335_v51 = vmul.f32 %v2665_v1, %v1557_v43  ;;  %v1558_v52 = vunpack.c.h.bf16 %v1988_v30  ;;  %1367 = vst [vmem:[%s3482_s6 + $0x180] sm:$0xff] %v1239_v44  ;;  %v1240_v53 = vmax.f32 %v1112_v45, 0.0  ;;  %v1814_v57 = vunpack.c.h.bf16 %v2051_v35 }
  0x6a   :  { %v986_v54 = vadd.f32 %v2692_v10, %v854_v46  ;;  %v855_v56 = vmul.f32 %v2698_v55, %v1813_v47  ;;  %v1113_v58 = vadd.f32 %v985_v48, %v465_v40  ;;  %v1561_v61 = vunpack.c.l.bf16 %v1989_v3 }
  0x6b   :  { %v467_v59 = vadd.f32 %v2679_v49, %v335_v51  ;;  %v336_v60 = vmul.f32 %v2665_v1, %v1558_v52  ;;  %1368 = vst [vmem:[%s3482_s6 + $0x188] sm:$0xff] %v1240_v53  ;;  %v856_v0 = vmul.f32 %v2698_v55, %v1814_v57  ;;  %v1817_v2 = vunpack.c.l.bf16 %v2052_v7  ;;  %v2055_v51 = vld [vmem:[%s3479_s3 + $0xf0] sm:$0xff]  }
  0x6c   :  { %v1114_v62 = vadd.f32 %v986_v54, %v466_v50  ;;  %v987_v63 = vadd.f32 %v2692_v10, %v855_v56  ;;  %v1241_v5 = vmax.f32 %v1113_v58, 0.0  ;;  %v337_v8 = vmul.f32 %v2665_v1, %v1561_v61 }
  0x6d   :  { %v468_v6 = vadd.f32 %v2679_v49, %v336_v60  ;;  %v1562_v9 = vunpack.c.h.bf16 %v1989_v3  ;;  %v988_v14 = vadd.f32 %v2692_v10, %v856_v0  ;;  %v857_v15 = vmul.f32 %v2698_v55, %v1817_v2  ;;  %v1993_v60 = vld [vmem:[%s3476_s0 + $0xf8] sm:$0xff]  }
  0x6e   :  { %v1242_v12 = vmax.f32 %v1114_v62, 0.0  ;;  %v1115_v13 = vadd.f32 %v987_v63, %v467_v59  ;;  %1369 = vst [vmem:[%s3482_s6 + $0x190] sm:$0xff] %v1241_v5  ;;  %v469_v16 = vadd.f32 %v2679_v49, %v337_v8  ;;  %v1818_v18 = vunpack.c.h.bf16 %v2052_v7  ;;  %v2056_v2 = vld [vmem:[%s3479_s3 + $0xf8] sm:$0xff]  }
  0x6f   :  { %v338_v17 = vmul.f32 %v2665_v1, %v1562_v9  ;;  %v1565_v19 = vunpack.c.l.bf16 %v1990_v4  ;;  %v1116_v21 = vadd.f32 %v988_v14, %v468_v6  ;;  %v989_v22 = vadd.f32 %v2692_v10, %v857_v15 }
  0x70   :  { %1370 = vst [vmem:[%s3482_s6 + $0x198] sm:$0xff] %v1242_v12  ;;  %v1243_v20 = vmax.f32 %v1115_v13, 0.0  ;;  %v1821_v23 = vunpack.c.l.bf16 %v2053_v11  ;;  %v858_v26 = vmul.f32 %v2698_v55, %v1818_v18  ;;  %v1566_v28 = vunpack.c.h.bf16 %v1990_v4  ;;  %v1994_v18 = vld [vmem:[%s3476_s0 + $0x100] sm:$0xff]  }
  0x71   :  { %v470_v25 = vadd.f32 %v2679_v49, %v338_v17  ;;  %v339_v27 = vmul.f32 %v2665_v1, %v1565_v19  ;;  %v1244_v30 = vmax.f32 %v1116_v21, 0.0  ;;  %v1117_v31 = vadd.f32 %v989_v22, %v469_v16 }
  0x72   :  { %1371 = vst [vmem:[%s3482_s6 + $0x1a0] sm:$0xff] %v1243_v20  ;;  %v859_v32 = vmul.f32 %v2698_v55, %v1821_v23  ;;  %v1822_v33 = vunpack.c.h.bf16 %v2053_v11  ;;  %v990_v34 = vadd.f32 %v2692_v10, %v858_v26  ;;  %v340_v36 = vmul.f32 %v2665_v1, %v1566_v28  ;;  %v2057_v23 = vld [vmem:[%s3479_s3 + $0x100] sm:$0xff]  }
  0x73   :  { %v471_v35 = vadd.f32 %v2679_v49, %v339_v27  ;;  %v1569_v37 = vunpack.c.l.bf16 %v1991_v24  ;;  %1372 = vst [vmem:[%s3482_s6 + $0x1a8] sm:$0xff] %v1244_v30  ;;  %v1245_v38 = vmax.f32 %v1117_v31, 0.0  ;;  %v1825_v41 = vunpack.c.l.bf16 %v2054_v29 }
  0x74   :  { %v991_v39 = vadd.f32 %v2692_v10, %v859_v32  ;;  %v860_v40 = vmul.f32 %v2698_v55, %v1822_v33  ;;  %v1118_v43 = vadd.f32 %v990_v34, %v470_v25  ;;  %v472_v44 = vadd.f32 %v2679_v49, %v340_v36  ;;  %v1995_v36 = vld [vmem:[%s3476_s0 + $0x108] sm:$0xff]  }
  0x75   :  { %v341_v45 = vmul.f32 %v2665_v1, %v1569_v37  ;;  %v1570_v46 = vunpack.c.h.bf16 %v1991_v24  ;;  %1373 = vst [vmem:[%s3482_s6 + $0x1b0] sm:$0xff] %v1245_v38  ;;  %v861_v48 = vmul.f32 %v2698_v55, %v1825_v41  ;;  %v1826_v50 = vunpack.c.h.bf16 %v2054_v29  ;;  %v2058_v41 = vld [vmem:[%s3479_s3 + $0x108] sm:$0xff]  }
  0x76   :  { %v1119_v47 = vadd.f32 %v991_v39, %v471_v35  ;;  %v992_v3 = vadd.f32 %v2692_v10, %v860_v40  ;;  %v1246_v52 = vmax.f32 %v1118_v43, 0.0  ;;  %v1573_v54 = vunpack.c.l.bf16 %v1992_v42 }
  0x77   :  { %v473_v7 = vadd.f32 %v2679_v49, %v341_v45  ;;  %v342_v53 = vmul.f32 %v2665_v1, %v1570_v46  ;;  %v993_v58 = vadd.f32 %v2692_v10, %v861_v48  ;;  %v862_v59 = vmul.f32 %v2698_v55, %v1826_v50 }
  0x78   :  { %v1247_v56 = vmax.f32 %v1119_v47, 0.0  ;;  %v1120_v57 = vadd.f32 %v992_v3, %v472_v44  ;;  %1374 = vst [vmem:[%s3482_s6 + $0x1b8] sm:$0xff] %v1246_v52  ;;  %v343_v62 = vmul.f32 %v2665_v1, %v1573_v54  ;;  %v1829_v63 = vunpack.c.l.bf16 %v2055_v51 }
  0x79   :  { %v474_v61 = vadd.f32 %v2679_v49, %v342_v53  ;;  %v1574_v0 = vunpack.c.h.bf16 %v1992_v42  ;;  %v1121_v5 = vadd.f32 %v993_v58, %v473_v7  ;;  %v994_v6 = vadd.f32 %v2692_v10, %v862_v59  ;;  %v1996_v53 = vld [vmem:[%s3476_s0 + $0x110] sm:$0xff]  }
  0x7a   :  { %1375 = vst [vmem:[%s3482_s6 + $0x1c0] sm:$0xff] %v1247_v56  ;;  %v1248_v4 = vmax.f32 %v1120_v57, 0.0  ;;  %v1830_v8 = vunpack.c.h.bf16 %v2055_v51  ;;  %v475_v9 = vadd.f32 %v2679_v49, %v343_v62  ;;  %v863_v11 = vmul.f32 %v2698_v55, %v1829_v63  ;;  %v2059_v59 = vld [vmem:[%s3479_s3 + $0x110] sm:$0xff]  }
  0x7b   :  { %v344_v12 = vmul.f32 %v2665_v1, %v1574_v0  ;;  %v1577_v13 = vunpack.c.l.bf16 %v1993_v60  ;;  %v1249_v14 = vmax.f32 %v1121_v5, 0.0  ;;  %v1122_v15 = vadd.f32 %v994_v6, %v474_v61 }
  0x7c   :  { %1376 = vst [vmem:[%s3482_s6 + $0x1c8] sm:$0xff] %v1248_v4  ;;  %v864_v16 = vmul.f32 %v2698_v55, %v1830_v8  ;;  %v1833_v17 = vunpack.c.l.bf16 %v2056_v2  ;;  %v995_v19 = vadd.f32 %v2692_v10, %v863_v11  ;;  %v1578_v22 = vunpack.c.h.bf16 %v1993_v60 }
  0x7d   :  { %v476_v20 = vadd.f32 %v2679_v49, %v344_v12  ;;  %v345_v21 = vmul.f32 %v2665_v1, %v1577_v13  ;;  %1377 = vst [vmem:[%s3482_s6 + $0x1d0] sm:$0xff] %v1249_v14  ;;  %v1250_v24 = vmax.f32 %v1122_v15, 0.0  ;;  %v1834_v27 = vunpack.c.h.bf16 %v2056_v2  ;;  %v1997_v12 = vld [vmem:[%s3476_s0 + $0x118] sm:$0xff]  }
  0x7e   :  { %v996_v25 = vadd.f32 %v2692_v10, %v864_v16  ;;  %v865_v26 = vmul.f32 %v2698_v55, %v1833_v17  ;;  %v1123_v28 = vadd.f32 %v995_v19, %v475_v9  ;;  %v346_v30 = vmul.f32 %v2665_v1, %v1578_v22 }
  0x7f   :  { %v477_v29 = vadd.f32 %v2679_v49, %v345_v21  ;;  %v1581_v31 = vunpack.c.l.bf16 %v1994_v18  ;;  %1378 = vst [vmem:[%s3482_s6 + $0x1d8] sm:$0xff] %v1250_v24  ;;  %v866_v34 = vmul.f32 %v2698_v55, %v1834_v27  ;;  %v1837_v35 = vunpack.c.l.bf16 %v2057_v23  ;;  %v2060_v21 = vld [vmem:[%s3479_s3 + $0x118] sm:$0xff]  }
  0x80   :  { %v1124_v32 = vadd.f32 %v996_v25, %v476_v20  ;;  %v997_v33 = vadd.f32 %v2692_v10, %v865_v26  ;;  %v1251_v37 = vmax.f32 %v1123_v28, 0.0  ;;  %v478_v38 = vadd.f32 %v2679_v49, %v346_v30  ;;  %v1998_v30 = vld [vmem:[%s3476_s0 + $0x120] sm:$0xff]  }
  0x81   :  { %v347_v39 = vmul.f32 %v2665_v1, %v1581_v31  ;;  %v1582_v40 = vunpack.c.h.bf16 %v1994_v18  ;;  %v998_v44 = vadd.f32 %v2692_v10, %v866_v34  ;;  %v867_v45 = vmul.f32 %v2698_v55, %v1837_v35  ;;  %v2061_v35 = vld [vmem:[%s3479_s3 + $0x120] sm:$0xff]  }
  0x82   :  { %v1252_v42 = vmax.f32 %v1124_v32, 0.0  ;;  %v1125_v43 = vadd.f32 %v997_v33, %v477_v29  ;;  %1379 = vst [vmem:[%s3482_s6 + $0x1e0] sm:$0xff] %v1251_v37  ;;  %v1838_v3 = vunpack.c.h.bf16 %v2057_v23  ;;  %v1585_v48 = vunpack.c.l.bf16 %v1995_v36 }
  0x83   :  { %v479_v46 = vadd.f32 %v2679_v49, %v347_v39  ;;  %v348_v47 = vmul.f32 %v2665_v1, %v1582_v40  ;;  %v1126_v51 = vadd.f32 %v998_v44, %v478_v38  ;;  %v999_v52 = vadd.f32 %v2692_v10, %v867_v45 }
  0x84   :  { %1380 = vst [vmem:[%s3482_s6 + $0x1e8] sm:$0xff] %v1252_v42  ;;  %v1253_v50 = vmax.f32 %v1125_v43, 0.0  ;;  %v1841_v7 = vunpack.c.l.bf16 %v2058_v41  ;;  %v868_v56 = vmul.f32 %v2698_v55, %v1838_v3  ;;  %v349_v57 = vmul.f32 %v2665_v1, %v1585_v48  ;;  %v1999_v3 = vld [vmem:[%s3476_s0 + $0x128] sm:$0xff]  }
  0x85   :  { %v480_v54 = vadd.f32 %v2679_v49, %v348_v47  ;;  %v1586_v58 = vunpack.c.h.bf16 %v1995_v36  ;;  %v1254_v60 = vmax.f32 %v1126_v51, 0.0  ;;  %v1127_v61 = vadd.f32 %v999_v52, %v479_v46 }
  0x86   :  { %1381 = vst [vmem:[%s3482_s6 + $0x1f0] sm:$0xff] %v1253_v50  ;;  %v869_v62 = vmul.f32 %v2698_v55, %v1841_v7  ;;  %v1842_v63 = vunpack.c.h.bf16 %v2058_v41  ;;  %v1000_v0 = vadd.f32 %v2692_v10, %v868_v56  ;;  %v481_v2 = vadd.f32 %v2679_v49, %v349_v57  ;;  %v2062_v7 = vld [vmem:[%s3479_s3 + $0x128] sm:$0xff]  }
  0x87   :  { %v350_v4 = vmul.f32 %v2665_v1, %v1586_v58  ;;  %v1589_v5 = vunpack.c.l.bf16 %v1996_v53  ;;  %1382 = vst [vmem:[%s3482_s6 + $0x1f8] sm:$0xff] %v1254_v60  ;;  %v1255_v6 = vmax.f32 %v1127_v61, 0.0  ;;  %v1845_v11 = vunpack.c.l.bf16 %v2059_v59 }
  0x88   :  { %v1001_v8 = vadd.f32 %v2692_v10, %v869_v62  ;;  %v870_v9 = vmul.f32 %v2698_v55, %v1842_v63  ;;  %v1128_v13 = vadd.f32 %v1000_v0, %v480_v54  ;;  %v1590_v16 = vunpack.c.h.bf16 %v1996_v53 }
  0x89   :  { %v482_v14 = vadd.f32 %v2679_v49, %v350_v4  ;;  %v351_v15 = vmul.f32 %v2665_v1, %v1589_v5  ;;  %1383 = vst [vmem:[%s3482_s6 + $0x200] sm:$0xff] %v1255_v6  ;;  %v871_v19 = vmul.f32 %v2698_v55, %v1845_v11  ;;  %v1846_v20 = vunpack.c.h.bf16 %v2059_v59  ;;  %v2000_v4 = vld [vmem:[%s3476_s0 + $0x130] sm:$0xff]  }
  0x8a   :  { %v1129_v17 = vadd.f32 %v1001_v8, %v481_v2  ;;  %v1002_v18 = vadd.f32 %v2692_v10, %v870_v9  ;;  %v1256_v22 = vmax.f32 %v1128_v13, 0.0  ;;  %v352_v24 = vmul.f32 %v2665_v1, %v1590_v16  ;;  %v2063_v11 = vld [vmem:[%s3479_s3 + $0x130] sm:$0xff]  }
  0x8b   :  { %v483_v23 = vadd.f32 %v2679_v49, %v351_v15  ;;  %v1593_v25 = vunpack.c.l.bf16 %v1997_v12  ;;  %v1003_v28 = vadd.f32 %v2692_v10, %v871_v19  ;;  %v872_v29 = vmul.f32 %v2698_v55, %v1846_v20 }
  0x8c   :  { %v1257_v26 = vmax.f32 %v1129_v17, 0.0  ;;  %v1130_v27 = vadd.f32 %v1002_v18, %v482_v14  ;;  %1384 = vst [vmem:[%s3482_s6 + $0x208] sm:$0xff] %v1256_v22  ;;  %v484_v31 = vadd.f32 %v2679_v49, %v352_v24  ;;  %v1849_v33 = vunpack.c.l.bf16 %v2060_v21  ;;  %v2001_v24 = vld [vmem:[%s3476_s0 + $0x138] sm:$0xff]  }
  0x8d   :  { %v353_v32 = vmul.f32 %v2665_v1, %v1593_v25  ;;  %v1594_v34 = vunpack.c.h.bf16 %v1997_v12  ;;  %v1131_v37 = vadd.f32 %v1003_v28, %v483_v23  ;;  %v1004_v38 = vadd.f32 %v2692_v10, %v872_v29  ;;  %v2064_v29 = vld [vmem:[%s3479_s3 + $0x138] sm:$0xff]  }
  0x8e   :  { %1385 = vst [vmem:[%s3482_s6 + $0x210] sm:$0xff] %v1257_v26  ;;  %v1258_v36 = vmax.f32 %v1130_v27, 0.0  ;;  %v1850_v39 = vunpack.c.h.bf16 %v2060_v21  ;;  %v873_v41 = vmul.f32 %v2698_v55, %v1849_v33  ;;  %v1597_v43 = vunpack.c.l.bf16 %v1998_v30 }
  0x8f   :  { %v485_v40 = vadd.f32 %v2679_v49, %v353_v32  ;;  %v354_v42 = vmul.f32 %v2665_v1, %v1594_v34  ;;  %v1259_v44 = vmax.f32 %v1131_v37, 0.0  ;;  %v1132_v45 = vadd.f32 %v1004_v38, %v484_v31 }
  0x90   :  { %1386 = vst [vmem:[%s3482_s6 + $0x218] sm:$0xff] %v1258_v36  ;;  %v874_v46 = vmul.f32 %v2698_v55, %v1850_v39  ;;  %v1853_v47 = vunpack.c.l.bf16 %v2061_v35  ;;  %v1005_v48 = vadd.f32 %v2692_v10, %v873_v41  ;;  %v355_v51 = vmul.f32 %v2665_v1, %v1597_v43 }
  0x91   :  { %v486_v50 = vadd.f32 %v2679_v49, %v354_v42  ;;  %v1598_v52 = vunpack.c.h.bf16 %v1998_v30  ;;  %1387 = vst [vmem:[%s3482_s6 + $0x220] sm:$0xff] %v1259_v44  ;;  %v1260_v53 = vmax.f32 %v1132_v45, 0.0  ;;  %v1854_v57 = vunpack.c.h.bf16 %v2061_v35  ;;  %v2002_v42 = vld [vmem:[%s3476_s0 + $0x140] sm:$0xff]  }
  0x92   :  { %v1006_v54 = vadd.f32 %v2692_v10, %v874_v46  ;;  %v875_v56 = vmul.f32 %v2698_v55, %v1853_v47  ;;  %v1133_v58 = vadd.f32 %v1005_v48, %v485_v40  ;;  %v487_v59 = vadd.f32 %v2679_v49, %v355_v51  ;;  %v2065_v51 = vld [vmem:[%s3479_s3 + $0x140] sm:$0xff]  }
  0x93   :  { %v356_v60 = vmul.f32 %v2665_v1, %v1598_v52  ;;  %v1601_v61 = vunpack.c.l.bf16 %v1999_v3  ;;  %1388 = vst [vmem:[%s3482_s6 + $0x228] sm:$0xff] %v1260_v53  ;;  %v876_v0 = vmul.f32 %v2698_v55, %v1854_v57  ;;  %v1857_v2 = vunpack.c.l.bf16 %v2062_v7 }
  0x94   :  { %v1134_v62 = vadd.f32 %v1006_v54, %v486_v50  ;;  %v1007_v63 = vadd.f32 %v2692_v10, %v875_v56  ;;  %v1261_v5 = vmax.f32 %v1133_v58, 0.0  ;;  %v1602_v9 = vunpack.c.h.bf16 %v1999_v3 }
  0x95   :  { %v488_v6 = vadd.f32 %v2679_v49, %v356_v60  ;;  %v357_v8 = vmul.f32 %v2665_v1, %v1601_v61  ;;  %v1008_v14 = vadd.f32 %v2692_v10, %v876_v0  ;;  %v877_v15 = vmul.f32 %v2698_v55, %v1857_v2  ;;  %v2003_v60 = vld [vmem:[%s3476_s0 + $0x148] sm:$0xff]  }
  0x96   :  { %v1262_v12 = vmax.f32 %v1134_v62, 0.0  ;;  %v1135_v13 = vadd.f32 %v1007_v63, %v487_v59  ;;  %1389 = vst [vmem:[%s3482_s6 + $0x230] sm:$0xff] %v1261_v5  ;;  %v358_v17 = vmul.f32 %v2665_v1, %v1602_v9  ;;  %v1858_v18 = vunpack.c.h.bf16 %v2062_v7  ;;  %v2066_v2 = vld [vmem:[%s3479_s3 + $0x148] sm:$0xff]  }
  0x97   :  { %v489_v16 = vadd.f32 %v2679_v49, %v357_v8  ;;  %v1605_v19 = vunpack.c.l.bf16 %v2000_v4  ;;  %v1136_v21 = vadd.f32 %v1008_v14, %v488_v6  ;;  %v1009_v22 = vadd.f32 %v2692_v10, %v877_v15 }
  0x98   :  { %1390 = vst [vmem:[%s3482_s6 + $0x238] sm:$0xff] %v1262_v12  ;;  %v1263_v20 = vmax.f32 %v1135_v13, 0.0  ;;  %v1861_v23 = vunpack.c.l.bf16 %v2063_v11  ;;  %v490_v25 = vadd.f32 %v2679_v49, %v358_v17  ;;  %v878_v26 = vmul.f32 %v2698_v55, %v1858_v18  ;;  %v2004_v18 = vld [vmem:[%s3476_s0 + $0x150] sm:$0xff]  }
  0x99   :  { %v359_v27 = vmul.f32 %v2665_v1, %v1605_v19  ;;  %v1606_v28 = vunpack.c.h.bf16 %v2000_v4  ;;  %v1264_v30 = vmax.f32 %v1136_v21, 0.0  ;;  %v1137_v31 = vadd.f32 %v1009_v22, %v489_v16 }
  0x9a   :  { %1391 = vst [vmem:[%s3482_s6 + $0x240] sm:$0xff] %v1263_v20  ;;  %v879_v32 = vmul.f32 %v2698_v55, %v1861_v23  ;;  %v1862_v33 = vunpack.c.h.bf16 %v2063_v11  ;;  %v1010_v34 = vadd.f32 %v2692_v10, %v878_v26  ;;  %v1609_v37 = vunpack.c.l.bf16 %v2001_v24  ;;  %v2067_v23 = vld [vmem:[%s3479_s3 + $0x150] sm:$0xff]  }
  0x9b   :  { %v491_v35 = vadd.f32 %v2679_v49, %v359_v27  ;;  %v360_v36 = vmul.f32 %v2665_v1, %v1606_v28  ;;  %1392 = vst [vmem:[%s3482_s6 + $0x248] sm:$0xff] %v1264_v30  ;;  %v1265_v38 = vmax.f32 %v1137_v31, 0.0  ;;  %v1865_v41 = vunpack.c.l.bf16 %v2064_v29 }
  0x9c   :  { %v1011_v39 = vadd.f32 %v2692_v10, %v879_v32  ;;  %v880_v40 = vmul.f32 %v2698_v55, %v1862_v33  ;;  %v1138_v43 = vadd.f32 %v1010_v34, %v490_v25  ;;  %v361_v45 = vmul.f32 %v2665_v1, %v1609_v37 }
  0x9d   :  { %v492_v44 = vadd.f32 %v2679_v49, %v360_v36  ;;  %v1610_v46 = vunpack.c.h.bf16 %v2001_v24  ;;  %1393 = vst [vmem:[%s3482_s6 + $0x250] sm:$0xff] %v1265_v38  ;;  %v881_v48 = vmul.f32 %v2698_v55, %v1865_v41  ;;  %v1866_v50 = vunpack.c.h.bf16 %v2064_v29  ;;  %v2005_v36 = vld [vmem:[%s3476_s0 + $0x158] sm:$0xff]  }
  0x9e   :  { %v1139_v47 = vadd.f32 %v1011_v39, %v491_v35  ;;  %v1012_v3 = vadd.f32 %v2692_v10, %v880_v40  ;;  %v1266_v52 = vmax.f32 %v1138_v43, 0.0  ;;  %v493_v7 = vadd.f32 %v2679_v49, %v361_v45  ;;  %v2068_v41 = vld [vmem:[%s3479_s3 + $0x158] sm:$0xff]  }
  0x9f   :  { %v362_v53 = vmul.f32 %v2665_v1, %v1610_v46  ;;  %v1613_v54 = vunpack.c.l.bf16 %v2002_v42  ;;  %v1013_v58 = vadd.f32 %v2692_v10, %v881_v48  ;;  %v882_v59 = vmul.f32 %v2698_v55, %v1866_v50 }
  0xa0   :  { %v1267_v56 = vmax.f32 %v1139_v47, 0.0  ;;  %v1140_v57 = vadd.f32 %v1012_v3, %v492_v44  ;;  %1394 = vst [vmem:[%s3482_s6 + $0x258] sm:$0xff] %v1266_v52  ;;  %v1869_v63 = vunpack.c.l.bf16 %v2065_v51  ;;  %v1614_v0 = vunpack.c.h.bf16 %v2002_v42 }
  0xa1   :  { %v494_v61 = vadd.f32 %v2679_v49, %v362_v53  ;;  %v363_v62 = vmul.f32 %v2665_v1, %v1613_v54  ;;  %v1141_v5 = vadd.f32 %v1013_v58, %v493_v7  ;;  %v1014_v6 = vadd.f32 %v2692_v10, %v882_v59  ;;  %v2006_v53 = vld [vmem:[%s3476_s0 + $0x160] sm:$0xff]  }
  0xa2   :  { %1395 = vst [vmem:[%s3482_s6 + $0x260] sm:$0xff] %v1267_v56  ;;  %v1268_v4 = vmax.f32 %v1140_v57, 0.0  ;;  %v1870_v8 = vunpack.c.h.bf16 %v2065_v51  ;;  %v883_v11 = vmul.f32 %v2698_v55, %v1869_v63  ;;  %v364_v12 = vmul.f32 %v2665_v1, %v1614_v0  ;;  %v2069_v59 = vld [vmem:[%s3479_s3 + $0x160] sm:$0xff]  }
  0xa3   :  { %v495_v9 = vadd.f32 %v2679_v49, %v363_v62  ;;  %v1617_v13 = vunpack.c.l.bf16 %v2003_v60  ;;  %v1269_v14 = vmax.f32 %v1141_v5, 0.0  ;;  %v1142_v15 = vadd.f32 %v1014_v6, %v494_v61 }
  0xa4   :  { %1396 = vst [vmem:[%s3482_s6 + $0x268] sm:$0xff] %v1268_v4  ;;  %v884_v16 = vmul.f32 %v2698_v55, %v1870_v8  ;;  %v1873_v17 = vunpack.c.l.bf16 %v2066_v2  ;;  %v1015_v19 = vadd.f32 %v2692_v10, %v883_v11  ;;  %v496_v20 = vadd.f32 %v2679_v49, %v364_v12  ;;  %v2007_v12 = vld [vmem:[%s3476_s0 + $0x168] sm:$0xff]  }
  0xa5   :  { %v365_v21 = vmul.f32 %v2665_v1, %v1617_v13  ;;  %v1618_v22 = vunpack.c.h.bf16 %v2003_v60  ;;  %1397 = vst [vmem:[%s3482_s6 + $0x270] sm:$0xff] %v1269_v14  ;;  %v1270_v24 = vmax.f32 %v1142_v15, 0.0  ;;  %v1874_v27 = vunpack.c.h.bf16 %v2066_v2 }
  0xa6   :  { %v1016_v25 = vadd.f32 %v2692_v10, %v884_v16  ;;  %v885_v26 = vmul.f32 %v2698_v55, %v1873_v17  ;;  %v1143_v28 = vadd.f32 %v1015_v19, %v495_v9  ;;  %v1621_v31 = vunpack.c.l.bf16 %v2004_v18 }
  0xa7   :  { %v497_v29 = vadd.f32 %v2679_v49, %v365_v21  ;;  %v366_v30 = vmul.f32 %v2665_v1, %v1618_v22  ;;  %1398 = vst [vmem:[%s3482_s6 + $0x278] sm:$0xff] %v1270_v24  ;;  %v886_v34 = vmul.f32 %v2698_v55, %v1874_v27  ;;  %v1877_v35 = vunpack.c.l.bf16 %v2067_v23  ;;  %v2070_v21 = vld [vmem:[%s3479_s3 + $0x168] sm:$0xff]  }
  0xa8   :  { %v1144_v32 = vadd.f32 %v1016_v25, %v496_v20  ;;  %v1017_v33 = vadd.f32 %v2692_v10, %v885_v26  ;;  %v1271_v37 = vmax.f32 %v1143_v28, 0.0  ;;  %v367_v39 = vmul.f32 %v2665_v1, %v1621_v31 }
  0xa9   :  { %v498_v38 = vadd.f32 %v2679_v49, %v366_v30  ;;  %v1622_v40 = vunpack.c.h.bf16 %v2004_v18  ;;  %v1018_v44 = vadd.f32 %v2692_v10, %v886_v34  ;;  %v887_v45 = vmul.f32 %v2698_v55, %v1877_v35  ;;  %v2008_v30 = vld [vmem:[%s3476_s0 + $0x170] sm:$0xff]  }
  0xaa   :  { %v1272_v42 = vmax.f32 %v1144_v32, 0.0  ;;  %v1145_v43 = vadd.f32 %v1017_v33, %v497_v29  ;;  %1399 = vst [vmem:[%s3482_s6 + $0x280] sm:$0xff] %v1271_v37  ;;  %v499_v46 = vadd.f32 %v2679_v49, %v367_v39  ;;  %v1878_v3 = vunpack.c.h.bf16 %v2067_v23  ;;  %v2071_v35 = vld [vmem:[%s3479_s3 + $0x170] sm:$0xff]  }
  0xab   :  { %v368_v47 = vmul.f32 %v2665_v1, %v1622_v40  ;;  %v1625_v48 = vunpack.c.l.bf16 %v2005_v36  ;;  %v1146_v51 = vadd.f32 %v1018_v44, %v498_v38  ;;  %v1019_v52 = vadd.f32 %v2692_v10, %v887_v45 }
  0xac   :  { %1400 = vst [vmem:[%s3482_s6 + $0x288] sm:$0xff] %v1272_v42  ;;  %v1273_v50 = vmax.f32 %v1145_v43, 0.0  ;;  %v1881_v7 = vunpack.c.l.bf16 %v2068_v41  ;;  %v888_v56 = vmul.f32 %v2698_v55, %v1878_v3  ;;  %v1626_v58 = vunpack.c.h.bf16 %v2005_v36  ;;  %v2009_v3 = vld [vmem:[%s3476_s0 + $0x178] sm:$0xff]  }
  0xad   :  { %v500_v54 = vadd.f32 %v2679_v49, %v368_v47  ;;  %v369_v57 = vmul.f32 %v2665_v1, %v1625_v48  ;;  %v1274_v60 = vmax.f32 %v1146_v51, 0.0  ;;  %v1147_v61 = vadd.f32 %v1019_v52, %v499_v46 }
  0xae   :  { %1401 = vst [vmem:[%s3482_s6 + $0x290] sm:$0xff] %v1273_v50  ;;  %v889_v62 = vmul.f32 %v2698_v55, %v1881_v7  ;;  %v1882_v63 = vunpack.c.h.bf16 %v2068_v41  ;;  %v1020_v0 = vadd.f32 %v2692_v10, %v888_v56  ;;  %v370_v4 = vmul.f32 %v2665_v1, %v1626_v58  ;;  %v2072_v7 = vld [vmem:[%s3479_s3 + $0x178] sm:$0xff]  }
  0xaf   :  { %v501_v2 = vadd.f32 %v2679_v49, %v369_v57  ;;  %v1629_v5 = vunpack.c.l.bf16 %v2006_v53  ;;  %1402 = vst [vmem:[%s3482_s6 + $0x298] sm:$0xff] %v1274_v60  ;;  %v1275_v6 = vmax.f32 %v1147_v61, 0.0  ;;  %v1885_v11 = vunpack.c.l.bf16 %v2069_v59 }
  0xb0   :  { %v1021_v8 = vadd.f32 %v2692_v10, %v889_v62  ;;  %v890_v9 = vmul.f32 %v2698_v55, %v1882_v63  ;;  %v1148_v13 = vadd.f32 %v1020_v0, %v500_v54  ;;  %v502_v14 = vadd.f32 %v2679_v49, %v370_v4  ;;  %v2010_v4 = vld [vmem:[%s3476_s0 + $0x180] sm:$0xff]  }
  0xb1   :  { %v371_v15 = vmul.f32 %v2665_v1, %v1629_v5  ;;  %v1630_v16 = vunpack.c.h.bf16 %v2006_v53  ;;  %1403 = vst [vmem:[%s3482_s6 + $0x2a0] sm:$0xff] %v1275_v6  ;;  %v891_v19 = vmul.f32 %v2698_v55, %v1885_v11  ;;  %v1886_v20 = vunpack.c.h.bf16 %v2069_v59  ;;  %v2073_v11 = vld [vmem:[%s3479_s3 + $0x180] sm:$0xff]  }
  0xb2   :  { %v1149_v17 = vadd.f32 %v1021_v8, %v501_v2  ;;  %v1022_v18 = vadd.f32 %v2692_v10, %v890_v9  ;;  %v1276_v22 = vmax.f32 %v1148_v13, 0.0  ;;  %v1633_v25 = vunpack.c.l.bf16 %v2007_v12 }
  0xb3   :  { %v503_v23 = vadd.f32 %v2679_v49, %v371_v15  ;;  %v372_v24 = vmul.f32 %v2665_v1, %v1630_v16  ;;  %v1023_v28 = vadd.f32 %v2692_v10, %v891_v19  ;;  %v892_v29 = vmul.f32 %v2698_v55, %v1886_v20 }
  0xb4   :  { %v1277_v26 = vmax.f32 %v1149_v17, 0.0  ;;  %v1150_v27 = vadd.f32 %v1022_v18, %v502_v14  ;;  %1404 = vst [vmem:[%s3482_s6 + $0x2a8] sm:$0xff] %v1276_v22  ;;  %v373_v32 = vmul.f32 %v2665_v1, %v1633_v25  ;;  %v1889_v33 = vunpack.c.l.bf16 %v2070_v21 }
  0xb5   :  { %v504_v31 = vadd.f32 %v2679_v49, %v372_v24  ;;  %v1634_v34 = vunpack.c.h.bf16 %v2007_v12  ;;  %v1151_v37 = vadd.f32 %v1023_v28, %v503_v23  ;;  %v1024_v38 = vadd.f32 %v2692_v10, %v892_v29  ;;  %v2011_v24 = vld [vmem:[%s3476_s0 + $0x188] sm:$0xff]  }
  0xb6   :  { %1405 = vst [vmem:[%s3482_s6 + $0x2b0] sm:$0xff] %v1277_v26  ;;  %v1278_v36 = vmax.f32 %v1150_v27, 0.0  ;;  %v1890_v39 = vunpack.c.h.bf16 %v2070_v21  ;;  %v505_v40 = vadd.f32 %v2679_v49, %v373_v32  ;;  %v893_v41 = vmul.f32 %v2698_v55, %v1889_v33  ;;  %v2074_v29 = vld [vmem:[%s3479_s3 + $0x188] sm:$0xff]  }
  0xb7   :  { %v374_v42 = vmul.f32 %v2665_v1, %v1634_v34  ;;  %v1637_v43 = vunpack.c.l.bf16 %v2008_v30  ;;  %v1279_v44 = vmax.f32 %v1151_v37, 0.0  ;;  %v1152_v45 = vadd.f32 %v1024_v38, %v504_v31 }
  0xb8   :  { %1406 = vst [vmem:[%s3482_s6 + $0x2b8] sm:$0xff] %v1278_v36  ;;  %v894_v46 = vmul.f32 %v2698_v55, %v1890_v39  ;;  %v1893_v47 = vunpack.c.l.bf16 %v2071_v35  ;;  %v1025_v48 = vadd.f32 %v2692_v10, %v893_v41  ;;  %v1638_v52 = vunpack.c.h.bf16 %v2008_v30 }
  0xb9   :  { %v506_v50 = vadd.f32 %v2679_v49, %v374_v42  ;;  %v375_v51 = vmul.f32 %v2665_v1, %v1637_v43  ;;  %1407 = vst [vmem:[%s3482_s6 + $0x2c0] sm:$0xff] %v1279_v44  ;;  %v1280_v53 = vmax.f32 %v1152_v45, 0.0  ;;  %v1894_v57 = vunpack.c.h.bf16 %v2071_v35  ;;  %v2012_v42 = vld [vmem:[%s3476_s0 + $0x190] sm:$0xff]  }
  0xba   :  { %v1026_v54 = vadd.f32 %v2692_v10, %v894_v46  ;;  %v895_v56 = vmul.f32 %v2698_v55, %v1893_v47  ;;  %v1153_v58 = vadd.f32 %v1025_v48, %v505_v40  ;;  %v376_v60 = vmul.f32 %v2665_v1, %v1638_v52 }
  0xbb   :  { %v507_v59 = vadd.f32 %v2679_v49, %v375_v51  ;;  %v1641_v61 = vunpack.c.l.bf16 %v2009_v3  ;;  %1408 = vst [vmem:[%s3482_s6 + $0x2c8] sm:$0xff] %v1280_v53  ;;  %v896_v0 = vmul.f32 %v2698_v55, %v1894_v57  ;;  %v1897_v2 = vunpack.c.l.bf16 %v2072_v7  ;;  %v2075_v51 = vld [vmem:[%s3479_s3 + $0x190] sm:$0xff]  }
  0xbc   :  { %v1154_v62 = vadd.f32 %v1026_v54, %v506_v50  ;;  %v1027_v63 = vadd.f32 %v2692_v10, %v895_v56  ;;  %v1281_v5 = vmax.f32 %v1153_v58, 0.0  ;;  %v508_v6 = vadd.f32 %v2679_v49, %v376_v60  ;;  %v2013_v60 = vld [vmem:[%s3476_s0 + $0x198] sm:$0xff]  }
  0xbd   :  { %v377_v8 = vmul.f32 %v2665_v1, %v1641_v61  ;;  %v1642_v9 = vunpack.c.h.bf16 %v2009_v3  ;;  %v1028_v14 = vadd.f32 %v2692_v10, %v896_v0  ;;  %v897_v15 = vmul.f32 %v2698_v55, %v1897_v2  ;;  %v2076_v2 = vld [vmem:[%s3479_s3 + $0x198] sm:$0xff]  }
  0xbe   :  { %v1282_v12 = vmax.f32 %v1154_v62, 0.0  ;;  %v1155_v13 = vadd.f32 %v1027_v63, %v507_v59  ;;  %1409 = vst [vmem:[%s3482_s6 + $0x2d0] sm:$0xff] %v1281_v5  ;;  %v1898_v18 = vunpack.c.h.bf16 %v2072_v7  ;;  %v1645_v19 = vunpack.c.l.bf16 %v2010_v4 }
  0xbf   :  { %v509_v16 = vadd.f32 %v2679_v49, %v377_v8  ;;  %v378_v17 = vmul.f32 %v2665_v1, %v1642_v9  ;;  %v1156_v21 = vadd.f32 %v1028_v14, %v508_v6  ;;  %v1029_v22 = vadd.f32 %v2692_v10, %v897_v15 }
  0xc0   :  { %1410 = vst [vmem:[%s3482_s6 + $0x2d8] sm:$0xff] %v1282_v12  ;;  %v1283_v20 = vmax.f32 %v1155_v13, 0.0  ;;  %v1901_v23 = vunpack.c.l.bf16 %v2073_v11  ;;  %v898_v26 = vmul.f32 %v2698_v55, %v1898_v18  ;;  %v379_v27 = vmul.f32 %v2665_v1, %v1645_v19  ;;  %v2014_v18 = vld [vmem:[%s3476_s0 + $0x1a0] sm:$0xff]  }
  0xc1   :  { %v510_v25 = vadd.f32 %v2679_v49, %v378_v17  ;;  %v1646_v28 = vunpack.c.h.bf16 %v2010_v4  ;;  %v1284_v30 = vmax.f32 %v1156_v21, 0.0  ;;  %v1157_v31 = vadd.f32 %v1029_v22, %v509_v16 }
  0xc2   :  { %1411 = vst [vmem:[%s3482_s6 + $0x2e0] sm:$0xff] %v1283_v20  ;;  %v899_v32 = vmul.f32 %v2698_v55, %v1901_v23  ;;  %v1902_v33 = vunpack.c.h.bf16 %v2073_v11  ;;  %v1030_v34 = vadd.f32 %v2692_v10, %v898_v26  ;;  %v511_v35 = vadd.f32 %v2679_v49, %v379_v27  ;;  %v2077_v23 = vld [vmem:[%s3479_s3 + $0x1a0] sm:$0xff]  }
  0xc3   :  { %v380_v36 = vmul.f32 %v2665_v1, %v1646_v28  ;;  %v1649_v37 = vunpack.c.l.bf16 %v2011_v24  ;;  %1412 = vst [vmem:[%s3482_s6 + $0x2e8] sm:$0xff] %v1284_v30  ;;  %v1285_v38 = vmax.f32 %v1157_v31, 0.0  ;;  %v1905_v41 = vunpack.c.l.bf16 %v2074_v29 }
  0xc4   :  { %v1031_v39 = vadd.f32 %v2692_v10, %v899_v32  ;;  %v900_v40 = vmul.f32 %v2698_v55, %v1902_v33  ;;  %v1158_v43 = vadd.f32 %v1030_v34, %v510_v25  ;;  %v1650_v46 = vunpack.c.h.bf16 %v2011_v24 }
  0xc5   :  { %v512_v44 = vadd.f32 %v2679_v49, %v380_v36  ;;  %v381_v45 = vmul.f32 %v2665_v1, %v1649_v37  ;;  %1413 = vst [vmem:[%s3482_s6 + $0x2f0] sm:$0xff] %v1285_v38  ;;  %v901_v48 = vmul.f32 %v2698_v55, %v1905_v41  ;;  %v1906_v50 = vunpack.c.h.bf16 %v2074_v29  ;;  %v3219_v37 = vld [vmem:[%s3478_s2] ss:$0 sm:$0xff] }
  0xc6   :  { %v1159_v47 = vadd.f32 %v1031_v39, %v511_v35  ;;  %v1032_v3 = vadd.f32 %v2692_v10, %v900_v40  ;;  %v1286_v52 = vmax.f32 %v1158_v43, 0.0  ;;  %v382_v53 = vmul.f32 %v2665_v1, %v1650_v46 }
  0xc7   :  { %v513_v7 = vadd.f32 %v2679_v49, %v381_v45  ;;  %v1653_v54 = vunpack.c.l.bf16 %v2012_v42  ;;  %v1033_v58 = vadd.f32 %v2692_v10, %v901_v48  ;;  %v902_v59 = vmul.f32 %v2698_v55, %v1906_v50 }
  0xc8   :  { %v1287_v56 = vmax.f32 %v1159_v47, 0.0  ;;  %v1160_v57 = vadd.f32 %v1032_v3, %v512_v44  ;;  %1414 = vst [vmem:[%s3482_s6 + $0x2f8] sm:$0xff] %v1286_v52  ;;  %v514_v61 = vadd.f32 %v2679_v49, %v382_v53  ;;  %v1909_v63 = vunpack.c.l.bf16 %v2075_v51  ;;  %v3235_v44 = vld [vmem:[%s3480_s4] ss:$0 sm:$0xff]  ;;  %v2016_v53 = vld [vmem:[%s3476_s0 + $0x1b0] sm:$0xff]  }
  0xc9   :  { %v383_v62 = vmul.f32 %v2665_v1, %v1653_v54  ;;  %v1654_v0 = vunpack.c.h.bf16 %v2012_v42  ;;  %v1161_v5 = vadd.f32 %v1033_v58, %v513_v7  ;;  %v1034_v6 = vadd.f32 %v2692_v10, %v902_v59  ;;  %v3229_v42 = vld [vmem:[%s3481_s5] ss:$0 sm:$0xff]  ;;  %v2079_v59 = vld [vmem:[%s3479_s3 + $0x1b0] sm:$0xff]  }
  0xca   :  { %1415 = vst [vmem:[%s3482_s6 + $0x300] sm:$0xff] %v1287_v56  ;;  %v1288_v4 = vmax.f32 %v1160_v57, 0.0  ;;  %v1910_v8 = vunpack.c.h.bf16 %v2075_v51  ;;  %v903_v11 = vmul.f32 %v2698_v55, %v1909_v63  ;;  %v1657_v13 = vunpack.c.l.bf16 %v2013_v60 }
  0xcb   :  { %v515_v9 = vadd.f32 %v2679_v49, %v383_v62  ;;  %v384_v12 = vmul.f32 %v2665_v1, %v1654_v0  ;;  %v1289_v14 = vmax.f32 %v1161_v5, 0.0  ;;  %v1162_v15 = vadd.f32 %v1034_v6, %v514_v61 }
  0xcc   :  { %1416 = vst [vmem:[%s3482_s6 + $0x308] sm:$0xff] %v1288_v4  ;;  %v904_v16 = vmul.f32 %v2698_v55, %v1910_v8  ;;  %v1913_v17 = vunpack.c.l.bf16 %v2076_v2  ;;  %v1035_v19 = vadd.f32 %v2692_v10, %v903_v11  ;;  %v385_v21 = vmul.f32 %v2665_v1, %v1657_v13  ;;  %v3205_v1 = vld [vmem:[%s3477_s1] ss:$0 sm:$0xff] }
  0xcd   :  { %v516_v20 = vadd.f32 %v2679_v49, %v384_v12  ;;  %v1658_v22 = vunpack.c.h.bf16 %v2013_v60  ;;  %1417 = vst [vmem:[%s3482_s6 + $0x310] sm:$0xff] %v1289_v14  ;;  %v1290_v24 = vmax.f32 %v1162_v15, 0.0  ;;  %v1914_v27 = vunpack.c.h.bf16 %v2076_v2  ;;  %v2017_v12 = vld [vmem:[%s3476_s0 + $0x1b8] sm:$0xff]  }
  0xce   :  { %v1036_v25 = vadd.f32 %v2692_v10, %v904_v16  ;;  %v905_v26 = vmul.f32 %v2698_v55, %v1913_v17  ;;  %v1163_v28 = vadd.f32 %v1035_v19, %v515_v9  ;;  %v517_v29 = vadd.f32 %v2679_v49, %v385_v21  ;;  %v2015_v49 = vld [vmem:[%s3476_s0 + $0x1a8] sm:$0xff]   ;;  %v2080_v21 = vld [vmem:[%s3479_s3 + $0x1b8] sm:$0xff]  }
  0xcf   :  { %v386_v30 = vmul.f32 %v3205_v1, %v1658_v22  ;;  %v1661_v31 = vunpack.c.l.bf16 %v2014_v18  ;;  %1418 = vst [vmem:[%s3482_s6 + $0x318] sm:$0xff] %v1290_v24  ;;  %v906_v34 = vmul.f32 %v2698_v55, %v1914_v27  ;;  %v1917_v35 = vunpack.c.l.bf16 %v2077_v23 }
  0xd0   :  { %v1164_v32 = vadd.f32 %v1036_v25, %v516_v20  ;;  %v1037_v33 = vadd.f32 %v2692_v10, %v905_v26  ;;  %v1291_v36 = vmax.f32 %v1163_v28, 0.0  ;;  %v1662_v40 = vunpack.c.h.bf16 %v2014_v18  ;;  %v2078_v10 = vld [vmem:[%s3479_s3 + $0x1a8] sm:$0xff]  }
  0xd1   :  { %v518_v38 = vadd.f32 %v3219_v37, %v386_v30  ;;  %v387_v39 = vmul.f32 %v3205_v1, %v1661_v31  ;;  %v1038_v43 = vadd.f32 %v3229_v42, %v906_v34  ;;  %v907_v45 = vmul.f32 %v3235_v44, %v1917_v35  ;;  %v2018_v30 = vld [vmem:[%s3476_s0 + $0x1c0] sm:$0xff]  }
  0xd2   :  { %v1292_v55 = vmax.f32 %v1164_v32, 0.0  ;;  %v1165_v41 = vadd.f32 %v1037_v33, %v517_v29  ;;  %1419 = vst [vmem:[%s3482_s6 + $0x320] sm:$0xff] %v1291_v36  ;;  %v388_v47 = vmul.f32 %v3205_v1, %v1662_v40  ;;  %v1918_v3 = vunpack.c.h.bf16 %v2077_v23  ;;  %v2081_v35 = vld [vmem:[%s3479_s3 + $0x1c0] sm:$0xff]  }
  0xd3   :  { %v519_v46 = vadd.f32 %v3219_v37, %v387_v39  ;;  %v1665_v48 = vunpack.c.l.bf16 %v2015_v49  ;;  %v1166_v51 = vadd.f32 %v1038_v43, %v518_v38  ;;  %v1039_v52 = vadd.f32 %v3229_v42, %v907_v45 }
  0xd4   :  { %1420 = vst [vmem:[%s3482_s6 + $0x328] sm:$0xff] %v1292_v55  ;;  %v1293_v50 = vmax.f32 %v1165_v41, 0.0  ;;  %v1921_v7 = vunpack.c.l.bf16 %v2078_v10  ;;  %v520_v54 = vadd.f32 %v3219_v37, %v388_v47  ;;  %v908_v56 = vmul.f32 %v3235_v44, %v1918_v3  ;;  %v2019_v3 = vld [vmem:[%s3476_s0 + $0x1c8] sm:$0xff]  }
  0xd5   :  { %v389_v57 = vmul.f32 %v3205_v1, %v1665_v48  ;;  %v1666_v58 = vunpack.c.h.bf16 %v2015_v49  ;;  %v1294_v60 = vmax.f32 %v1166_v51, 0.0  ;;  %v1167_v61 = vadd.f32 %v1039_v52, %v519_v46 }
  0xd6   :  { %1421 = vst [vmem:[%s3482_s6 + $0x330] sm:$0xff] %v1293_v50  ;;  %v909_v62 = vmul.f32 %v3235_v44, %v1921_v7  ;;  %v1922_v63 = vunpack.c.h.bf16 %v2078_v10  ;;  %v1040_v0 = vadd.f32 %v3229_v42, %v908_v56  ;;  %v1669_v5 = vunpack.c.l.bf16 %v2016_v53  ;;  %v2082_v7 = vld [vmem:[%s3479_s3 + $0x1c8] sm:$0xff]  }
  0xd7   :  { %v521_v2 = vadd.f32 %v3219_v37, %v389_v57  ;;  %v390_v4 = vmul.f32 %v3205_v1, %v1666_v58  ;;  %1422 = vst [vmem:[%s3482_s6 + $0x338] sm:$0xff] %v1294_v60  ;;  %v1295_v6 = vmax.f32 %v1167_v61, 0.0  ;;  %v1925_v11 = vunpack.c.l.bf16 %v2079_v59 }
  0xd8   :  { %v1041_v8 = vadd.f32 %v3229_v42, %v909_v62  ;;  %v910_v9 = vmul.f32 %v3235_v44, %v1922_v63  ;;  %v1168_v13 = vadd.f32 %v1040_v0, %v520_v54  ;;  %v391_v15 = vmul.f32 %v3205_v1, %v1669_v5 }
  0xd9   :  { %v522_v14 = vadd.f32 %v3219_v37, %v390_v4  ;;  %v1670_v16 = vunpack.c.h.bf16 %v2016_v53  ;;  %1423 = vst [vmem:[%s3482_s6 + $0x340] sm:$0xff] %v1295_v6  ;;  %v911_v19 = vmul.f32 %v3235_v44, %v1925_v11  ;;  %v1926_v20 = vunpack.c.h.bf16 %v2079_v59  ;;  %v2020_v4 = vld [vmem:[%s3476_s0 + $0x1d0] sm:$0xff]  }
  0xda   :  { %v1169_v17 = vadd.f32 %v1041_v8, %v521_v2  ;;  %v1042_v18 = vadd.f32 %v3229_v42, %v910_v9  ;;  %v1296_v22 = vmax.f32 %v1168_v13, 0.0  ;;  %v523_v23 = vadd.f32 %v3219_v37, %v391_v15  ;;  %v2083_v11 = vld [vmem:[%s3479_s3 + $0x1d0] sm:$0xff]  }
  0xdb   :  { %v392_v24 = vmul.f32 %v3205_v1, %v1670_v16  ;;  %v1673_v25 = vunpack.c.l.bf16 %v2017_v12  ;;  %v1043_v28 = vadd.f32 %v3229_v42, %v911_v19  ;;  %v912_v29 = vmul.f32 %v3235_v44, %v1926_v20 }
  0xdc   :  { %v1297_v26 = vmax.f32 %v1169_v17, 0.0  ;;  %v1170_v27 = vadd.f32 %v1042_v18, %v522_v14  ;;  %1424 = vst [vmem:[%s3482_s6 + $0x348] sm:$0xff] %v1296_v22  ;;  %v1929_v33 = vunpack.c.l.bf16 %v2080_v21  ;;  %v1674_v34 = vunpack.c.h.bf16 %v2017_v12 }
  0xdd   :  { %v524_v31 = vadd.f32 %v3219_v37, %v392_v24  ;;  %v393_v32 = vmul.f32 %v3205_v1, %v1673_v25  ;;  %v1171_v36 = vadd.f32 %v1043_v28, %v523_v23  ;;  %v1044_v38 = vadd.f32 %v3229_v42, %v912_v29  ;;  %v2021_v24 = vld [vmem:[%s3476_s0 + $0x1d8] sm:$0xff]  }
  0xde   :  { %1425 = vst [vmem:[%s3482_s6 + $0x350] sm:$0xff] %v1297_v26  ;;  %v1298_v49 = vmax.f32 %v1170_v27, 0.0  ;;  %v1930_v39 = vunpack.c.h.bf16 %v2080_v21  ;;  %v913_v10 = vmul.f32 %v3235_v44, %v1929_v33  ;;  %v394_v55 = vmul.f32 %v3205_v1, %v1674_v34  ;;  %v2084_v29 = vld [vmem:[%s3479_s3 + $0x1d8] sm:$0xff]  }
  0xdf   :  { %v525_v40 = vadd.f32 %v3219_v37, %v393_v32  ;;  %v1677_v41 = vunpack.c.l.bf16 %v2018_v30  ;;  %v1299_v43 = vmax.f32 %v1171_v36, 0.0  ;;  %v1172_v45 = vadd.f32 %v1044_v38, %v524_v31 }
  0xe0   :  { %1426 = vst [vmem:[%s3482_s6 + $0x358] sm:$0xff] %v1298_v49  ;;  %v914_v46 = vmul.f32 %v3235_v44, %v1930_v39  ;;  %v1933_v47 = vunpack.c.l.bf16 %v2081_v35  ;;  %v1045_v48 = vadd.f32 %v3229_v42, %v913_v10  ;;  %v526_v50 = vadd.f32 %v3219_v37, %v394_v55  ;;  %v2022_v55 = vld [vmem:[%s3476_s0 + $0x1e0] sm:$0xff]  }
  0xe1   :  { %v395_v51 = vmul.f32 %v3205_v1, %v1677_v41  ;;  %v1678_v52 = vunpack.c.h.bf16 %v2018_v30  ;;  %1427 = vst [vmem:[%s3482_s6 + $0x360] sm:$0xff] %v1299_v43  ;;  %v1300_v53 = vmax.f32 %v1172_v45, 0.0  ;;  %v1934_v57 = vunpack.c.h.bf16 %v2081_v35 }
  0xe2   :  { %v1046_v54 = vadd.f32 %v3229_v42, %v914_v46  ;;  %v915_v56 = vmul.f32 %v3235_v44, %v1933_v47  ;;  %v1173_v58 = vadd.f32 %v1045_v48, %v525_v40  ;;  %v1681_v61 = vunpack.c.l.bf16 %v2019_v3 }
  0xe3   :  { %v527_v59 = vadd.f32 %v3219_v37, %v395_v51  ;;  %v396_v60 = vmul.f32 %v3205_v1, %v1678_v52  ;;  %1428 = vst [vmem:[%s3482_s6 + $0x368] sm:$0xff] %v1300_v53  ;;  %v916_v0 = vmul.f32 %v3235_v44, %v1934_v57  ;;  %v1937_v2 = vunpack.c.l.bf16 %v2082_v7  ;;  %v2085_v51 = vld [vmem:[%s3479_s3 + $0x1e0] sm:$0xff]  }
  0xe4   :  { %v1174_v62 = vadd.f32 %v1046_v54, %v526_v50  ;;  %v1047_v63 = vadd.f32 %v3229_v42, %v915_v56  ;;  %v1301_v5 = vmax.f32 %v1173_v58, 0.0  ;;  %v397_v8 = vmul.f32 %v3205_v1, %v1681_v61 }
  0xe5   :  { %v528_v6 = vadd.f32 %v3219_v37, %v396_v60  ;;  %v1682_v9 = vunpack.c.h.bf16 %v2019_v3  ;;  %v1048_v14 = vadd.f32 %v3229_v42, %v916_v0  ;;  %v917_v15 = vmul.f32 %v3235_v44, %v1937_v2  ;;  %v2023_v60 = vld [vmem:[%s3476_s0 + $0x1e8] sm:$0xff]  }
  0xe6   :  { %v1302_v12 = vmax.f32 %v1174_v62, 0.0  ;;  %v1175_v13 = vadd.f32 %v1047_v63, %v527_v59  ;;  %1429 = vst [vmem:[%s3482_s6 + $0x370] sm:$0xff] %v1301_v5  ;;  %v529_v16 = vadd.f32 %v3219_v37, %v397_v8  ;;  %v1938_v18 = vunpack.c.h.bf16 %v2082_v7  ;;  %v2086_v2 = vld [vmem:[%s3479_s3 + $0x1e8] sm:$0xff]  }
  0xe7   :  { %v398_v17 = vmul.f32 %v3205_v1, %v1682_v9  ;;  %v1685_v19 = vunpack.c.l.bf16 %v2020_v4  ;;  %v1176_v21 = vadd.f32 %v1048_v14, %v528_v6  ;;  %v1049_v22 = vadd.f32 %v3229_v42, %v917_v15 }
  0xe8   :  { %1430 = vst [vmem:[%s3482_s6 + $0x378] sm:$0xff] %v1302_v12  ;;  %v1303_v20 = vmax.f32 %v1175_v13, 0.0  ;;  %v1941_v23 = vunpack.c.l.bf16 %v2083_v11  ;;  %v918_v26 = vmul.f32 %v3235_v44, %v1938_v18  ;;  %v1686_v28 = vunpack.c.h.bf16 %v2020_v4  ;;  %v2024_v18 = vld [vmem:[%s3476_s0 + $0x1f0] sm:$0xff]  }
  0xe9   :  { %v530_v25 = vadd.f32 %v3219_v37, %v398_v17  ;;  %v399_v27 = vmul.f32 %v3205_v1, %v1685_v19  ;;  %v1304_v30 = vmax.f32 %v1176_v21, 0.0  ;;  %v1177_v31 = vadd.f32 %v1049_v22, %v529_v16 }
  0xea   :  { %1431 = vst [vmem:[%s3482_s6 + $0x380] sm:$0xff] %v1303_v20  ;;  %v919_v32 = vmul.f32 %v3235_v44, %v1941_v23  ;;  %v1942_v33 = vunpack.c.h.bf16 %v2083_v11  ;;  %v1050_v34 = vadd.f32 %v3229_v42, %v918_v26  ;;  %v400_v49 = vmul.f32 %v3205_v1, %v1686_v28  ;;  %v2087_v23 = vld [vmem:[%s3479_s3 + $0x1f0] sm:$0xff]  }
  0xeb   :  { %v531_v35 = vadd.f32 %v3219_v37, %v399_v27  ;;  %v1689_v36 = vunpack.c.l.bf16 %v2021_v24  ;;  %1432 = vst [vmem:[%s3482_s6 + $0x388] sm:$0xff] %v1304_v30  ;;  %v1305_v38 = vmax.f32 %v1177_v31, 0.0  ;;  %v1945_v10 = vunpack.c.l.bf16 %v2084_v29 }
  0xec   :  { %v1051_v39 = vadd.f32 %v3229_v42, %v919_v32  ;;  %v920_v40 = vmul.f32 %v3235_v44, %v1942_v33  ;;  %v1178_v41 = vadd.f32 %v1050_v34, %v530_v25  ;;  %v532_v43 = vadd.f32 %v3219_v37, %v400_v49  ;;  %v2025_v49 = vld [vmem:[%s3476_s0 + $0x1f8] sm:$0xff]  }
  0xed   :  { %v401_v45 = vmul.f32 %v3205_v1, %v1689_v36  ;;  %v1690_v46 = vunpack.c.h.bf16 %v2021_v24  ;;  %1433 = vst [vmem:[%s3482_s6 + $0x390] sm:$0xff] %v1305_v38  ;;  %v921_v48 = vmul.f32 %v3235_v44, %v1945_v10  ;;  %v1946_v50 = vunpack.c.h.bf16 %v2084_v29  ;;  %v2088_v10 = vld [vmem:[%s3479_s3 + $0x1f8] sm:$0xff]  }
  0xee   :  { %v1179_v47 = vadd.f32 %v1051_v39, %v531_v35  ;;  %v1052_v3 = vadd.f32 %v3229_v42, %v920_v40  ;;  %v1306_v52 = vmax.f32 %v1178_v41, 0.0  ;;  %v1693_v54 = vunpack.c.l.bf16 %v2022_v55 }
  0xef   :  { %v533_v7 = vadd.f32 %v3219_v37, %v401_v45  ;;  %v402_v53 = vmul.f32 %v3205_v1, %v1690_v46  ;;  %v1053_v58 = vadd.f32 %v3229_v42, %v921_v48  ;;  %v922_v59 = vmul.f32 %v3235_v44, %v1946_v50 }
  0xf0   :  { %v1307_v56 = vmax.f32 %v1179_v47, 0.0  ;;  %v1180_v57 = vadd.f32 %v1052_v3, %v532_v43  ;;  %1434 = vst [vmem:[%s3482_s6 + $0x398] sm:$0xff] %v1306_v52  ;;  %v403_v62 = vmul.f32 %v3205_v1, %v1693_v54  ;;  %v1949_v63 = vunpack.c.l.bf16 %v2085_v51 }
  0xf1   :  { %v534_v61 = vadd.f32 %v3219_v37, %v402_v53  ;;  %v1694_v0 = vunpack.c.h.bf16 %v2022_v55  ;;  %v1181_v5 = vadd.f32 %v1053_v58, %v533_v7  ;;  %v1054_v6 = vadd.f32 %v3229_v42, %v922_v59 }
  0xf2   :  { %1435 = vst [vmem:[%s3482_s6 + $0x3a0] sm:$0xff] %v1307_v56  ;;  %v1308_v4 = vmax.f32 %v1180_v57, 0.0  ;;  %v1950_v8 = vunpack.c.h.bf16 %v2085_v51  ;;  %v535_v9 = vadd.f32 %v3219_v37, %v403_v62  ;;  %v923_v11 = vmul.f32 %v3235_v44, %v1949_v63 }
  0xf3   :  { %v404_v12 = vmul.f32 %v3205_v1, %v1694_v0  ;;  %v1697_v13 = vunpack.c.l.bf16 %v2023_v60  ;;  %v1309_v14 = vmax.f32 %v1181_v5, 0.0  ;;  %v1182_v15 = vadd.f32 %v1054_v6, %v534_v61 }
  0xf4   :  { %1436 = vst [vmem:[%s3482_s6 + $0x3a8] sm:$0xff] %v1308_v4  ;;  %v924_v16 = vmul.f32 %v3235_v44, %v1950_v8  ;;  %v1953_v17 = vunpack.c.l.bf16 %v2086_v2  ;;  %v1055_v19 = vadd.f32 %v3229_v42, %v923_v11  ;;  %v1698_v22 = vunpack.c.h.bf16 %v2023_v60 }
  0xf5   :  { %v536_v20 = vadd.f32 %v3219_v37, %v404_v12  ;;  %v405_v21 = vmul.f32 %v3205_v1, %v1697_v13  ;;  %1437 = vst [vmem:[%s3482_s6 + $0x3b0] sm:$0xff] %v1309_v14  ;;  %v1310_v24 = vmax.f32 %v1182_v15, 0.0  ;;  %v1954_v27 = vunpack.c.h.bf16 %v2086_v2 }
  0xf6   :  { %v1056_v25 = vadd.f32 %v3229_v42, %v924_v16  ;;  %v925_v26 = vmul.f32 %v3235_v44, %v1953_v17  ;;  %v1183_v28 = vadd.f32 %v1055_v19, %v535_v9  ;;  %v406_v30 = vmul.f32 %v3205_v1, %v1698_v22 }
  0xf7   :  { %v537_v29 = vadd.f32 %v3219_v37, %v405_v21  ;;  %v1701_v31 = vunpack.c.l.bf16 %v2024_v18  ;;  %1438 = vst [vmem:[%s3482_s6 + $0x3b8] sm:$0xff] %v1310_v24  ;;  %v926_v34 = vmul.f32 %v3235_v44, %v1954_v27  ;;  %v1957_v35 = vunpack.c.l.bf16 %v2087_v23 }
  0xf8   :  { %v1184_v32 = vadd.f32 %v1056_v25, %v536_v20  ;;  %v1057_v33 = vadd.f32 %v3229_v42, %v925_v26  ;;  %v1311_v36 = vmax.f32 %v1183_v28, 0.0  ;;  %v538_v38 = vadd.f32 %v3219_v37, %v406_v30 }
  0xf9   :  { %v407_v39 = vmul.f32 %v3205_v1, %v1701_v31  ;;  %v1702_v40 = vunpack.c.h.bf16 %v2024_v18  ;;  %v1058_v43 = vadd.f32 %v3229_v42, %v926_v34  ;;  %v927_v45 = vmul.f32 %v3235_v44, %v1957_v35 }
  0xfa   :  { %v1312_v55 = vmax.f32 %v1184_v32, 0.0  ;;  %v1185_v41 = vadd.f32 %v1057_v33, %v537_v29  ;;  %1439 = vst [vmem:[%s3482_s6 + $0x3c0] sm:$0xff] %v1311_v36  ;;  %v1958_v3 = vunpack.c.h.bf16 %v2087_v23  ;;  %v1705_v48 = vunpack.c.l.bf16 %v2025_v49 }
  0xfb   :  { %v539_v46 = vadd.f32 %v3219_v37, %v407_v39  ;;  %v408_v47 = vmul.f32 %v3205_v1, %v1702_v40  ;;  %v1186_v51 = vadd.f32 %v1058_v43, %v538_v38  ;;  %v1059_v52 = vadd.f32 %v3229_v42, %v927_v45 }
  0xfc   :  { %1440 = vst [vmem:[%s3482_s6 + $0x3c8] sm:$0xff] %v1312_v55  ;;  %v1313_v50 = vmax.f32 %v1185_v41, 0.0  ;;  %v1961_v7 = vunpack.c.l.bf16 %v2088_v10  ;;  %v928_v54 = vmul.f32 %v3235_v44, %v1958_v3  ;;  %v409_v56 = vmul.f32 %v3205_v1, %v1705_v48 }
  0xfd   :  { %v540_v53 = vadd.f32 %v3219_v37, %v408_v47  ;;  %v1706_v57 = vunpack.c.h.bf16 %v2025_v49  ;;  %v1314_v58 = vmax.f32 %v1186_v51, 0.0  ;;  %v1187_v59 = vadd.f32 %v1059_v52, %v539_v46 }
  0xfe   :  { %1441 = vst [vmem:[%s3482_s6 + $0x3d0] sm:$0xff] %v1313_v50  ;;  %v929_v60 = vmul.f32 %v3235_v44, %v1961_v7  ;;  %v1962_v61 = vunpack.c.h.bf16 %v2088_v10  ;;  %v1060_v62 = vadd.f32 %v3229_v42, %v928_v54  ;;  %v541_v63 = vadd.f32 %v3219_v37, %v409_v56 }
  0xff   :  { %v410_v0 = vmul.f32 %v3205_v1, %v1706_v57  ;;  %1442 = vst [vmem:[%s3482_s6 + $0x3d8] sm:$0xff] %v1314_v58  ;;  %v1315_v2 = vmax.f32 %v1187_v59, 0.0 }
 0x100   :  { %v1061_v4 = vadd.f32 %v3229_v42, %v929_v60  ;;  %v930_v5 = vmul.f32 %v3235_v44, %v1962_v61  ;;  %v1188_v6 = vadd.f32 %v1060_v62, %v540_v53 }
 0x101   :  { %v542_v8 = vadd.f32 %v3219_v37, %v410_v0  ;;  %1443 = vst [vmem:[%s3482_s6 + $0x3e0] sm:$0xff] %v1315_v2 }
 0x102   :  { %v1189_v9 = vadd.f32 %v1061_v4, %v541_v63  ;;  %v1062_v11 = vadd.f32 %v3229_v42, %v930_v5  ;;  %v1316_v1 = vmax.f32 %v1188_v6, 0.0 }
 0x104   :  { %v1317_v12 = vmax.f32 %v1189_v9, 0.0  ;;  %v1190_v13 = vadd.f32 %v1062_v11, %v542_v8  ;;  %1444 = vst [vmem:[%s3482_s6 + $0x3e8] sm:$0xff] %v1316_v1 }
 0x106   :  { %1445 = vst [vmem:[%s3482_s6 + $0x3f0] sm:$0xff] %v1317_v12  ;;  %v1318_v44 = vmax.f32 %v1190_v13, 0.0 }
 0x108   :  { %1446 = vst [vmem:[%s3482_s6 + $0x3f8] sm:$0xff] %v1318_v44 }

</bundles_post_ra>
